<compile_context>
chip_gen: v5e
topology: v5e:2x2
jax: 0.10.0
libtpu: 0.0.40
codegen_flags: <defaults>
</compile_context>

<pallas_src>
import math
import functools

import jax
import jax.numpy as jnp
from jax.experimental import pallas as pl
from jax.experimental.pallas import tpu as pltpu

# --- hyperparameters implied by the PyTorch module -------------------------
INPUT_DIM = 5          # env.observation_space.shape[0]
ACTION_DIM = 3         # env.action_space.n
D_MODEL = 128
N_HEADS = 4
N_LAYERS = 2
D_FF = 2048            # nn.Transformer default dim_feedforward
HEAD_DIM = D_MODEL // N_HEADS
LN_EPS = 1e-5          # nn.LayerNorm / nn.Transformer default
F_PAD = 8              # feature dim zero-padded to one sublane


def _layer_norm(z, gamma, beta):
    mu = jnp.mean(z, axis=-1, keepdims=True)
    var = jnp.mean(jnp.square(z - mu), axis=-1, keepdims=True)
    return (z - mu) * jax.lax.rsqrt(var + LN_EPS) * gamma + beta


def actor_critic_kernel(B, S,
                        x_ref, pe_ref, w_emb_ref, b_emb_ref,
                        wqkv_ref, bqkv_ref, wo_ref, bo_ref, ln1_ref,
                        w1_ref, b1_ref, w2_ref, b2_ref, ln2_ref,
                        lnf_ref, wh_ref, bh_ref,
                        pol_ref, val_ref,
                        h_ref):
    f32 = jnp.float32
    bf16 = jnp.bfloat16
    scale = 1.0 / math.sqrt(HEAD_DIM)
    l = pl.program_id(0)

    # ----- layer 0 only: embedding (Linear 5->128, padded to 8) + PE --------
    @pl.when(l == 0)
    def _():
        emb = jnp.dot(x_ref[...], w_emb_ref[...], preferred_element_type=f32)
        emb = emb + b_emb_ref[...]
        pe = jnp.concatenate([pe_ref[...]] * B, axis=0)       # (B*S, D)
        h_ref[...] = emb + pe

    # ----- one post-norm transformer encoder layer (weights of layer `l`) ---
    h = h_ref[...]                                            # (B*S, D) f32
    hb = h.astype(bf16)

    # fused Q|K|V projection: one (B*S,128) x (128,384) matmul
    qkv = jnp.dot(hb, wqkv_ref[...], preferred_element_type=f32)
    qkv = qkv + bqkv_ref[...]                                 # (B*S, 3D)
    q = qkv[:, 0:D_MODEL] * scale
    k = qkv[:, D_MODEL:2 * D_MODEL]
    v = qkv[:, 2 * D_MODEL:3 * D_MODEL]

    # multi-head attention, batched over B per head (B-independent code)
    ctx_heads = []
    for hh in range(N_HEADS):                                 # static 4 iters
        c0 = hh * HEAD_DIM
        qh = q[:, c0:c0 + HEAD_DIM].reshape(B, S, HEAD_DIM)
        kh = k[:, c0:c0 + HEAD_DIM].reshape(B, S, HEAD_DIM)
        vh = v[:, c0:c0 + HEAD_DIM].reshape(B, S, HEAD_DIM)
        s = jnp.einsum('bqd,bkd->bqk', qh, kh,
                       preferred_element_type=f32)            # (B, S, S)
        m = jnp.max(s, axis=-1, keepdims=True)
        p = jnp.exp(s - m)
        p = p * pl.reciprocal(jnp.sum(p, axis=-1, keepdims=True), approx=True)
        ch = jnp.einsum('bqk,bkd->bqd', p, vh,
                        preferred_element_type=f32)           # (B, S, HD)
        ctx_heads.append(ch.reshape(B * S, HEAD_DIM))
    ctx = jnp.concatenate(ctx_heads, axis=-1)                 # (B*S, D)

    attn = jnp.dot(ctx.astype(bf16), wo_ref[...], preferred_element_type=f32)
    attn = attn + bo_ref[...]
    ln1 = ln1_ref[...]
    h1 = _layer_norm(h + attn, ln1[0:1, :], ln1[1:2, :])

    # feed-forward 128 -> 2048 -> 128 (relu), bf16 weights, f32 accumulate
    a1 = jnp.maximum(
        jnp.dot(h1.astype(bf16), w1_ref[...], preferred_element_type=f32)
        + b1_ref[...], 0.0)
    a2 = jnp.dot(a1.astype(bf16), w2_ref[...], preferred_element_type=f32)
    a2 = a2 + b2_ref[...]
    ln2 = ln2_ref[...]
    h2 = _layer_norm(h1 + a2, ln2[0:1, :], ln2[1:2, :])
    h_ref[...] = h2

    # ----- last layer only: final LN + fused policy/value heads on the
    #       B last-token rows (not all B*S rows) -----------------------------
    @pl.when(l == N_LAYERS - 1)
    def _():
        rows = [h2[(b + 1) * S - 1:(b + 1) * S, :] for b in range(B)]
        last = rows[0] if B == 1 else jnp.concatenate(rows, axis=0)  # (B, D)
        last = _layer_norm(last, lnf_ref[0:1, :], lnf_ref[1:2, :])
        heads = jnp.dot(last, wh_ref[...], preferred_element_type=f32)
        heads = heads + bh_ref[...]                           # (B, A+1)
        pol_ref[...] = heads[:, 0:ACTION_DIM]
        val_ref[...] = heads[:, ACTION_DIM:ACTION_DIM + 1]


# --------------------------- parameter setup (glue) -------------------------
def _xavier(key, shape):
    fan_in, fan_out = shape[-2], shape[-1]
    bound = math.sqrt(6.0 / (fan_in + fan_out))
    return jax.random.uniform(key, shape, jnp.float32, -bound, bound)


def init_params(key):
    ks = jax.random.split(key, 8)
    L, D, F = N_LAYERS, D_MODEL, D_FF
    p = {
        "w_emb": _xavier(ks[0], (INPUT_DIM, D)),
        "b_emb": jnp.zeros((1, D), jnp.float32),
        "wq": _xavier(ks[1], (L, D, D)),
        "wk": _xavier(ks[2], (L, D, D)),
        "wv": _xavier(ks[3], (L, D, D)),
        "wo": _xavier(ks[4], (L, D, D)),
        "b_attn": jnp.zeros((L, 4, D), jnp.float32),
        "ln1": jnp.stack([jnp.ones((L, D)), jnp.zeros((L, D))],
                         axis=1).astype(jnp.float32),          # (L,2,D)
        "w1": _xavier(ks[5], (L, D, F)),
        "b1": jnp.zeros((L, F), jnp.float32),
        "w2": _xavier(ks[6], (L, F, D)),
        "b2": jnp.zeros((L, D), jnp.float32),
        "ln2": jnp.stack([jnp.ones((L, D)), jnp.zeros((L, D))],
                         axis=1).astype(jnp.float32),
        "lnf": jnp.stack([jnp.ones((D,)), jnp.zeros((D,))],
                         axis=0).astype(jnp.float32),          # (2,D)
        "wp": _xavier(jax.random.fold_in(ks[7], 0), (D, ACTION_DIM)),
        "bp": jnp.zeros((1, ACTION_DIM), jnp.float32),
        "wvh": _xavier(jax.random.fold_in(ks[7], 1), (D, 1)),
        "bvh": jnp.zeros((1, 1), jnp.float32),
    }
    return p


def positional_encoding(S, D):
    pos = jnp.arange(S, dtype=jnp.float32)[:, None]
    div = jnp.exp(jnp.arange(0, D, 2, dtype=jnp.float32)
                  * (-math.log(10000.0) / D))
    pe = jnp.zeros((S, D), jnp.float32)
    pe = pe.at[:, 0::2].set(jnp.sin(pos * div))
    pe = pe.at[:, 1::2].set(jnp.cos(pos * div))
    return pe


# ------------------------------- wrapper ------------------------------------
def actor_critic_forward(x, params):
    B, S, F = x.shape
    assert F == INPUT_DIM
    f32 = jnp.float32
    bf16 = jnp.bfloat16
    L, D, FF = N_LAYERS, D_MODEL, D_FF

    x_flat = x.reshape(B * S, F).astype(f32)
    x_pad = jnp.zeros((B * S, F_PAD), f32).at[:, :F].set(x_flat)
    w_emb_pad = jnp.zeros((F_PAD, D), f32).at[:INPUT_DIM, :].set(params["w_emb"])
    pe = positional_encoding(S, D)                              # (S, D)

    # fuse Q|K|V per layer; cast big matmul weights to bf16 (f32 accum in-kernel)
    wqkv = jnp.concatenate([params["wq"], params["wk"], params["wv"]],
                           axis=-1).astype(bf16)                # (L, D, 3D)
    ba = params["b_attn"]                                       # (L, 4, D)
    b_qkv = jnp.concatenate([ba[:, 0, :], ba[:, 1, :], ba[:, 2, :]],
                            axis=-1).reshape(L, 1, 3 * D)
    wo = params["wo"].astype(bf16)
    b_o = ba[:, 3, :].reshape(L, 1, D)
    w1 = params["w1"].astype(bf16)
    b1 = params["b1"].reshape(L, 1, FF)
    w2 = params["w2"].astype(bf16)
    b2 = params["b2"].reshape(L, 1, D)
    # fuse policy / value heads into a single (D, 4) weight
    w_head = jnp.concatenate([params["wp"], params["wvh"]], axis=-1)  # (D, 4)
    b_head = jnp.concatenate([params["bp"], params["bvh"]], axis=-1)  # (1, 4)

    shared = (x_pad, pe, w_emb_pad, params["b_emb"])
    per_layer = (wqkv, b_qkv, wo, b_o, params["ln1"],
                 w1, b1, w2, b2, params["ln2"])
    tail = (params["lnf"], w_head, b_head)

    def full_spec(a):
        nd = a.ndim
        return pl.BlockSpec(a.shape, lambda l, _n=nd: (0,) * _n)

    def layer_spec(a):
        nd = a.ndim
        return pl.BlockSpec((None,) + a.shape[1:],
                            lambda l, _n=nd: (l,) + (0,) * (_n - 1))

    in_specs = ([full_spec(a) for a in shared]
                + [layer_spec(a) for a in per_layer]
                + [full_spec(a) for a in tail])
    out_specs = (pl.BlockSpec((B, ACTION_DIM), lambda l: (0, 0)),
                 pl.BlockSpec((B, 1), lambda l: (0, 0)))
    out_shape = (jax.ShapeDtypeStruct((B, ACTION_DIM), f32),
                 jax.ShapeDtypeStruct((B, 1), f32))

    kernel = functools.partial(actor_critic_kernel, B, S)
    return pl.pallas_call(
        kernel,
        out_shape=out_shape,
        grid=(N_LAYERS,),
        in_specs=in_specs,
        out_specs=out_specs,
        scratch_shapes=[pltpu.VMEM((B * S, D_MODEL), jnp.float32)],
        compiler_params=pltpu.CompilerParams(
            dimension_semantics=("arbitrary",),
            vmem_limit_bytes=16 * 1024 * 1024),
    )(*shared, *per_layer, *tail)


if __name__ == "__main__":
    B, S = 2, 8
    root = jax.random.PRNGKey(0)
    xkey, pkey = jax.random.split(root)
    x = jax.random.normal(xkey, (B, S, INPUT_DIM), dtype=jnp.float32)
    params = init_params(pkey)

    fwd = jax.jit(actor_critic_forward)
    policy_logits, value = fwd(x, params)
    jax.block_until_ready((policy_logits, value))

    assert policy_logits.shape == (B, ACTION_DIM)
    assert value.shape == (B, 1)
    assert bool(jnp.all(jnp.isfinite(policy_logits)))
    assert bool(jnp.all(jnp.isfinite(value)))
    print("KERNEL_OK")
</pallas_src>

<mosaic_0001>
module attributes {stable_mosaic.version = 11 : i64} {
  func.func @actor_critic_kernel(%arg0: i32, %arg1: memref<16x8xf32, #tpu.memory_space<vmem>>, %arg2: memref<8x128xf32, #tpu.memory_space<vmem>>, %arg3: memref<8x128xf32, #tpu.memory_space<vmem>>, %arg4: memref<1x128xf32, #tpu.memory_space<vmem>>, %arg5: memref<1x128x384xbf16, #tpu.memory_space<vmem>>, %arg6: memref<1x1x384xf32, #tpu.memory_space<vmem>>, %arg7: memref<1x128x128xbf16, #tpu.memory_space<vmem>>, %arg8: memref<1x1x128xf32, #tpu.memory_space<vmem>>, %arg9: memref<1x2x128xf32, #tpu.memory_space<vmem>>, %arg10: memref<1x128x2048xbf16, #tpu.memory_space<vmem>>, %arg11: memref<1x1x2048xf32, #tpu.memory_space<vmem>>, %arg12: memref<1x2048x128xbf16, #tpu.memory_space<vmem>>, %arg13: memref<1x1x128xf32, #tpu.memory_space<vmem>>, %arg14: memref<1x2x128xf32, #tpu.memory_space<vmem>>, %arg15: memref<2x128xf32, #tpu.memory_space<vmem>>, %arg16: memref<128x4xf32, #tpu.memory_space<vmem>>, %arg17: memref<1x4xf32, #tpu.memory_space<vmem>>, %arg18: memref<2x3xf32, #tpu.memory_space<vmem>>, %arg19: memref<2x1xf32, #tpu.memory_space<vmem>>, %arg20: memref<16x128xf32, #tpu.memory_space<vmem>>) attributes {dimension_semantics = [#tpu.dimension_semantics<arbitrary>], iteration_bounds = array<i64: 2>, scalar_prefetch = 0 : i64, scratch_operands = 1 : i64, tpu.core_type = #tpu.core_type<tc>, window_params = [{pipeline_mode = #tpu.pipeline_mode<synchronous>, transform_indices = @transform_0, window_bounds = array<i64: 16, 8>}, {pipeline_mode = #tpu.pipeline_mode<synchronous>, transform_indices = @transform_1, window_bounds = array<i64: 8, 128>}, {pipeline_mode = #tpu.pipeline_mode<synchronous>, transform_indices = @transform_2, window_bounds = array<i64: 8, 128>}, {pipeline_mode = #tpu.pipeline_mode<synchronous>, transform_indices = @transform_3, window_bounds = array<i64: 1, 128>}, {transform_indices = @transform_4, window_bounds = array<i64: 1, 128, 384>}, {transform_indices = @transform_5, window_bounds = array<i64: 1, 1, 384>}, {transform_indices = @transform_6, window_bounds = array<i64: 1, 128, 128>}, {transform_indices = @transform_7, window_bounds = array<i64: 1, 1, 128>}, {transform_indices = @transform_8, window_bounds = array<i64: 1, 2, 128>}, {transform_indices = @transform_9, window_bounds = array<i64: 1, 128, 2048>}, {transform_indices = @transform_10, window_bounds = array<i64: 1, 1, 2048>}, {transform_indices = @transform_11, window_bounds = array<i64: 1, 2048, 128>}, {transform_indices = @transform_12, window_bounds = array<i64: 1, 1, 128>}, {transform_indices = @transform_13, window_bounds = array<i64: 1, 2, 128>}, {pipeline_mode = #tpu.pipeline_mode<synchronous>, transform_indices = @transform_14, window_bounds = array<i64: 2, 128>}, {pipeline_mode = #tpu.pipeline_mode<synchronous>, transform_indices = @transform_15, window_bounds = array<i64: 128, 4>}, {pipeline_mode = #tpu.pipeline_mode<synchronous>, transform_indices = @transform_16, window_bounds = array<i64: 1, 4>}, {pipeline_mode = #tpu.pipeline_mode<synchronous>, transform_indices = @transform_17, window_bounds = array<i64: 2, 3>}, {pipeline_mode = #tpu.pipeline_mode<synchronous>, transform_indices = @transform_18, window_bounds = array<i64: 2, 1>}]} {
    %c0_i32 = arith.constant 0 : i32
    %0 = arith.cmpi eq, %arg0, %c0_i32 : i32
    %1 = arith.extui %0 : i1 to i32
    %c0_i32_0 = arith.constant 0 : i32
    %2 = arith.cmpi ne, %1, %c0_i32_0 : i32
    scf.if %2 {
      %c0_66 = arith.constant 0 : index
      %c0_67 = arith.constant 0 : index
      %178 = vector.load %arg1[%c0_66, %c0_67] : memref<16x8xf32, #tpu.memory_space<vmem>>, vector<16x8xf32>
      %c0_68 = arith.constant 0 : index
      %c0_69 = arith.constant 0 : index
      %179 = vector.load %arg3[%c0_68, %c0_69] : memref<8x128xf32, #tpu.memory_space<vmem>>, vector<8x128xf32>
      %cst_70 = arith.constant dense<0.000000e+00> : vector<16x128xf32>
      %180 = tpu.matmul %178, %179, %cst_70 {dimension_numbers = #tpu.dot_dimension_numbers<[1], [0], [0], [1], [0, 0, 1, 1], [], []>} : vector<16x8xf32>, vector<8x128xf32>, vector<16x128xf32> -> vector<16x128xf32>
      %c0_71 = arith.constant 0 : index
      %c0_72 = arith.constant 0 : index
      %181 = vector.load %arg4[%c0_71, %c0_72] : memref<1x128xf32, #tpu.memory_space<vmem>>, vector<1x128xf32>
      %182 = vector.broadcast %181 : vector<1x128xf32> to vector<16x128xf32>
      %183 = arith.addf %180, %182 : vector<16x128xf32>
      %c0_73 = arith.constant 0 : index
      %c0_74 = arith.constant 0 : index
      %184 = vector.load %arg2[%c0_73, %c0_74] : memref<8x128xf32, #tpu.memory_space<vmem>>, vector<8x128xf32>
      %185 = tpu.concatenate %184, %184 in 0 : vector<8x128xf32>, vector<8x128xf32> -> vector<16x128xf32>
      %186 = arith.addf %183, %185 : vector<16x128xf32>
      %c0_75 = arith.constant 0 : index
      %c0_76 = arith.constant 0 : index
      %187 = vector.load %arg20[%c0_75, %c0_76] : memref<16x128xf32, #tpu.memory_space<vmem>>, vector<16x128xf32>
      tpu.vector_store %arg20[%c0_75, %c0_76], %186 {strides = array<i32>} : memref<16x128xf32, #tpu.memory_space<vmem>>, vector<16x128xf32>,
    } else {
    }
    %c0 = arith.constant 0 : index
    %c0_1 = arith.constant 0 : index
    %3 = vector.load %arg20[%c0, %c0_1] : memref<16x128xf32, #tpu.memory_space<vmem>>, vector<16x128xf32>
    %4 = arith.truncf %3 : vector<16x128xf32> to vector<16x128xbf16>
    %c0_2 = arith.constant 0 : index
    %c0_3 = arith.constant 0 : index
    %c0_4 = arith.constant 0 : index
    %5 = vector.load %arg5[%c0_2, %c0_3, %c0_4] : memref<1x128x384xbf16, #tpu.memory_space<vmem>>, vector<1x128x384xbf16>
    %6 = vector.shape_cast %5 : vector<1x128x384xbf16> to vector<128x384xbf16>
    %cst = arith.constant dense<0.000000e+00> : vector<16x384xf32>
    %7 = tpu.matmul %4, %6, %cst {dimension_numbers = #tpu.dot_dimension_numbers<[1], [0], [0], [1], [0, 0, 1, 1], [], []>} : vector<16x128xbf16>, vector<128x384xbf16>, vector<16x384xf32> -> vector<16x384xf32>
    %c0_5 = arith.constant 0 : index
    %c0_6 = arith.constant 0 : index
    %c0_7 = arith.constant 0 : index
    %8 = vector.load %arg6[%c0_5, %c0_6, %c0_7] : memref<1x1x384xf32, #tpu.memory_space<vmem>>, vector<1x1x384xf32>
    %9 = vector.shape_cast %8 : vector<1x1x384xf32> to vector<1x384xf32>
    %10 = vector.broadcast %9 : vector<1x384xf32> to vector<16x384xf32>
    %11 = arith.addf %7, %10 : vector<16x384xf32>
    %12 = vector.extract_strided_slice %11 {offsets = [0, 0], sizes = [16, 128], strides = [1, 1]} : vector<16x384xf32> to vector<16x128xf32>
    %cst_8 = arith.constant 0.176776692 : f32
    %13 = vector.broadcast %cst_8 : f32 to vector<16x128xf32>
    %14 = arith.mulf %12, %13 : vector<16x128xf32>
    %15 = vector.extract_strided_slice %11 {offsets = [0, 128], sizes = [16, 128], strides = [1, 1]} : vector<16x384xf32> to vector<16x128xf32>
    %16 = vector.extract_strided_slice %11 {offsets = [0, 256], sizes = [16, 128], strides = [1, 1]} : vector<16x384xf32> to vector<16x128xf32>
    %17 = vector.extract_strided_slice %14 {offsets = [0, 0], sizes = [16, 32], strides = [1, 1]} : vector<16x128xf32> to vector<16x32xf32>
    %18 = vector.shape_cast %17 : vector<16x32xf32> to vector<2x8x32xf32>
    %19 = vector.extract_strided_slice %15 {offsets = [0, 0], sizes = [16, 32], strides = [1, 1]} : vector<16x128xf32> to vector<16x32xf32>
    %20 = vector.shape_cast %19 : vector<16x32xf32> to vector<2x8x32xf32>
    %21 = vector.extract_strided_slice %16 {offsets = [0, 0], sizes = [16, 32], strides = [1, 1]} : vector<16x128xf32> to vector<16x32xf32>
    %22 = vector.shape_cast %21 : vector<16x32xf32> to vector<2x8x32xf32>
    "tpu.trace_start"() <{level = 10 : i32, message = "bqd,bkd->bqk"}> : () -> ()
    %cst_9 = arith.constant dense<0.000000e+00> : vector<2x8x8xf32>
    %23 = tpu.matmul %18, %20, %cst_9 {dimension_numbers = #tpu.dot_dimension_numbers<[2], [2], [1], [1], [0, 0, 0, 1, 1, 1], [0], [0]>} : vector<2x8x32xf32>, vector<2x8x32xf32>, vector<2x8x8xf32> -> vector<2x8x8xf32>
    "tpu.trace_stop"() : () -> ()
    %cst_10 = arith.constant dense<0xFF800000> : vector<2x8xf32>
    %24 = vector.multi_reduction <maximumf>, %23, %cst_10 [2] : vector<2x8x8xf32> to vector<2x8xf32>
    %25 = vector.shape_cast %24 : vector<2x8xf32> to vector<2x8x1xf32>
    %26 = vector.broadcast %25 : vector<2x8x1xf32> to vector<2x8x8xf32>
    %27 = arith.subf %23, %26 : vector<2x8x8xf32>
    %28 = math.exp %27 : vector<2x8x8xf32>
    %cst_11 = arith.constant dense<0.000000e+00> : vector<2x8xf32>
    %29 = vector.multi_reduction <add>, %28, %cst_11 [2] : vector<2x8x8xf32> to vector<2x8xf32>
    %30 = vector.shape_cast %29 : vector<2x8xf32> to vector<2x8x1xf32>
    %31 = tpu.reciprocal %30 {approx = true} : vector<2x8x1xf32> -> vector<2x8x1xf32>
    %32 = vector.broadcast %31 : vector<2x8x1xf32> to vector<2x8x8xf32>
    %33 = arith.mulf %28, %32 : vector<2x8x8xf32>
    "tpu.trace_start"() <{level = 10 : i32, message = "bqk,bkd->bqd"}> : () -> ()
    %cst_12 = arith.constant dense<0.000000e+00> : vector<2x8x32xf32>
    %34 = tpu.matmul %33, %22, %cst_12 {dimension_numbers = #tpu.dot_dimension_numbers<[2], [1], [1], [2], [0, 0, 0, 1, 1, 2], [0], [0]>} : vector<2x8x8xf32>, vector<2x8x32xf32>, vector<2x8x32xf32> -> vector<2x8x32xf32>
    "tpu.trace_stop"() : () -> ()
    %35 = vector.shape_cast %34 : vector<2x8x32xf32> to vector<16x32xf32>
    %36 = vector.extract_strided_slice %14 {offsets = [0, 32], sizes = [16, 32], strides = [1, 1]} : vector<16x128xf32> to vector<16x32xf32>
    %37 = vector.shape_cast %36 : vector<16x32xf32> to vector<2x8x32xf32>
    %38 = vector.extract_strided_slice %15 {offsets = [0, 32], sizes = [16, 32], strides = [1, 1]} : vector<16x128xf32> to vector<16x32xf32>
    %39 = vector.shape_cast %38 : vector<16x32xf32> to vector<2x8x32xf32>
    %40 = vector.extract_strided_slice %16 {offsets = [0, 32], sizes = [16, 32], strides = [1, 1]} : vector<16x128xf32> to vector<16x32xf32>
    %41 = vector.shape_cast %40 : vector<16x32xf32> to vector<2x8x32xf32>
    "tpu.trace_start"() <{level = 10 : i32, message = "bqd,bkd->bqk"}> : () -> ()
    %cst_13 = arith.constant dense<0.000000e+00> : vector<2x8x8xf32>
    %42 = tpu.matmul %37, %39, %cst_13 {dimension_numbers = #tpu.dot_dimension_numbers<[2], [2], [1], [1], [0, 0, 0, 1, 1, 1], [0], [0]>} : vector<2x8x32xf32>, vector<2x8x32xf32>, vector<2x8x8xf32> -> vector<2x8x8xf32>
    "tpu.trace_stop"() : () -> ()
    %cst_14 = arith.constant dense<0xFF800000> : vector<2x8xf32>
    %43 = vector.multi_reduction <maximumf>, %42, %cst_14 [2] : vector<2x8x8xf32> to vector<2x8xf32>
    %44 = vector.shape_cast %43 : vector<2x8xf32> to vector<2x8x1xf32>
    %45 = vector.broadcast %44 : vector<2x8x1xf32> to vector<2x8x8xf32>
    %46 = arith.subf %42, %45 : vector<2x8x8xf32>
    %47 = math.exp %46 : vector<2x8x8xf32>
    %cst_15 = arith.constant dense<0.000000e+00> : vector<2x8xf32>
    %48 = vector.multi_reduction <add>, %47, %cst_15 [2] : vector<2x8x8xf32> to vector<2x8xf32>
    %49 = vector.shape_cast %48 : vector<2x8xf32> to vector<2x8x1xf32>
    %50 = tpu.reciprocal %49 {approx = true} : vector<2x8x1xf32> -> vector<2x8x1xf32>
    %51 = vector.broadcast %50 : vector<2x8x1xf32> to vector<2x8x8xf32>
    %52 = arith.mulf %47, %51 : vector<2x8x8xf32>
    "tpu.trace_start"() <{level = 10 : i32, message = "bqk,bkd->bqd"}> : () -> ()
    %cst_16 = arith.constant dense<0.000000e+00> : vector<2x8x32xf32>
    %53 = tpu.matmul %52, %41, %cst_16 {dimension_numbers = #tpu.dot_dimension_numbers<[2], [1], [1], [2], [0, 0, 0, 1, 1, 2], [0], [0]>} : vector<2x8x8xf32>, vector<2x8x32xf32>, vector<2x8x32xf32> -> vector<2x8x32xf32>
    "tpu.trace_stop"() : () -> ()
    %54 = vector.shape_cast %53 : vector<2x8x32xf32> to vector<16x32xf32>
    %55 = vector.extract_strided_slice %14 {offsets = [0, 64], sizes = [16, 32], strides = [1, 1]} : vector<16x128xf32> to vector<16x32xf32>
    %56 = vector.shape_cast %55 : vector<16x32xf32> to vector<2x8x32xf32>
    %57 = vector.extract_strided_slice %15 {offsets = [0, 64], sizes = [16, 32], strides = [1, 1]} : vector<16x128xf32> to vector<16x32xf32>
    %58 = vector.shape_cast %57 : vector<16x32xf32> to vector<2x8x32xf32>
    %59 = vector.extract_strided_slice %16 {offsets = [0, 64], sizes = [16, 32], strides = [1, 1]} : vector<16x128xf32> to vector<16x32xf32>
    %60 = vector.shape_cast %59 : vector<16x32xf32> to vector<2x8x32xf32>
    "tpu.trace_start"() <{level = 10 : i32, message = "bqd,bkd->bqk"}> : () -> ()
    %cst_17 = arith.constant dense<0.000000e+00> : vector<2x8x8xf32>
    %61 = tpu.matmul %56, %58, %cst_17 {dimension_numbers = #tpu.dot_dimension_numbers<[2], [2], [1], [1], [0, 0, 0, 1, 1, 1], [0], [0]>} : vector<2x8x32xf32>, vector<2x8x32xf32>, vector<2x8x8xf32> -> vector<2x8x8xf32>
    "tpu.trace_stop"() : () -> ()
    %cst_18 = arith.constant dense<0xFF800000> : vector<2x8xf32>
    %62 = vector.multi_reduction <maximumf>, %61, %cst_18 [2] : vector<2x8x8xf32> to vector<2x8xf32>
    %63 = vector.shape_cast %62 : vector<2x8xf32> to vector<2x8x1xf32>
    %64 = vector.broadcast %63 : vector<2x8x1xf32> to vector<2x8x8xf32>
    %65 = arith.subf %61, %64 : vector<2x8x8xf32>
    %66 = math.exp %65 : vector<2x8x8xf32>
    %cst_19 = arith.constant dense<0.000000e+00> : vector<2x8xf32>
    %67 = vector.multi_reduction <add>, %66, %cst_19 [2] : vector<2x8x8xf32> to vector<2x8xf32>
    %68 = vector.shape_cast %67 : vector<2x8xf32> to vector<2x8x1xf32>
    %69 = tpu.reciprocal %68 {approx = true} : vector<2x8x1xf32> -> vector<2x8x1xf32>
    %70 = vector.broadcast %69 : vector<2x8x1xf32> to vector<2x8x8xf32>
    %71 = arith.mulf %66, %70 : vector<2x8x8xf32>
    "tpu.trace_start"() <{level = 10 : i32, message = "bqk,bkd->bqd"}> : () -> ()
    %cst_20 = arith.constant dense<0.000000e+00> : vector<2x8x32xf32>
    %72 = tpu.matmul %71, %60, %cst_20 {dimension_numbers = #tpu.dot_dimension_numbers<[2], [1], [1], [2], [0, 0, 0, 1, 1, 2], [0], [0]>} : vector<2x8x8xf32>, vector<2x8x32xf32>, vector<2x8x32xf32> -> vector<2x8x32xf32>
    "tpu.trace_stop"() : () -> ()
    %73 = vector.shape_cast %72 : vector<2x8x32xf32> to vector<16x32xf32>
    %74 = vector.extract_strided_slice %14 {offsets = [0, 96], sizes = [16, 32], strides = [1, 1]} : vector<16x128xf32> to vector<16x32xf32>
    %75 = vector.shape_cast %74 : vector<16x32xf32> to vector<2x8x32xf32>
    %76 = vector.extract_strided_slice %15 {offsets = [0, 96], sizes = [16, 32], strides = [1, 1]} : vector<16x128xf32> to vector<16x32xf32>
    %77 = vector.shape_cast %76 : vector<16x32xf32> to vector<2x8x32xf32>
    %78 = vector.extract_strided_slice %16 {offsets = [0, 96], sizes = [16, 32], strides = [1, 1]} : vector<16x128xf32> to vector<16x32xf32>
    %79 = vector.shape_cast %78 : vector<16x32xf32> to vector<2x8x32xf32>
    "tpu.trace_start"() <{level = 10 : i32, message = "bqd,bkd->bqk"}> : () -> ()
    %cst_21 = arith.constant dense<0.000000e+00> : vector<2x8x8xf32>
    %80 = tpu.matmul %75, %77, %cst_21 {dimension_numbers = #tpu.dot_dimension_numbers<[2], [2], [1], [1], [0, 0, 0, 1, 1, 1], [0], [0]>} : vector<2x8x32xf32>, vector<2x8x32xf32>, vector<2x8x8xf32> -> vector<2x8x8xf32>
    "tpu.trace_stop"() : () -> ()
    %cst_22 = arith.constant dense<0xFF800000> : vector<2x8xf32>
    %81 = vector.multi_reduction <maximumf>, %80, %cst_22 [2] : vector<2x8x8xf32> to vector<2x8xf32>
    %82 = vector.shape_cast %81 : vector<2x8xf32> to vector<2x8x1xf32>
    %83 = vector.broadcast %82 : vector<2x8x1xf32> to vector<2x8x8xf32>
    %84 = arith.subf %80, %83 : vector<2x8x8xf32>
    %85 = math.exp %84 : vector<2x8x8xf32>
    %cst_23 = arith.constant dense<0.000000e+00> : vector<2x8xf32>
    %86 = vector.multi_reduction <add>, %85, %cst_23 [2] : vector<2x8x8xf32> to vector<2x8xf32>
    %87 = vector.shape_cast %86 : vector<2x8xf32> to vector<2x8x1xf32>
    %88 = tpu.reciprocal %87 {approx = true} : vector<2x8x1xf32> -> vector<2x8x1xf32>
    %89 = vector.broadcast %88 : vector<2x8x1xf32> to vector<2x8x8xf32>
    %90 = arith.mulf %85, %89 : vector<2x8x8xf32>
    "tpu.trace_start"() <{level = 10 : i32, message = "bqk,bkd->bqd"}> : () -> ()
    %cst_24 = arith.constant dense<0.000000e+00> : vector<2x8x32xf32>
    %91 = tpu.matmul %90, %79, %cst_24 {dimension_numbers = #tpu.dot_dimension_numbers<[2], [1], [1], [2], [0, 0, 0, 1, 1, 2], [0], [0]>} : vector<2x8x8xf32>, vector<2x8x32xf32>, vector<2x8x32xf32> -> vector<2x8x32xf32>
    "tpu.trace_stop"() : () -> ()
    %92 = vector.shape_cast %91 : vector<2x8x32xf32> to vector<16x32xf32>
    %93 = tpu.concatenate %35, %54, %73, %92 in 1 : vector<16x32xf32>, vector<16x32xf32>, vector<16x32xf32>, vector<16x32xf32> -> vector<16x128xf32>
    %94 = arith.truncf %93 : vector<16x128xf32> to vector<16x128xbf16>
    %c0_25 = arith.constant 0 : index
    %c0_26 = arith.constant 0 : index
    %c0_27 = arith.constant 0 : index
    %95 = vector.load %arg7[%c0_25, %c0_26, %c0_27] : memref<1x128x128xbf16, #tpu.memory_space<vmem>>, vector<1x128x128xbf16>
    %96 = vector.shape_cast %95 : vector<1x128x128xbf16> to vector<128x128xbf16>
    %cst_28 = arith.constant dense<0.000000e+00> : vector<16x128xf32>
    %97 = tpu.matmul %94, %96, %cst_28 {dimension_numbers = #tpu.dot_dimension_numbers<[1], [0], [0], [1], [0, 0, 1, 1], [], []>} : vector<16x128xbf16>, vector<128x128xbf16>, vector<16x128xf32> -> vector<16x128xf32>
    %c0_29 = arith.constant 0 : index
    %c0_30 = arith.constant 0 : index
    %c0_31 = arith.constant 0 : index
    %98 = vector.load %arg8[%c0_29, %c0_30, %c0_31] : memref<1x1x128xf32, #tpu.memory_space<vmem>>, vector<1x1x128xf32>
    %99 = vector.shape_cast %98 : vector<1x1x128xf32> to vector<1x128xf32>
    %100 = vector.broadcast %99 : vector<1x128xf32> to vector<16x128xf32>
    %101 = arith.addf %97, %100 : vector<16x128xf32>
    %c0_32 = arith.constant 0 : index
    %c0_33 = arith.constant 0 : index
    %c0_34 = arith.constant 0 : index
    %102 = vector.load %arg9[%c0_32, %c0_33, %c0_34] : memref<1x2x128xf32, #tpu.memory_space<vmem>>, vector<1x2x128xf32>
    %103 = vector.shape_cast %102 : vector<1x2x128xf32> to vector<2x128xf32>
    %104 = arith.addf %3, %101 : vector<16x128xf32>
    %105 = vector.extract_strided_slice %103 {offsets = [0, 0], sizes = [1, 128], strides = [1, 1]} : vector<2x128xf32> to vector<1x128xf32>
    %106 = vector.extract_strided_slice %103 {offsets = [1, 0], sizes = [1, 128], strides = [1, 1]} : vector<2x128xf32> to vector<1x128xf32>
    %cst_35 = arith.constant dense<0.000000e+00> : vector<16xf32>
    %107 = vector.multi_reduction <add>, %104, %cst_35 [1] : vector<16x128xf32> to vector<16xf32>
    %108 = vector.shape_cast %107 : vector<16xf32> to vector<16x1xf32>
    %cst_36 = arith.constant 1.280000e+02 : f32
    %109 = vector.broadcast %cst_36 : f32 to vector<16x1xf32>
    %110 = arith.divf %108, %109 : vector<16x1xf32>
    %111 = vector.broadcast %110 : vector<16x1xf32> to vector<16x128xf32>
    %112 = arith.subf %104, %111 : vector<16x128xf32>
    %113 = arith.mulf %112, %112 : vector<16x128xf32>
    %cst_37 = arith.constant dense<0.000000e+00> : vector<16xf32>
    %114 = vector.multi_reduction <add>, %113, %cst_37 [1] : vector<16x128xf32> to vector<16xf32>
    %115 = vector.shape_cast %114 : vector<16xf32> to vector<16x1xf32>
    %cst_38 = arith.constant 1.280000e+02 : f32
    %116 = vector.broadcast %cst_38 : f32 to vector<16x1xf32>
    %117 = arith.divf %115, %116 : vector<16x1xf32>
    %118 = vector.broadcast %110 : vector<16x1xf32> to vector<16x128xf32>
    %119 = arith.subf %104, %118 : vector<16x128xf32>
    %cst_39 = arith.constant 9.99999974E-6 : f32
    %120 = vector.broadcast %cst_39 : f32 to vector<16x1xf32>
    %121 = arith.addf %117, %120 : vector<16x1xf32>
    %122 = math.rsqrt %121 : vector<16x1xf32>
    %123 = vector.broadcast %122 : vector<16x1xf32> to vector<16x128xf32>
    %124 = arith.mulf %119, %123 : vector<16x128xf32>
    %125 = vector.broadcast %105 : vector<1x128xf32> to vector<16x128xf32>
    %126 = arith.mulf %124, %125 : vector<16x128xf32>
    %127 = vector.broadcast %106 : vector<1x128xf32> to vector<16x128xf32>
    %128 = arith.addf %126, %127 : vector<16x128xf32>
    %129 = arith.truncf %128 : vector<16x128xf32> to vector<16x128xbf16>
    %c0_40 = arith.constant 0 : index
    %c0_41 = arith.constant 0 : index
    %c0_42 = arith.constant 0 : index
    %130 = vector.load %arg10[%c0_40, %c0_41, %c0_42] : memref<1x128x2048xbf16, #tpu.memory_space<vmem>>, vector<1x128x2048xbf16>
    %131 = vector.shape_cast %130 : vector<1x128x2048xbf16> to vector<128x2048xbf16>
    %cst_43 = arith.constant dense<0.000000e+00> : vector<16x2048xf32>
    %132 = tpu.matmul %129, %131, %cst_43 {dimension_numbers = #tpu.dot_dimension_numbers<[1], [0], [0], [1], [0, 0, 1, 1], [], []>} : vector<16x128xbf16>, vector<128x2048xbf16>, vector<16x2048xf32> -> vector<16x2048xf32>
    %c0_44 = arith.constant 0 : index
    %c0_45 = arith.constant 0 : index
    %c0_46 = arith.constant 0 : index
    %133 = vector.load %arg11[%c0_44, %c0_45, %c0_46] : memref<1x1x2048xf32, #tpu.memory_space<vmem>>, vector<1x1x2048xf32>
    %134 = vector.shape_cast %133 : vector<1x1x2048xf32> to vector<1x2048xf32>
    %135 = vector.broadcast %134 : vector<1x2048xf32> to vector<16x2048xf32>
    %136 = arith.addf %132, %135 : vector<16x2048xf32>
    %cst_47 = arith.constant 0.000000e+00 : f32
    %137 = vector.broadcast %cst_47 : f32 to vector<16x2048xf32>
    %138 = arith.maximumf %136, %137 : vector<16x2048xf32>
    %139 = arith.truncf %138 : vector<16x2048xf32> to vector<16x2048xbf16>
    %c0_48 = arith.constant 0 : index
    %c0_49 = arith.constant 0 : index
    %c0_50 = arith.constant 0 : index
    %140 = vector.load %arg12[%c0_48, %c0_49, %c0_50] : memref<1x2048x128xbf16, #tpu.memory_space<vmem>>, vector<1x2048x128xbf16>
    %141 = vector.shape_cast %140 : vector<1x2048x128xbf16> to vector<2048x128xbf16>
    %cst_51 = arith.constant dense<0.000000e+00> : vector<16x128xf32>
    %142 = tpu.matmul %139, %141, %cst_51 {dimension_numbers = #tpu.dot_dimension_numbers<[1], [0], [0], [1], [0, 0, 1, 1], [], []>} : vector<16x2048xbf16>, vector<2048x128xbf16>, vector<16x128xf32> -> vector<16x128xf32>
    %c0_52 = arith.constant 0 : index
    %c0_53 = arith.constant 0 : index
    %c0_54 = arith.constant 0 : index
    %143 = vector.load %arg13[%c0_52, %c0_53, %c0_54] : memref<1x1x128xf32, #tpu.memory_space<vmem>>, vector<1x1x128xf32>
    %144 = vector.shape_cast %143 : vector<1x1x128xf32> to vector<1x128xf32>
    %145 = vector.broadcast %144 : vector<1x128xf32> to vector<16x128xf32>
    %146 = arith.addf %142, %145 : vector<16x128xf32>
    %c0_55 = arith.constant 0 : index
    %c0_56 = arith.constant 0 : index
    %c0_57 = arith.constant 0 : index
    %147 = vector.load %arg14[%c0_55, %c0_56, %c0_57] : memref<1x2x128xf32, #tpu.memory_space<vmem>>, vector<1x2x128xf32>
    %148 = vector.shape_cast %147 : vector<1x2x128xf32> to vector<2x128xf32>
    %149 = arith.addf %128, %146 : vector<16x128xf32>
    %150 = vector.extract_strided_slice %148 {offsets = [0, 0], sizes = [1, 128], strides = [1, 1]} : vector<2x128xf32> to vector<1x128xf32>
    %151 = vector.extract_strided_slice %148 {offsets = [1, 0], sizes = [1, 128], strides = [1, 1]} : vector<2x128xf32> to vector<1x128xf32>
    %cst_58 = arith.constant dense<0.000000e+00> : vector<16xf32>
    %152 = vector.multi_reduction <add>, %149, %cst_58 [1] : vector<16x128xf32> to vector<16xf32>
    %153 = vector.shape_cast %152 : vector<16xf32> to vector<16x1xf32>
    %cst_59 = arith.constant 1.280000e+02 : f32
    %154 = vector.broadcast %cst_59 : f32 to vector<16x1xf32>
    %155 = arith.divf %153, %154 : vector<16x1xf32>
    %156 = vector.broadcast %155 : vector<16x1xf32> to vector<16x128xf32>
    %157 = arith.subf %149, %156 : vector<16x128xf32>
    %158 = arith.mulf %157, %157 : vector<16x128xf32>
    %cst_60 = arith.constant dense<0.000000e+00> : vector<16xf32>
    %159 = vector.multi_reduction <add>, %158, %cst_60 [1] : vector<16x128xf32> to vector<16xf32>
    %160 = vector.shape_cast %159 : vector<16xf32> to vector<16x1xf32>
    %cst_61 = arith.constant 1.280000e+02 : f32
    %161 = vector.broadcast %cst_61 : f32 to vector<16x1xf32>
    %162 = arith.divf %160, %161 : vector<16x1xf32>
    %163 = vector.broadcast %155 : vector<16x1xf32> to vector<16x128xf32>
    %164 = arith.subf %149, %163 : vector<16x128xf32>
    %cst_62 = arith.constant 9.99999974E-6 : f32
    %165 = vector.broadcast %cst_62 : f32 to vector<16x1xf32>
    %166 = arith.addf %162, %165 : vector<16x1xf32>
    %167 = math.rsqrt %166 : vector<16x1xf32>
    %168 = vector.broadcast %167 : vector<16x1xf32> to vector<16x128xf32>
    %169 = arith.mulf %164, %168 : vector<16x128xf32>
    %170 = vector.broadcast %150 : vector<1x128xf32> to vector<16x128xf32>
    %171 = arith.mulf %169, %170 : vector<16x128xf32>
    %172 = vector.broadcast %151 : vector<1x128xf32> to vector<16x128xf32>
    %173 = arith.addf %171, %172 : vector<16x128xf32>
    %c0_63 = arith.constant 0 : index
    %c0_64 = arith.constant 0 : index
    %174 = vector.load %arg20[%c0_63, %c0_64] : memref<16x128xf32, #tpu.memory_space<vmem>>, vector<16x128xf32>
    tpu.vector_store %arg20[%c0_63, %c0_64], %173 {strides = array<i32>} : memref<16x128xf32, #tpu.memory_space<vmem>>, vector<16x128xf32>,
    %c1_i32 = arith.constant 1 : i32
    %175 = arith.cmpi eq, %arg0, %c1_i32 : i32
    %176 = arith.extui %175 : i1 to i32
    %c0_i32_65 = arith.constant 0 : i32
    %177 = arith.cmpi ne, %176, %c0_i32_65 : i32
    scf.if %177 {
      %178 = vector.extract_strided_slice %173 {offsets = [7, 0], sizes = [1, 128], strides = [1, 1]} : vector<16x128xf32> to vector<1x128xf32>
      %179 = vector.extract_strided_slice %173 {offsets = [15, 0], sizes = [1, 128], strides = [1, 1]} : vector<16x128xf32> to vector<1x128xf32>
      %180 = tpu.concatenate %178, %179 in 0 : vector<1x128xf32>, vector<1x128xf32> -> vector<2x128xf32>
      %c0_66 = arith.constant 0 : index
      %c0_67 = arith.constant 0 : index
      %181 = vector.load %arg15[%c0_66, %c0_67] : memref<2x128xf32, #tpu.memory_space<vmem>>, vector<1x128xf32>
      %c1 = arith.constant 1 : index
      %c0_68 = arith.constant 0 : index
      %182 = vector.load %arg15[%c1, %c0_68] : memref<2x128xf32, #tpu.memory_space<vmem>>, vector<1x128xf32>
      %cst_69 = arith.constant dense<0.000000e+00> : vector<2xf32>
      %183 = vector.multi_reduction <add>, %180, %cst_69 [1] : vector<2x128xf32> to vector<2xf32>
      %184 = vector.shape_cast %183 : vector<2xf32> to vector<2x1xf32>
      %cst_70 = arith.constant 1.280000e+02 : f32
      %185 = vector.broadcast %cst_70 : f32 to vector<2x1xf32>
      %186 = arith.divf %184, %185 : vector<2x1xf32>
      %187 = vector.broadcast %186 : vector<2x1xf32> to vector<2x128xf32>
      %188 = arith.subf %180, %187 : vector<2x128xf32>
      %189 = arith.mulf %188, %188 : vector<2x128xf32>
      %cst_71 = arith.constant dense<0.000000e+00> : vector<2xf32>
      %190 = vector.multi_reduction <add>, %189, %cst_71 [1] : vector<2x128xf32> to vector<2xf32>
      %191 = vector.shape_cast %190 : vector<2xf32> to vector<2x1xf32>
      %cst_72 = arith.constant 1.280000e+02 : f32
      %192 = vector.broadcast %cst_72 : f32 to vector<2x1xf32>
      %193 = arith.divf %191, %192 : vector<2x1xf32>
      %194 = vector.broadcast %186 : vector<2x1xf32> to vector<2x128xf32>
      %195 = arith.subf %180, %194 : vector<2x128xf32>
      %cst_73 = arith.constant 9.99999974E-6 : f32
      %196 = vector.broadcast %cst_73 : f32 to vector<2x1xf32>
      %197 = arith.addf %193, %196 : vector<2x1xf32>
      %198 = math.rsqrt %197 : vector<2x1xf32>
      %199 = vector.broadcast %198 : vector<2x1xf32> to vector<2x128xf32>
      %200 = arith.mulf %195, %199 : vector<2x128xf32>
      %201 = vector.broadcast %181 : vector<1x128xf32> to vector<2x128xf32>
      %202 = arith.mulf %200, %201 : vector<2x128xf32>
      %203 = vector.broadcast %182 : vector<1x128xf32> to vector<2x128xf32>
      %204 = arith.addf %202, %203 : vector<2x128xf32>
      %c0_74 = arith.constant 0 : index
      %c0_75 = arith.constant 0 : index
      %205 = vector.load %arg16[%c0_74, %c0_75] : memref<128x4xf32, #tpu.memory_space<vmem>>, vector<128x4xf32>
      %cst_76 = arith.constant dense<0.000000e+00> : vector<2x4xf32>
      %206 = tpu.matmul %204, %205, %cst_76 {dimension_numbers = #tpu.dot_dimension_numbers<[1], [0], [0], [1], [0, 0, 1, 1], [], []>} : vector<2x128xf32>, vector<128x4xf32>, vector<2x4xf32> -> vector<2x4xf32>
      %c0_77 = arith.constant 0 : index
      %c0_78 = arith.constant 0 : index
      %207 = vector.load %arg17[%c0_77, %c0_78] : memref<1x4xf32, #tpu.memory_space<vmem>>, vector<1x4xf32>
      %208 = vector.broadcast %207 : vector<1x4xf32> to vector<2x4xf32>
      %209 = arith.addf %206, %208 : vector<2x4xf32>
      %210 = vector.extract_strided_slice %209 {offsets = [0, 0], sizes = [2, 3], strides = [1, 1]} : vector<2x4xf32> to vector<2x3xf32>
      %c0_79 = arith.constant 0 : index
      %c0_80 = arith.constant 0 : index
      %211 = vector.load %arg18[%c0_79, %c0_80] : memref<2x3xf32, #tpu.memory_space<vmem>>, vector<2x3xf32>
      tpu.vector_store %arg18[%c0_79, %c0_80], %210 {strides = array<i32>} : memref<2x3xf32, #tpu.memory_space<vmem>>, vector<2x3xf32>,
      %212 = vector.extract_strided_slice %209 {offsets = [0, 3], sizes = [2, 1], strides = [1, 1]} : vector<2x4xf32> to vector<2x1xf32>
      %c0_81 = arith.constant 0 : index
      %c0_82 = arith.constant 0 : index
      %213 = vector.load %arg19[%c0_81, %c0_82] : memref<2x1xf32, #tpu.memory_space<vmem>>, vector<2x1xf32>
      tpu.vector_store %arg19[%c0_81, %c0_82], %212 {strides = array<i32>} : memref<2x1xf32, #tpu.memory_space<vmem>>, vector<2x1xf32>,
    } else {
    }
    return
  }
  func.func @transform_0(%arg0: i32) -> (i32, i32) {
    %c0_i32 = arith.constant 0 : i32
    %c0_i32_0 = arith.constant 0 : i32
    %c0_i32_1 = arith.constant 0 : i32
    return %c0_i32, %c0_i32_0 : i32, i32
  }
  func.func @transform_1(%arg0: i32) -> (i32, i32) {
    %c0_i32 = arith.constant 0 : i32
    %c0_i32_0 = arith.constant 0 : i32
    %c0_i32_1 = arith.constant 0 : i32
    return %c0_i32, %c0_i32_0 : i32, i32
  }
  func.func @transform_2(%arg0: i32) -> (i32, i32) {
    %c0_i32 = arith.constant 0 : i32
    %c0_i32_0 = arith.constant 0 : i32
    %c0_i32_1 = arith.constant 0 : i32
    return %c0_i32, %c0_i32_0 : i32, i32
  }
  func.func @transform_3(%arg0: i32) -> (i32, i32) {
    %c0_i32 = arith.constant 0 : i32
    %c0_i32_0 = arith.constant 0 : i32
    %c0_i32_1 = arith.constant 0 : i32
    return %c0_i32, %c0_i32_0 : i32, i32
  }
  func.func @transform_4(%arg0: i32) -> (i32, i32, i32) {
    %c0_i32 = arith.constant 0 : i32
    %c0_i32_0 = arith.constant 0 : i32
    %c0_i32_1 = arith.constant 0 : i32
    return %arg0, %c0_i32, %c0_i32_0 : i32, i32, i32
  }
  func.func @transform_5(%arg0: i32) -> (i32, i32, i32) {
    %c0_i32 = arith.constant 0 : i32
    %c0_i32_0 = arith.constant 0 : i32
    %c0_i32_1 = arith.constant 0 : i32
    return %arg0, %c0_i32, %c0_i32_0 : i32, i32, i32
  }
  func.func @transform_6(%arg0: i32) -> (i32, i32, i32) {
    %c0_i32 = arith.constant 0 : i32
    %c0_i32_0 = arith.constant 0 : i32
    %c0_i32_1 = arith.constant 0 : i32
    return %arg0, %c0_i32, %c0_i32_0 : i32, i32, i32
  }
  func.func @transform_7(%arg0: i32) -> (i32, i32, i32) {
    %c0_i32 = arith.constant 0 : i32
    %c0_i32_0 = arith.constant 0 : i32
    %c0_i32_1 = arith.constant 0 : i32
    return %arg0, %c0_i32, %c0_i32_0 : i32, i32, i32
  }
  func.func @transform_8(%arg0: i32) -> (i32, i32, i32) {
    %c0_i32 = arith.constant 0 : i32
    %c0_i32_0 = arith.constant 0 : i32
    %c0_i32_1 = arith.constant 0 : i32
    return %arg0, %c0_i32, %c0_i32_0 : i32, i32, i32
  }
  func.func @transform_9(%arg0: i32) -> (i32, i32, i32) {
    %c0_i32 = arith.constant 0 : i32
    %c0_i32_0 = arith.constant 0 : i32
    %c0_i32_1 = arith.constant 0 : i32
    return %arg0, %c0_i32, %c0_i32_0 : i32, i32, i32
  }
  func.func @transform_10(%arg0: i32) -> (i32, i32, i32) {
    %c0_i32 = arith.constant 0 : i32
    %c0_i32_0 = arith.constant 0 : i32
    %c0_i32_1 = arith.constant 0 : i32
    return %arg0, %c0_i32, %c0_i32_0 : i32, i32, i32
  }
  func.func @transform_11(%arg0: i32) -> (i32, i32, i32) {
    %c0_i32 = arith.constant 0 : i32
    %c0_i32_0 = arith.constant 0 : i32
    %c0_i32_1 = arith.constant 0 : i32
    return %arg0, %c0_i32, %c0_i32_0 : i32, i32, i32
  }
  func.func @transform_12(%arg0: i32) -> (i32, i32, i32) {
    %c0_i32 = arith.constant 0 : i32
    %c0_i32_0 = arith.constant 0 : i32
    %c0_i32_1 = arith.constant 0 : i32
    return %arg0, %c0_i32, %c0_i32_0 : i32, i32, i32
  }
  func.func @transform_13(%arg0: i32) -> (i32, i32, i32) {
    %c0_i32 = arith.constant 0 : i32
    %c0_i32_0 = arith.constant 0 : i32
    %c0_i32_1 = arith.constant 0 : i32
    return %arg0, %c0_i32, %c0_i32_0 : i32, i32, i32
  }
  func.func @transform_14(%arg0: i32) -> (i32, i32) {
    %c0_i32 = arith.constant 0 : i32
    %c0_i32_0 = arith.constant 0 : i32
    %c0_i32_1 = arith.constant 0 : i32
    return %c0_i32, %c0_i32_0 : i32, i32
  }
  func.func @transform_15(%arg0: i32) -> (i32, i32) {
    %c0_i32 = arith.constant 0 : i32
    %c0_i32_0 = arith.constant 0 : i32
    %c0_i32_1 = arith.constant 0 : i32
    return %c0_i32, %c0_i32_0 : i32, i32
  }
  func.func @transform_16(%arg0: i32) -> (i32, i32) {
    %c0_i32 = arith.constant 0 : i32
    %c0_i32_0 = arith.constant 0 : i32
    %c0_i32_1 = arith.constant 0 : i32
    return %c0_i32, %c0_i32_0 : i32, i32
  }
  func.func @transform_17(%arg0: i32) -> (i32, i32) {
    %c0_i32 = arith.constant 0 : i32
    %c0_i32_0 = arith.constant 0 : i32
    %c0_i32_1 = arith.constant 0 : i32
    return %c0_i32, %c0_i32_0 : i32, i32
  }
  func.func @transform_18(%arg0: i32) -> (i32, i32) {
    %c0_i32 = arith.constant 0 : i32
    %c0_i32_0 = arith.constant 0 : i32
    %c0_i32_1 = arith.constant 0 : i32
    return %c0_i32, %c0_i32_0 : i32, i32
  }
}

</mosaic_0001>

<bundles_post_ra>
// kernel: actor_critic_forward.1
= control target key start
LH: loop header
LB: loop body
LE: loop exit
PB: predicated region body
PF: predicated region fallthrough
CT: control target
= control target key end

     0   :  { %s6825_s0 = inlined_call_operand.vmem [shape: f32[16,8], index: 0, kind: input, shape index: {}]   ;;  %s6826_s1 = inlined_call_operand.vmem [shape: f32[8,128], index: 1, kind: input, shape index: {}]   ;;  %s6827_s2 = inlined_call_operand.vmem [shape: f32[8,128], index: 2, kind: input, shape index: {}]   ;;  %s6828_s3 = inlined_call_operand.vmem [shape: f32[1,128], index: 3, kind: input, shape index: {}]   ;;  %s6829_s4 = inlined_call_operand.vmem [shape: bf16[2,128,384], index: 4, kind: input, shape index: {}]   ;;  %s6830_s5 = inlined_call_operand.vmem [shape: f32[2,1,384], index: 5, kind: input, shape index: {}]   ;;  %s6831_s6 = inlined_call_operand.vmem [shape: bf16[2,128,128], index: 6, kind: input, shape index: {}]   ;;  %s6832_s7 = inlined_call_operand.vmem [shape: f32[2,1,128], index: 7, kind: input, shape index: {}]   ;;  %s6833_s8 = inlined_call_operand.vmem [shape: f32[2,2,128], index: 8, kind: input, shape index: {}]   ;;  %s6834_s9 = inlined_call_operand.vmem [shape: bf16[2,128,2048], index: 9, kind: input, shape index: {}]   ;;  %s6835_s10 = inlined_call_operand.vmem [shape: f32[2,1,2048], index: 10, kind: input, shape index: {}]   ;;  %s6836_s11 = inlined_call_operand.vmem [shape: bf16[2,2048,128], index: 11, kind: input, shape index: {}]   ;;  %s6837_s12 = inlined_call_operand.vmem [shape: f32[2,1,128], index: 12, kind: input, shape index: {}]   ;;  %s6838_s13 = inlined_call_operand.vmem [shape: f32[2,2,128], index: 13, kind: input, shape index: {}]   ;;  %s6839_s14 = inlined_call_operand.vmem [shape: f32[2,128], index: 14, kind: input, shape index: {}]   ;;  %s6840_s15 = inlined_call_operand.vmem [shape: f32[128,4], index: 15, kind: input, shape index: {}]   ;;  %s6841_s16 = inlined_call_operand.vmem [shape: f32[1,4], index: 16, kind: input, shape index: {}]   ;;  %s6842_s17 = inlined_call_operand.hbm [shape: f32[2,3], index: 17, kind: output, shape index: {0}]   ;;  %s6843_s18 = inlined_call_operand.vmem [shape: f32[2,1], index: 18, kind: output, shape index: {1}]  }
   0x1   :  { %6848 = sst [smem:[#allocation7_spill]] %s6825_s0 }
   0x2   :  { %6849 = sst [smem:[#allocation8_spill]] %s6826_s1 }
   0x3   :  { %6850 = sst [smem:[#allocation9_spill]] %s6827_s2 }
   0x4   :  { %6851 = sst [smem:[#allocation10_spill]] %s6829_s4 }
   0x5   :  { %6852 = sst [smem:[#allocation11_spill]] %s6830_s5 }
   0x6   :  { %6853 = sst [smem:[#allocation12_spill]] %s6831_s6 }
   0x7   :  { %6854 = sst [smem:[#allocation13_spill]] %s6839_s14 }
   0x8   :  { %6855 = sst [smem:[#allocation14_spill]] %s6840_s15 }
   0x9   :  { %6856 = sst [smem:[#allocation15_spill]] %s6841_s16 }
   0xa   :  { %6857 = sst [smem:[#allocation16_spill]] %s6842_s17 }
   0xb   :  { %6858 = sst [smem:[#allocation17_spill]] %s6843_s18 }
   0xc   :  { %24 = vsyncpa [#allocation4], 0  ;;  %s6010_s27 = smov 0  }
   0xd LB: > { %6859 = sst [smem:[#allocation6_spill]] %s5907_s27  ;;  %s6016_s28 = sadd.s32 4294967295, %s5907_s27   ;;  %s5907_s27 = sphi %s6010_s27, %s30_s27  }
   0xe   : > { %p4290_p0 = scmp.ge.s32.totalorder %s5907_s27, 1  ;;  %p588_p1 = scmp.lt.s32.totalorder %s5907_s27, 3 }
  0x10   : > { %p589_p2 = pnand %p4290_p0, %p588_p1 }
  0x11   : > { %p674_p3 = scmp.lt.s32.totalorder (!%p589_p2), %s6016_s28, 1  ;;  %s6860_s6 = sld [smem:[#allocation12_spill]] (!%p589_p2) }
  0x12   : > { %592 = sbr.rel (%p589_p2) target bundleno = 3368 (0xd28), region = 88  ;;  %s6861_s4 = sld [smem:[#allocation10_spill]] (!%p589_p2) }
  0x13   : > { %s6862_s5 = sld [smem:[#allocation11_spill]] (!%p589_p2)  ;;  %p4301_p4 = scmp.ne.s32.totalorder (!%p589_p2), %s6016_s28, 0 }
  0x17   : > { %s6022_s29 = scalar_select %p674_p3, %s6016_s28, 1 }
  0x18   : > { %s6863_s24 = sld [smem:[#allocation9_spill]] (!%p4301_p4) }
  0x19   : > { %s5777_s30 = smul.u32 192, %s6022_s29  ;;  %s5485_s0 = sshll.u32 %s6022_s29, 6 }
  0x1a   : > { %s5778_s19 = smul.u32 3, %s6022_s29  ;;  %s6030_s21 = scalar_lea.vmem %s6860_s6, %s5485_s0 }
  0x1b   : > { %s6035_s23 = scalar_lea.vmem %s6861_s4, %s5777_s30  ;;  %s4294_s16 = sshll.u32 %s6022_s29, 1 }
  0x1c   : > { %s6044_s18 = scalar_lea.vmem %s6862_s5, %s5778_s19  ;;  %s6050_s0 = scalar_lea.vmem %s6833_s8, %s4294_s16 }
  0x1d   : > { %s5486_s1 = sshll.u32 %s6022_s29, 10  ;;  %s4297_s2 = sshll.u32 %s6022_s29, 4 }
  0x1e   : > { %s6056_s30 = scalar_lea.vmem %s6834_s9, %s5486_s1  ;;  %s6062_s26 = scalar_lea.vmem %s6835_s10, %s4297_s2 }
  0x1f   : > { %s6067_s19 = scalar_lea.vmem %s6836_s11, %s5486_s1  ;;  %s711_s4 = scalar_lea.vmem %s6837_s12, %s6022_s29 }
  0x20   : > { %s6076_s20 = scalar_lea.vmem %s6838_s13, %s4294_s16  ;;  %719 = sbr.rel (%p4301_p4) target bundleno = 172 (0xac), region = 92 }
  0x21   : > { %s6864_s1 = sld [smem:[#allocation7_spill]] (!%p4301_p4) }
  0x22   : > { %s6865_s22 = sld [smem:[#allocation8_spill]] (!%p4301_p4) }
  0x25   : > { %v722_v0 = vld [vmem:[%s6863_s24] sm:$0xff]  ;;  %vm727_vm0 = vcmask 64512  }
  0x26   : > { %749 = vmatpush.msra.mxu0 %v722_v0  ;;  %5776 = vmatpush.msra.mxu1 %v722_v0  ;;  %v5799_v3 = vld [vmem:[%s6828_s3] ss:$0 sm:$0xff] }
  0x27   : > { %v720_v1 = vld [vmem:[%s6864_s1] sm:$0xff]  ;;  %v721_v2 = vld [vmem:[%s6864_s1 + $0x8] sm:$0xff] }
  0x28   : > { %4302 = vmatmul.msk.f32.vlgmr.msra.gmra.mxu0 %vm727_vm0, %v720_v1  ;;  %4303 = vmatmul.msk.f32.vlgmr.msra.gmra.mxu1 %vm727_vm0, %v721_v2  ;;  %v757_v5 = vld [vmem:[%s6865_s22] sm:$0xff] }
  0xa5   : > { %v751_v4 = vpop.f32.mrf.mxu0  ;;  %v754_v6 = vpop.f32.mrf.mxu1 }
  0xa6   : > { %v752_v7 = vadd.f32 %v5799_v3, %v751_v4  ;;  %v755_v8 = vadd.f32 %v5799_v3, %v754_v6 }
  0xa8   : > { %v758_v9 = vadd.f32 %v757_v5, %v752_v7  ;;  %v759_v10 = vadd.f32 %v757_v5, %v755_v8 }
  0xaa   : > { %760 = vst [vmem:[#allocation2] sm:$0xff] %v758_v9 }
  0xab   : > { %761 = vst [vmem:[#allocation2 + $0x8] sm:$0xff] %v759_v10 }
  0xac PF: > { %v4390_v11 = vld [vmem:[%s6035_s23 + $0xa8] sm:$0xf]  ;;  %v5510_v12 = vld [vmem:[%s6035_s23 + $0xb0] sm:$0xf0]  ;;  %v5509_v13 = vld [vmem:[%s6035_s23 + $0xac] sm:$0xf]  ;;  %s6866_s25 = scalar_lea.vmem %s6832_s7, %s6022_s29 }
  0xad   : > { %v4391_v14 = vor.u32 %v5510_v12, %v4390_v11  ;;  %v4392_v15 = vld [vmem:[%s6035_s23 + $0xb4] sm:$0xf0]  ;;  %v4378_v16 = vld [vmem:[%s6035_s23 + $0x90] sm:$0xf]  ;;  %v5507_v17 = vld [vmem:[%s6035_s23 + $0x98] sm:$0xf0] }
  0xae   : > { %v4395_v18 = vor.u32 %v5509_v13, %v4392_v15  ;;  %v5506_v19 = vld [vmem:[%s6035_s23 + $0x94] sm:$0xf]  ;;  %v4380_v20 = vld [vmem:[%s6035_s23 + $0x9c] sm:$0xf0]  ;;  %v4379_v21 = vor.u32 %v5507_v17, %v4378_v16  ;;  %v4366_v23 = vld [vmem:[%s6035_s23 + $0x78] sm:$0xf] }
  0xaf   : > { %933 = vmatpush.bf16.msra.mxu0 %v4391_v14  ;;  %v4383_v22 = vor.u32 %v5506_v19, %v4380_v20  ;;  %v5504_v24 = vld [vmem:[%s6035_s23 + $0x80] sm:$0xf0]  ;;  %v5503_v25 = vld [vmem:[%s6035_s23 + $0x7c] sm:$0xf]  ;;  %v4368_v26 = vld [vmem:[%s6035_s23 + $0x84] sm:$0xf0] }
  0xb0   : > { %947 = vmatpush.bf16.msra.mxu1 %v4395_v18  ;;  %v4367_v27 = vor.u32 %v5504_v24, %v4366_v23  ;;  %v4371_v28 = vor.u32 %v5503_v25, %v4368_v26  ;;  %v4354_v29 = vld [vmem:[%s6035_s23 + $0x60] sm:$0xf]  ;;  %v5501_v30 = vld [vmem:[%s6035_s23 + $0x68] sm:$0xf0]  ;;  %v5500_v31 = vld [vmem:[%s6035_s23 + $0x64] sm:$0xf] }
  0xb1   : > { %v4356_v32 = vld [vmem:[%s6035_s23 + $0x6c] sm:$0xf0]  ;;  %v4355_v33 = vor.u32 %v5501_v30, %v4354_v29  ;;  %v4342_v35 = vld [vmem:[%s6035_s23 + $0x48] sm:$0xf]  ;;  %v5498_v36 = vld [vmem:[%s6035_s23 + $0x50] sm:$0xf0] }
  0xb2   : > { %v4359_v34 = vor.u32 %v5500_v31, %v4356_v32  ;;  %v5497_v37 = vld [vmem:[%s6035_s23 + $0x4c] sm:$0xf]  ;;  %v4344_v38 = vld [vmem:[%s6035_s23 + $0x54] sm:$0xf0]  ;;  %v4343_v39 = vor.u32 %v5498_v36, %v4342_v35  ;;  %v4330_v41 = vld [vmem:[%s6035_s23 + $0x30] sm:$0xf] }
  0xb3   : > { %934 = vmatpush.bf16.msra.mxu0 %v4379_v21  ;;  %v4347_v40 = vor.u32 %v5497_v37, %v4344_v38  ;;  %v5495_v42 = vld [vmem:[%s6035_s23 + $0x38] sm:$0xf0]  ;;  %v5494_v43 = vld [vmem:[%s6035_s23 + $0x34] sm:$0xf]  ;;  %v4332_v44 = vld [vmem:[%s6035_s23 + $0x3c] sm:$0xf0] }
  0xb4   : > { %948 = vmatpush.bf16.msra.mxu1 %v4383_v22  ;;  %v4331_v45 = vor.u32 %v5495_v42, %v4330_v41  ;;  %v4335_v46 = vor.u32 %v5494_v43, %v4332_v44  ;;  %v4318_v47 = vld [vmem:[%s6035_s23 + $0x18] sm:$0xf]  ;;  %v5492_v48 = vld [vmem:[%s6035_s23 + $0x20] sm:$0xf0]  ;;  %v5491_v49 = vld [vmem:[%s6035_s23 + $0x1c] sm:$0xf] }
  0xb5   : > { %v4320_v50 = vld [vmem:[%s6035_s23 + $0x24] sm:$0xf0]  ;;  %v4319_v51 = vor.u32 %v5492_v48, %v4318_v47  ;;  %v4306_v53 = vld [vmem:[%s6035_s23] sm:$0xf]  ;;  %v5489_v54 = vld [vmem:[%s6035_s23 + $0x8] sm:$0xf0] }
  0xb6   : > { %v4323_v52 = vor.u32 %v5491_v49, %v4320_v50  ;;  %v5488_v55 = vld [vmem:[%s6035_s23 + $0x4] sm:$0xf]  ;;  %v4308_v56 = vld [vmem:[%s6035_s23 + $0xc] sm:$0xf0]  ;;  %v4307_v57 = vor.u32 %v5489_v54, %v4306_v53  ;;  %v6128_v59 = vld [vmem:[#allocation2 + $0x8] sm:$0xff]  ;;  %vm977_vm1 = vcmask 261120  }
  0xb7   : > { %935 = vmatpush.bf16.msra.mxu0 %v4367_v27  ;;  %v6126_v58 = vld [vmem:[#allocation2] sm:$0xff]  ;;  %v4311_v60 = vor.u32 %v5488_v55, %v4308_v56  ;;  %s5909_s2 = smov 96   ;;  %vm1030_vm2 = vcmask 64512   ;;  %v4398_v11 = vld [vmem:[%s6035_s23 + $0xb0] sm:$0xf]  ;;  %vm1517_vm3 = vcmask 523264  }
  0xb8   : > { %949 = vmatpush.bf16.msra.mxu1 %v4371_v28  ;;  %v6132_v61 = vpack.c.bf16 %v6128_v59, %v6126_v58  ;;  %v6137_v62 = vld [vmem:[%s6044_s18] sm:$0x7]  ;;  %s5910_s18 = smov 64   ;;  %v5511_v12 = vld [vmem:[%s6035_s23 + $0xb8] sm:$0xf0]  ;;  %vm1520_vm4 = vcmask 785408  }
  0xb9   : > { %v799_v63 = vperm.slane %v6137_v62, 0  ;;  %v800_v0 = vperm.slane %v6137_v62, 1  ;;  %v4386_v13 = vld [vmem:[%s6035_s23 + $0x98] sm:$0xf]  ;;  %v4399_v14 = vor.u32 %v5511_v12, %v4398_v11  ;;  %v5508_v15 = vld [vmem:[%s6035_s23 + $0xa0] sm:$0xf0] }
  0xba   : > { %v4387_v18 = vor.u32 %v5508_v15, %v4386_v13  ;;  %v4374_v19 = vld [vmem:[%s6035_s23 + $0x80] sm:$0xf]  ;;  %v5505_v20 = vld [vmem:[%s6035_s23 + $0x88] sm:$0xf0]  ;;  %v4362_v22 = vld [vmem:[%s6035_s23 + $0x68] sm:$0xf] }
  0xbb   : > { %936 = vmatpush.bf16.msra.mxu0 %v4355_v33  ;;  %961 = vmatpush.bf16.msra.mxu2 %v4399_v14  ;;  %v4375_v21 = vor.u32 %v5505_v20, %v4374_v19  ;;  %v5502_v23 = vld [vmem:[%s6035_s23 + $0x70] sm:$0xf0]  ;;  %v4350_v27 = vld [vmem:[%s6035_s23 + $0x50] sm:$0xf]  ;;  %v5499_v28 = vld [vmem:[%s6035_s23 + $0x58] sm:$0xf0] }
  0xbc   : > { %950 = vmatpush.bf16.msra.mxu1 %v4359_v34  ;;  %v4363_v26 = vor.u32 %v5502_v23, %v4362_v22  ;;  %v4351_v29 = vor.u32 %v5499_v28, %v4350_v27  ;;  %v4338_v30 = vld [vmem:[%s6035_s23 + $0x38] sm:$0xf]  ;;  %v5496_v31 = vld [vmem:[%s6035_s23 + $0x40] sm:$0xf0]  ;;  %v4326_v33 = vld [vmem:[%s6035_s23 + $0x20] sm:$0xf] }
  0xbd   : > { %v4339_v32 = vor.u32 %v5496_v31, %v4338_v30  ;;  %v5493_v34 = vld [vmem:[%s6035_s23 + $0x28] sm:$0xf0]  ;;  %v4314_v36 = vld [vmem:[%s6035_s23 + $0x8] sm:$0xf]  ;;  %v5490_v37 = vld [vmem:[%s6035_s23 + $0x10] sm:$0xf0] }
  0xbe   : > { %v4327_v35 = vor.u32 %v5493_v34, %v4326_v33  ;;  %v4315_v38 = vor.u32 %v5490_v37, %v4314_v36  ;;  %v801_v49 = vperm.slane %v6137_v62, 2  ;;  %s5911_s23 = smov 32   ;;  %p5480_p5 = scmp.ne.s32.totalorder %s6016_s28, 1 }
  0xbf   : > { %937 = vmatpush.bf16.msra.mxu0 %v4343_v39  ;;  %962 = vmatpush.bf16.msra.mxu2 %v4387_v18 }
  0xc0   : > { %951 = vmatpush.bf16.msra.mxu1 %v4347_v40 }
  0xc3   : > { %938 = vmatpush.bf16.msra.mxu0 %v4331_v45  ;;  %963 = vmatpush.bf16.msra.mxu2 %v4375_v21 }
  0xc4   : > { %952 = vmatpush.bf16.msra.mxu1 %v4335_v46 }
  0xc7   : > { %939 = vmatpush.bf16.msra.mxu0 %v4319_v51  ;;  %964 = vmatpush.bf16.msra.mxu2 %v4363_v26 }
  0xc8   : > { %953 = vmatpush.bf16.msra.mxu1 %v4323_v52 }
  0xcb   : > { %940 = vmatpush.bf16.msra.mxu0 %v4307_v57  ;;  %965 = vmatpush.bf16.msra.mxu2 %v4351_v29 }
  0xcc   : > { %954 = vmatpush.bf16.msra.mxu1 %v4311_v60 }
  0xce   : > { %941 = vmatmul.bf16.vlgmr.msra.gmra.mxu0 %v6132_v61 }
  0xcf   : > { %955 = vmatmul.bf16.vlgmr.msra.gmra.mxu1 %v6132_v61  ;;  %966 = vmatpush.bf16.msra.mxu2 %v4339_v32 }
  0xd3   : > { %967 = vmatpush.bf16.msra.mxu2 %v4327_v35 }
  0xd7   : > { %968 = vmatpush.bf16.msra.mxu2 %v4315_v38 }
  0xda   : > { %969 = vmatmul.bf16.vlgmr.msra.gmra.mxu2 %v6132_v61 }
 0x14b   : > { %v942_v1 = vpop.f32.mrf.mxu0 }
 0x14c   : > { %v943_v2 = vadd.f32 %v942_v1, %v799_v63  ;;  %v956_v3 = vpop.f32.mrf.mxu1 }
 0x14d   : > { %v6141_v4 = vadd.f32 %v956_v3, %v800_v0 }
 0x14e   : > { %v6143_v5 = vmul.f32 0.17677669, %v943_v2 }
 0x14f   : > { %1101 = vrot.lane.b32.xlu2 %v6141_v4, %s5909_s2  ;;  %4400 = vmatpush.xpose.msk.msra.mxu3 %vm977_vm1, %v6141_v4 }
 0x152   : > { %4401 = vmatmul.msk.f32.vlgmr.msra.gmra.mxu3 %vm977_vm1, %v6143_v5 }
 0x153   : > { %v944_v6 = vpop.f32.mrf.mxu0 }
 0x154   : > { %v945_v7 = vadd.f32 %v944_v6, %v799_v63  ;;  %v958_v8 = vpop.f32.mrf.mxu1 }
 0x155   : > { %v6151_v9 = vadd.f32 %v958_v8, %v800_v0 }
 0x156   : > { %v6153_v10 = vmul.f32 0.17677669, %v945_v7 }
 0x157   : > { %4402 = vmatpush.xpose.msk.msrb.mxu3 %vm977_vm1, %v6151_v9  ;;  %1099 = vrot.lane.b32.xlu2 %v6143_v5, %s5909_s2 }
 0x15a   : > { %4403 = vmatmul.msk.f32.vlgmr.msrb.gmra.mxu3 %vm977_vm1, %v6153_v10 }
 0x15d   : > { %v970_v50 = vpop.f32.mrf.mxu2 }
 0x15e   : > { %v6191_v51 = vadd.f32 %v970_v50, %v801_v49 }
 0x15f   : > { %1233 = vrot.lane.b32.xlu2 %v6141_v4, %s5910_s18 }
 0x160   : > { %1071 = vmatpush.msra.mxu3 %v6191_v51 }
 0x165   : > { %v972_v52 = vpop.f32.mrf.mxu2 }
 0x166   : > { %v6196_v53 = vadd.f32 %v972_v52, %v801_v49 }
 0x167   : > { %1231 = vrot.lane.b32.xlu2 %v6143_v5, %s5910_s18 }
 0x168   : > { %1094 = vmatpush.msrb.mxu3 %v6196_v53 }
 0x1a9   : > { %v1102_v55 = vpop.permute.xlu2 %1101 }
 0x1b1   : > { %v1100_v62 = vpop.permute.xlu2 %1099 }
 0x1b9   : > { %v1234_v1 = vpop.permute.xlu2 %1233 }
 0x1c1   : > { %v1232_v3 = vpop.permute.xlu2 %1231 }
 0x1d5   : > { %v1001_v16 = vpop.f32.mrf.mxu3 }
 0x1d6   : > { %v1031_v17 = vsel %vm1030_vm2, %v1001_v16, -inf }
 0x1d7   : > { %1032 = vmax.xlane.f32.xlu0 %v1031_v17 }
 0x1dd   : > { %v1027_v24 = vpop.f32.mrf.mxu3 }
 0x1de   : > { %v1034_v25 = vsel %vm1030_vm2, %v1027_v24, -inf }
 0x1df   : > { %1035 = vmax.xlane.f32.xlu0 %v1034_v25 }
 0x1f3   : > { %1129 = vrot.lane.b32.xlu0 %v6151_v9, %s5909_s2 }
 0x24a   : > { %v1033_v39 = vpop.xlane.xlu0 %1032 }
 0x24b   : > { %v1037_v40 = vsub.f32 %v1001_v16, %v1033_v39 }
 0x24d   : > { %v1039_v41 = vmul.f32 1.442695, %v1037_v40 }
 0x24f   : > { %5822 = vpow2.f32 %v1039_v41 }
 0x252   : > { %v1036_v42 = vpop.xlane.xlu0 %1035 }
 0x253   : > { %v1038_v43 = vsub.f32 %v1027_v24, %v1036_v42 }
 0x255   : > { %v5823_v44 = vpop.eup %5822  ;;  %v1041_v45 = vmul.f32 1.442695, %v1038_v43 }
 0x256   : > { %v1043_v46 = vsel %vm1030_vm2, %v5823_v44, 0.0 }
 0x257   : > { %5824 = vpow2.f32 %v1041_v45  ;;  %1044 = vadd.xlane.f32.xlu1 %v1043_v46 }
 0x25d   : > { %v5825_v47 = vpop.eup %5824 }
 0x25e   : > { %v1046_v48 = vsel %vm1030_vm2, %v5825_v47, 0.0 }
 0x25f   : > { %1047 = vadd.xlane.f32.xlu1 %v1046_v48 }
 0x265   : > { %v1130_v0 = vpop.permute.xlu0 %1129 }
 0x278   : > { %1127 = vrot.lane.b32.xlu1 %v6153_v10, %s5909_s2 }
 0x280   : > { %1259 = vrot.lane.b32.xlu1 %v6153_v10, %s5910_s18 }
 0x2ca   : > { %v1045_v54 = vpop.xlane.xlu1 %1044 }
 0x2cb   : > { %5826 = vrcp.f32 %v1045_v54 }
 0x2d1   : > { %v5827_v56 = vpop.eup %5826 }
 0x2d2   : > { %v1051_v57 = vmul.f32 %v5827_v56, %v5823_v44  ;;  %v1048_v60 = vpop.xlane.xlu1 %1047 }
 0x2d3   : > { %5828 = vrcp.f32 %v1048_v60 }
 0x2d4   : > { %4404 = vmatmul.msk.f32.vlgmr.msra.gmra.mxu3 %vm1030_vm2, %v1051_v57 }
 0x2d5   : > { %4406 = vmatpush.xpose.msk.msra.mxu3 %vm977_vm1, %v1102_v55 }
 0x2d9   : > { %v5829_v61 = vpop.eup %5828 }
 0x2da   : > { %v1052_v63 = vmul.f32 %v5829_v61, %v5825_v47 }
 0x2dc   : > { %4405 = vmatmul.msk.f32.vlgmr.msrb.gmra.mxu3 %vm1030_vm2, %v1052_v63 }
 0x2dd   : > { %4408 = vmatpush.xpose.msk.msrb.mxu3 %vm977_vm1, %v1130_v0 }
 0x2e4   : > { %4407 = vmatmul.msk.f32.vlgmr.msra.gmra.mxu3 %vm977_vm1, %v1100_v62 }
 0x2e5   : > { %4412 = vmatpush.xpose.msk.msra.mxu3 %vm977_vm1, %v1234_v1 }
 0x2ea   : > { %v1128_v2 = vpop.permute.xlu1 %1127 }
 0x2ec   : > { %4409 = vmatmul.msk.f32.vlgmr.msrb.gmra.mxu3 %vm977_vm1, %v1128_v2 }
 0x2f2   : > { %v1260_v20 = vpop.permute.xlu1 %1259 }
 0x2f4   : > { %4413 = vmatmul.msk.f32.vlgmr.msra.gmra.mxu3 %vm977_vm1, %v1232_v3  ;;  %v5800_v3 = vpack.i.bf16 %v6196_v53, %v6191_v51 }
 0x357   : > { %v6207_v6 = vpop.f32.mrf.mxu3 }
 0x35f   : > { %v6209_v7 = vpop.f32.mrf.mxu3 }
 0x367   : > { %v1124_v8 = vpop.f32.mrf.mxu3 }
 0x368   : > { %v1155_v11 = vsel %vm1030_vm2, %v1124_v8, -inf }
 0x369   : > { %1156 = vmax.xlane.f32.xlu2 %v1155_v11 }
 0x36f   : > { %v1152_v12 = vpop.f32.mrf.mxu3 }
 0x370   : > { %v1158_v15 = vsel %vm1030_vm2, %v1152_v12, -inf }
 0x377   : > { %v1256_v13 = vpop.f32.mrf.mxu3 }
 0x378   : > { %v1287_v14 = vsel %vm1030_vm2, %v1256_v13, -inf }
 0x379   : > { %1288 = vmax.xlane.f32.xlu0 %v1287_v14 }
 0x381   : > { %1261 = vrot.lane.b32.xlu2 %v6151_v9, %s5910_s18 }
 0x389   : > { %1391 = vrot.lane.b32.xlu2 %v6151_v9, %s5911_s23 }
 0x38d   : > { %1178 = vrot.lane.b32.xlu0 %v6191_v51, %s5909_s2 }
 0x395   : > { %1309 = vrot.lane.b32.xlu0 %v6191_v51, %s5910_s18 }
 0x39d   : > { %1389 = vrot.lane.b32.xlu0 %v6153_v10, %s5911_s23 }
 0x3c7   : > { %1159 = vmax.xlane.f32.xlu0 %v1158_v15 }
 0x3dc   : > { %v1157_v16 = vpop.xlane.xlu2 %1156 }
 0x3dd   : > { %v1161_v17 = vsub.f32 %v1124_v8, %v1157_v16 }
 0x3df   : > { %v1163_v18 = vmul.f32 1.442695, %v1161_v17 }
 0x3e1   : > { %5830 = vpow2.f32 %v1163_v18 }
 0x3e4   : > { %v1262_v19 = vpop.permute.xlu2 %1261 }
 0x3e5   : > { %4414 = vmatpush.xpose.msk.msrb.mxu3 %vm977_vm1, %v1262_v19 }
 0x3e7   : > { %v5831_v9 = vpop.eup %5830 }
 0x3e8   : > { %4415 = vmatmul.msk.f32.vlgmr.msrb.gmra.mxu3 %vm977_vm1, %v1260_v20  ;;  %v1167_v21 = vsel %vm1030_vm2, %v5831_v9, 0.0 }
 0x3e9   : > { %1168 = vadd.xlane.f32.xlu1 %v1167_v21 }
 0x3ec   : > { %v1392_v22 = vpop.permute.xlu2 %1391  ;;  %v1289_v23 = vpop.xlane.xlu0 %1288 }
 0x3ed   : > { %v1293_v10 = vsub.f32 %v1256_v13, %v1289_v23  ;;  %4420 = vmatpush.xpose.msk.msra.mxu3 %vm977_vm1, %v1392_v22 }
 0x3ef   : > { %v1295_v24 = vmul.f32 1.442695, %v1293_v10 }
 0x3f1   : > { %5832 = vpow2.f32 %v1295_v24 }
 0x3f7   : > { %v5833_v25 = vpop.eup %5832 }
 0x3f8   : > { %v1299_v26 = vsel %vm1030_vm2, %v5833_v25, 0.0 }
 0x3f9   : > { %1300 = vadd.xlane.f32.xlu2 %v1299_v26  ;;  %v5519_v26 = vld [vmem:[%s6030_s21 + $0x38] sm:$0xff] }
 0x3fa   : > { %1592 = vmatpush.bf16.msrb.mxu2 %v5519_v26  ;;  %v5608_v26 = vld [vmem:[%s6056_s30 + $0x2bc] sm:$0xf0] }
 0x3ff   : > { %v1179_v27 = vpop.permute.xlu0 %1178 }
 0x400   : > { %1199 = vmatpush.msrb.mxu0 %v1179_v27  ;;  %v5518_v27 = vld [vmem:[%s6030_s21 + $0x30] sm:$0xff] }
 0x401   : > { %1593 = vmatpush.bf16.msrb.mxu2 %v5518_v27 }
 0x402   : > { %1363 = vrot.lane.b32.xlu1 %v6141_v4, %s5911_s23 }
 0x407   : > { %v1310_v28 = vpop.permute.xlu0 %1309 }
 0x408   : > { %1330 = vmatpush.msra.mxu0 %v1310_v28  ;;  %v5517_v28 = vld [vmem:[%s6030_s21 + $0x28] sm:$0xff] }
 0x409   : > { %1594 = vmatpush.bf16.msrb.mxu2 %v5517_v28  ;;  %v5600_v28 = vld [vmem:[%s6056_s30 + $0x284] sm:$0xf] }
 0x40f   : > { %v1390_v29 = vpop.permute.xlu0 %1389 }
 0x410   : > { %4421 = vmatmul.msk.f32.vlgmr.msra.gmra.mxu3 %vm977_vm1, %v1390_v29  ;;  %v5516_v29 = vld [vmem:[%s6030_s21 + $0x20] sm:$0xff] }
 0x411   : > { %1361 = vrot.lane.b32.xlu2 %v6143_v5, %s5911_s23  ;;  %1595 = vmatpush.bf16.msrb.mxu2 %v5516_v29  ;;  %v4780_v29 = vld [vmem:[%s6056_s30 + $0x2c0] sm:$0xf0] }
 0x43a   : > { %v1160_v31 = vpop.xlane.xlu0 %1159 }
 0x43b   : > { %v1162_v33 = vsub.f32 %v1152_v12, %v1160_v31 }
 0x43d   : > { %v1165_v35 = vmul.f32 1.442695, %v1162_v33 }
 0x45c   : > { %v1169_v30 = vpop.xlane.xlu1 %1168 }
 0x45d   : > { %5834 = vrcp.f32 %v1169_v30  ;;  %v5515_v30 = vld [vmem:[%s6030_s21 + $0x18] sm:$0xff] }
 0x45e   : > { %5836 = vpow2.f32 %v1165_v35  ;;  %1596 = vmatpush.bf16.msrb.mxu2 %v5515_v30  ;;  %v4786_v30 = vld [vmem:[%s6056_s30 + $0x288] sm:$0xf] }
 0x463   : > { %v5835_v32 = vpop.eup %5834 }
 0x464   : > { %v1175_v34 = vmul.f32 %v5835_v32, %v5831_v9  ;;  %v5837_v38 = vpop.eup %5836 }
 0x465   : > { %v1170_v41 = vsel %vm1030_vm2, %v5837_v38, 0.0 }
 0x466   : > { %4410 = vmatmul.msk.f32.vlgmr.msrb.gmra.mxu0 %vm1030_vm2, %v1175_v34 }
 0x46b   : > { %v1284_v36 = vpop.f32.mrf.mxu3 }
 0x46c   : > { %v1301_v4 = vpop.xlane.xlu2 %1300  ;;  %v1290_v37 = vsel %vm1030_vm2, %v1284_v36, -inf }
 0x46d   : > { %5838 = vrcp.f32 %v1301_v4  ;;  %1291 = vmax.xlane.f32.xlu1 %v1290_v37  ;;  %v5513_v4 = vld [vmem:[%s6030_s21 + $0x8] sm:$0xff]  ;;  %v5512_v37 = vld [vmem:[%s6030_s21] sm:$0xff] }
 0x473   : > { %v5839_v39 = vpop.eup %5838 }
 0x474   : > { %v1307_v40 = vmul.f32 %v5839_v39, %v5833_v25  ;;  %v1364_v5 = vpop.permute.xlu1 %1363  ;;  %v1362_v42 = vpop.permute.xlu2 %1361 }
 0x475   : > { %4418 = vmatpush.xpose.msk.msrb.mxu0 %vm977_vm1, %v1364_v5  ;;  %1171 = vadd.xlane.f32.xlu1 %v1170_v41 }
 0x476   : > { %4416 = vmatmul.msk.f32.vlgmr.msra.gmra.mxu0 %vm1030_vm2, %v1307_v40 }
 0x47e   : > { %4419 = vmatmul.msk.f32.vlgmr.msrb.gmra.mxu0 %vm977_vm1, %v1362_v42 }
 0x493   : > { %v1414_v43 = vpop.f32.mrf.mxu3 }
 0x494   : > { %v1420_v44 = vsel %vm1030_vm2, %v1414_v43, -inf }
 0x495   : > { %1421 = vmax.xlane.f32.xlu0 %v1420_v44 }
 0x4a9   : > { %1205 = vrot.lane.b32.xlu0 %v6196_v53, %s5909_s2 }
 0x4e0   : > { %v1292_v46 = vpop.xlane.xlu1 %1291 }
 0x4e1   : > { %v1294_v47 = vsub.f32 %v1284_v36, %v1292_v46  ;;  %v5514_v36 = vld [vmem:[%s6030_s21 + $0x10] sm:$0xff] }
 0x4e2   : > { %1597 = vmatpush.bf16.msrb.mxu2 %v5514_v36  ;;  %v4783_v36 = vor.u32 %v5600_v28, %v4780_v29 }
 0x4e3   : > { %v1201_v45 = vpop.f32.mrf.mxu0  ;;  %v1297_v49 = vmul.f32 1.442695, %v1294_v47 }
 0x4e5   : > { %5840 = vpow2.f32 %v1297_v49 }
 0x4e6   : > { %1598 = vmatpush.bf16.msrb.mxu2 %v5513_v4 }
 0x4e8   : > { %v1172_v61 = vpop.xlane.xlu1 %1171 }
 0x4ea   : > { %1599 = vmatpush.bf16.msrb.mxu2 %v5512_v37  ;;  %v4714_v37 = vld [vmem:[%s6056_s30 + $0x200] sm:$0xf] }
 0x4eb   : > { %v5841_v54 = vpop.eup %5840 }
 0x4ec   : > { %v1302_v55 = vsel %vm1030_vm2, %v5841_v54, 0.0 }
 0x4f3   : > { %v6243_v48 = vpop.f32.mrf.mxu0 }
 0x4fb   : > { %v1386_v50 = vpop.f32.mrf.mxu0 }
 0x4fc   : > { %v1417_v52 = vsel %vm1030_vm2, %v1386_v50, -inf }
 0x4fd   : > { %1418 = vmax.xlane.f32.xlu2 %v1417_v52 }
 0x505   : > { %1303 = vadd.xlane.f32.xlu2 %v1302_v55  ;;  %v5820_v55 = vld [vmem:[%s6866_s25] ss:$0 sm:$0xff] }
 0x508   : > { %v1422_v56 = vpop.xlane.xlu0 %1421 }
 0x509   : > { %v1424_v57 = vsub.f32 %v1414_v43, %v1422_v56 }
 0x50b   : > { %v1427_v60 = vmul.f32 1.442695, %v1424_v57 }
 0x50d   : > { %5842 = vpow2.f32 %v1427_v60 }
 0x50e   : > { %5844 = vrcp.f32 %v1172_v61 }
 0x513   : > { %v5843_v62 = vpop.eup %5842 }
 0x514   : > { %v1432_v63 = vsel %vm1030_vm2, %v5843_v62, 0.0  ;;  %v5845_v0 = vpop.eup %5844 }
 0x515   : > { %1433 = vadd.xlane.f32.xlu2 %v1432_v63  ;;  %v1176_v2 = vmul.f32 %v5845_v0, %v5837_v38 }
 0x51b   : > { %v1206_v1 = vpop.permute.xlu0 %1205 }
 0x51c   : > { %1226 = vmatpush.msrb.mxu1 %v1206_v1  ;;  %v4906_v1 = vld [vmem:[%s6056_s30 + $0x380] sm:$0xf] }
 0x51d   : > { %4411 = vmatmul.msk.f32.vlgmr.msrb.gmra.mxu1 %vm1030_vm2, %v1176_v2  ;;  %v5640_v2 = vld [vmem:[%s6056_s30 + $0x3bc] sm:$0xf0] }
 0x52d   : > { %5801 = vrot.lane.b32.xlu2 %v5800_v3, %s5911_s23  ;;  %v5632_v3 = vld [vmem:[%s6056_s30 + $0x384] sm:$0xf] }
 0x570   : > { %v1419_v8 = vpop.xlane.xlu2 %1418 }
 0x571   : > { %v1423_v11 = vsub.f32 %v1386_v50, %v1419_v8  ;;  %v4908_v8 = vld [vmem:[%s6056_s30 + $0x3c0] sm:$0xf0] }
 0x573   : > { %v1425_v12 = vmul.f32 1.442695, %v1423_v11  ;;  %v4914_v11 = vld [vmem:[%s6056_s30 + $0x388] sm:$0xf] }
 0x575   : > { %5846 = vpow2.f32 %v1425_v12  ;;  %v5641_v12 = vld [vmem:[%s6056_s30 + $0x3c4] sm:$0xf0] }
 0x578   : > { %v1304_v15 = vpop.xlane.xlu2 %1303 }
 0x57b   : > { %v5847_v13 = vpop.eup %5846 }
 0x57c   : > { %v1429_v14 = vsel %vm1030_vm2, %v5847_v13, 0.0 }
 0x57d   : > { %1430 = vadd.xlane.f32.xlu1 %v1429_v14  ;;  %v4915_v14 = vor.u32 %v5641_v12, %v4914_v11 }
 0x588   : > { %v1434_v16 = vpop.xlane.xlu2 %1433 }
 0x590   : > { %v5802_v17 = vpop.permute.xlu2 %5801 }
 0x591   : > { %v5803_v18 = vunpack.i.l.bf16 %v5802_v17 }
 0x593   : > { %1460 = vmatpush.msra.mxu0 %v5803_v18 }
 0x596   : > { %1335 = vrot.lane.b32.xlu1 %v6196_v53, %s5910_s18  ;;  %v5804_v53 = vunpack.i.h.bf16 %v5802_v17  ;;  %v4842_v17 = vld [vmem:[%s6056_s30 + $0x300] sm:$0xf] }
 0x59a   : > { %v1228_v19 = vpop.f32.mrf.mxu1 }
 0x59b   : > { %v5805_v51 = vpack.i.bf16 %v1228_v19, %v1201_v45  ;;  %v5624_v19 = vld [vmem:[%s6056_s30 + $0x33c] sm:$0xf0] }
 0x59d   : > { %5806 = vrot.lane.b32.xlu0 %v5805_v51, %s5911_s23  ;;  %v5616_v51 = vld [vmem:[%s6056_s30 + $0x304] sm:$0xf]  ;;  %s6868_s23 = sld [smem:[#allocation13_spill]] (!%p5480_p5) }
 0x5f0   : > { %v1431_v9 = vpop.xlane.xlu1 %1430 }
 0x5f1   : > { %5848 = vrcp.f32 %v1431_v9  ;;  %v4844_v9 = vld [vmem:[%s6056_s30 + $0x340] sm:$0xf0] }
 0x5f2   : > { %5850 = vrcp.f32 %v1304_v15  ;;  %v5633_v15 = vld [vmem:[%s6056_s30 + $0x38c] sm:$0xf] }
 0x5f3   : > { %5852 = vrcp.f32 %v1434_v16  ;;  %v4916_v16 = vld [vmem:[%s6056_s30 + $0x3c8] sm:$0xf0] }
 0x5f4   : > { %v4919_v18 = vor.u32 %v5633_v15, %v4916_v16  ;;  %v5560_v15 = vld [vmem:[%s6056_s30 + $0x13c] sm:$0xf0]  ;;  %v5552_v16 = vld [vmem:[%s6056_s30 + $0x104] sm:$0xf] }
 0x5f6   : > { %2509 = vmatpush.bf16.msra.mxu2 %v4919_v18  ;;  %v4588_v18 = vld [vmem:[%s6056_s30 + $0x140] sm:$0xf0] }
 0x5f7   : > { %v5849_v20 = vpop.eup %5848 }
 0x5f8   : > { %v1437_v21 = vmul.f32 %v5849_v20, %v5847_v13  ;;  %v5851_v22 = vpop.eup %5850  ;;  %v4911_v13 = vor.u32 %v5632_v3, %v4908_v8  ;;  %v4843_v20 = vor.u32 %v5624_v19, %v4842_v17  ;;  %v4594_v19 = vld [vmem:[%s6056_s30 + $0x108] sm:$0xf] }
 0x5f9   : > { %v1308_v23 = vmul.f32 %v5851_v22, %v5841_v54  ;;  %v5853_v24 = vpop.eup %5852  ;;  %v4850_v22 = vld [vmem:[%s6056_s30 + $0x308] sm:$0xf] }
 0x5fa   : > { %4422 = vmatmul.msk.f32.vlgmr.msra.gmra.mxu0 %vm1030_vm2, %v1437_v21  ;;  %v1438_v25 = vmul.f32 %v5853_v24, %v5843_v62  ;;  %v5912_v62 = vmov 128.0   ;;  %v4847_v21 = vor.u32 %v5616_v51, %v4844_v9  ;;  %v4852_v24 = vld [vmem:[%s6056_s30 + $0x348] sm:$0xf0]  ;;  %v5561_v51 = vld [vmem:[%s6056_s30 + $0x144] sm:$0xf0]  ;;  %v4591_v9 = vor.u32 %v5552_v16, %v4588_v18 }
 0x5fb   : > { %5854 = vrcp.f32 %v5912_v62  ;;  %2481 = vmatpush.bf16.msrb.mxu0 %v4911_v13  ;;  %v4802_v18 = vld [vmem:[%s6056_s30 + $0x298] sm:$0xf] }
 0x5ff   : > { %2482 = vmatpush.bf16.msrb.mxu0 %v4847_v21  ;;  %v4596_v21 = vld [vmem:[%s6056_s30 + $0x148] sm:$0xf0] }
 0x601   : > { %v6287_v63 = vpop.eup %5854 }
 0x602   : > { %vm1618_vm5 = vweird.f32 %v6287_v63 }
 0x603   : > { %2483 = vmatpush.bf16.msrb.mxu0 %v4783_v36 }
 0x608   : > { %v1336_v10 = vpop.permute.xlu1 %1335 }
 0x609   : > { %1356 = vmatpush.msra.mxu1 %v1336_v10  ;;  %v5617_v10 = vld [vmem:[%s6056_s30 + $0x30c] sm:$0xf] }
 0x60a   : > { %4417 = vmatmul.msk.f32.vlgmr.msra.gmra.mxu1 %vm1030_vm2, %v1308_v23  ;;  %v5625_v23 = vld [vmem:[%s6056_s30 + $0x344] sm:$0xf0]  ;;  %v4855_v27 = vor.u32 %v5617_v10, %v4852_v24  ;;  %v5544_v10 = vld [vmem:[%s6056_s30 + $0xbc] sm:$0xf0] }
 0x60b   : > { %1486 = vmatpush.msrb.mxu1 %v5804_v53  ;;  %v4851_v53 = vor.u32 %v5625_v23, %v4850_v22  ;;  %v4522_v23 = vld [vmem:[%s6056_s30 + $0x80] sm:$0xf] }
 0x60c   : > { %2510 = vmatpush.bf16.msra.mxu2 %v4855_v27  ;;  %v4523_v24 = vor.u32 %v5544_v10, %v4522_v23  ;;  %v5545_v27 = vld [vmem:[%s6056_s30 + $0xc4] sm:$0xf0]  ;;  %v5594_v23 = vld [vmem:[%s6056_s30 + $0x24c] sm:$0xf0]  ;;  %v5586_v10 = vld [vmem:[%s6056_s30 + $0x214] sm:$0xf] }
 0x60d   : > { %2495 = vmatpush.bf16.msra.mxu1 %v4915_v14  ;;  %v4586_v14 = vld [vmem:[%s6056_s30 + $0x100] sm:$0xf] }
 0x60e   : > { %v4587_v17 = vor.u32 %v5560_v15, %v4586_v14  ;;  %v5610_v14 = vld [vmem:[%s6056_s30 + $0x2cc] sm:$0xf0]  ;;  %v5602_v15 = vld [vmem:[%s6056_s30 + $0x294] sm:$0xf] }
 0x60f   : > { %v5807_v38 = vpop.permute.xlu0 %5806 }
 0x610   : > { %v5809_v40 = vunpack.i.h.bf16 %v5807_v38  ;;  %v5808_v5 = vunpack.i.l.bf16 %v5807_v38  ;;  %v5592_v38 = vld [vmem:[%s6056_s30 + $0x23c] sm:$0xf0] }
 0x611   : > { %2496 = vmatpush.bf16.msra.mxu1 %v4851_v53  ;;  %v5536_v53 = vld [vmem:[%s6056_s30 + $0x84] sm:$0xf] }
 0x612   : > { %4423 = vmatmul.msk.f32.vlgmr.msrb.gmra.mxu1 %vm1030_vm2, %v1438_v25  ;;  %v1516_v44 = vsel %vm977_vm1, %v6209_v7, %v5809_v40  ;;  %v1515_v45 = vsel %vm977_vm1, %v6207_v6, %v5808_v5  ;;  %v4778_v25 = vld [vmem:[%s6056_s30 + $0x280] sm:$0xf]  ;;  %v4716_v5 = vld [vmem:[%s6056_s30 + $0x240] sm:$0xf0] }
 0x677   : > { %v1462_v33 = vpop.f32.mrf.mxu0 }
 0x687   : > { %v1358_v31 = vpop.f32.mrf.mxu1 }
 0x688   : > { %v5810_v32 = vpack.i.bf16 %v1358_v31, %v6243_v48 }
 0x68a   : > { %5811 = vrot.lane.b32.xlu0 %v5810_v32, %s5910_s18  ;;  %v4779_v32 = vor.u32 %v5608_v26, %v4778_v25  ;;  %v4524_v25 = vld [vmem:[%s6056_s30 + $0xc0] sm:$0xf0]  ;;  %v4530_v26 = vld [vmem:[%s6056_s30 + $0x88] sm:$0xf] }
 0x68b   : > { %v4527_v28 = vor.u32 %v5536_v53, %v4524_v25  ;;  %v4531_v29 = vor.u32 %v5545_v27, %v4530_v26  ;;  %v4738_v25 = vld [vmem:[%s6056_s30 + $0x218] sm:$0xf] }
 0x68c   : > { %v5595_v26 = vld [vmem:[%s6056_s30 + $0x254] sm:$0xf0] }
 0x68f   : > { %v1488_v34 = vpop.f32.mrf.mxu1 }
 0x690   : > { %v5815_v35 = vpack.i.bf16 %v1488_v34, %v1462_v33  ;;  %v5609_v33 = vld [vmem:[%s6056_s30 + $0x2c4] sm:$0xf0]  ;;  %v5601_v34 = vld [vmem:[%s6056_s30 + $0x28c] sm:$0xf] }
 0x691   : > { %v4787_v4 = vor.u32 %v5609_v33, %v4786_v30  ;;  %v5537_v30 = vld [vmem:[%s6056_s30 + $0x8c] sm:$0xf]  ;;  %v4458_v33 = vld [vmem:[%s6056_s30] sm:$0xf] }
 0x692   : > { %5816 = vrot.lane.b32.xlu1 %v5815_v35, %s5909_s2  ;;  %v4788_v35 = vld [vmem:[%s6056_s30 + $0x2c8] sm:$0xf0] }
 0x693   : > { %v4791_v40 = vor.u32 %v5601_v34, %v4788_v35  ;;  %2497 = vmatpush.bf16.msra.mxu1 %v4787_v4  ;;  %v5528_v34 = vld [vmem:[%s6056_s30 + $0x3c] sm:$0xf0]  ;;  %v5520_v35 = vld [vmem:[%s6056_s30 + $0x4] sm:$0xf] }
 0x694   : > { %v4459_v36 = vor.u32 %v5528_v34, %v4458_v33  ;;  %v4460_v4 = vld [vmem:[%s6056_s30 + $0x40] sm:$0xf0]  ;;  %v5578_v33 = vld [vmem:[%s6056_s30 + $0x1cc] sm:$0xf0]  ;;  %v5570_v34 = vld [vmem:[%s6056_s30 + $0x194] sm:$0xf] }
 0x695   : > { %2511 = vmatpush.bf16.msra.mxu2 %v4791_v40 }
 0x6fc   : > { %v5812_v39 = vpop.permute.xlu0 %5811 }
 0x6fd   : > { %v5814_v41 = vunpack.i.h.bf16 %v5812_v39  ;;  %v5813_v42 = vunpack.i.l.bf16 %v5812_v39  ;;  %v5584_v39 = vld [vmem:[%s6056_s30 + $0x204] sm:$0xf] }
 0x6ff   : > { %v1519_v48 = vsel %vm1517_vm3, %v1516_v44, %v5814_v41  ;;  %v1518_v49 = vsel %vm1517_vm3, %v1515_v45, %v5813_v42  ;;  %v4722_v41 = vld [vmem:[%s6056_s30 + $0x208] sm:$0xf]  ;;  %v4724_v44 = vld [vmem:[%s6056_s30 + $0x248] sm:$0xf0] }
 0x700   : > { %v5593_v42 = vld [vmem:[%s6056_s30 + $0x244] sm:$0xf0] }
 0x704   : > { %v5817_v43 = vpop.permute.xlu1 %5816 }
 0x705   : > { %v5819_v46 = vunpack.i.h.bf16 %v5817_v43  ;;  %v5818_v47 = vunpack.i.l.bf16 %v5817_v43  ;;  %v5585_v43 = vld [vmem:[%s6056_s30 + $0x20c] sm:$0xf] }
 0x707   : > { %v1521_v50 = vsel %vm1520_vm4, %v1518_v49, %v5818_v47  ;;  %v1522_v52 = vsel %vm1520_vm4, %v1519_v48, %v5819_v46  ;;  %v4715_v46 = vor.u32 %v5592_v38, %v4714_v37  ;;  %v4719_v47 = vor.u32 %v5584_v39, %v4716_v5  ;;  %v4650_v49 = vld [vmem:[%s6056_s30 + $0x180] sm:$0xf]  ;;  %v4466_v37 = vld [vmem:[%s6056_s30 + $0x8] sm:$0xf]  ;;  %v5521_v5 = vld [vmem:[%s6056_s30 + $0xc] sm:$0xf] }
 0x708   : > { %v1523_v54 = vpack.c.bf16 %v1522_v52, %v1521_v50  ;;  %v4723_v48 = vor.u32 %v5593_v42, %v4722_v41  ;;  %v5576_v50 = vld [vmem:[%s6056_s30 + $0x1bc] sm:$0xf0]  ;;  %v5568_v52 = vld [vmem:[%s6056_s30 + $0x184] sm:$0xf]  ;;  %v5529_v38 = vld [vmem:[%s6056_s30 + $0x44] sm:$0xf0]  ;;  %v4463_v39 = vor.u32 %v5520_v35, %v4460_v4 }
 0x709   : > { %2484 = vmatpush.bf16.msrb.mxu0 %v4719_v47  ;;  %v4467_v40 = vor.u32 %v5529_v38, %v4466_v37  ;;  %v4468_v41 = vld [vmem:[%s6056_s30 + $0x48] sm:$0xf0]  ;;  %v4922_v42 = vld [vmem:[%s6056_s30 + $0x390] sm:$0xf]  ;;  %v4674_v4 = vld [vmem:[%s6056_s30 + $0x198] sm:$0xf] }
 0x70a   : > { %1600 = vmatmul.bf16.vlgmr.msrb.gmra.mxu2 %v1523_v54  ;;  %v4727_v54 = vor.u32 %v5585_v43, %v4724_v44  ;;  %2498 = vmatpush.bf16.msra.mxu1 %v4723_v48  ;;  %v4471_v43 = vor.u32 %v5521_v5, %v4468_v41  ;;  %v5642_v44 = vld [vmem:[%s6056_s30 + $0x3cc] sm:$0xf0]  ;;  %v5579_v37 = vld [vmem:[%s6056_s30 + $0x1d4] sm:$0xf0]  ;;  %v4676_v5 = vld [vmem:[%s6056_s30 + $0x1d8] sm:$0xf0] }
 0x70b   : > { %v4923_v47 = vor.u32 %v5642_v44, %v4922_v42  ;;  %v4602_v42 = vld [vmem:[%s6056_s30 + $0x110] sm:$0xf]  ;;  %v5554_v44 = vld [vmem:[%s6056_s30 + $0x114] sm:$0xf] }
 0x70c   : > { %2512 = vmatpush.bf16.msra.mxu2 %v4727_v54 }
 0x78d   : > { %v1601_v7 = vpop.f32.mrf.mxu2 }
 0x78e   : > { %v1602_v56 = vadd.f32 %v5820_v55, %v1601_v7  ;;  %v4658_v7 = vld [vmem:[%s6056_s30 + $0x188] sm:$0xf] }
 0x790   : > { %v6280_v6 = vadd.f32 %v1602_v56, %v6126_v58  ;;  %v1614_v58 = vmul.f32 128.0, %v6287_v63  ;;  %v5577_v56 = vld [vmem:[%s6056_s30 + $0x1c4] sm:$0xf0] }
 0x792   : > { %1609 = vadd.xlane.f32.xlu0 %v6280_v6  ;;  %v1615_v0 = vsub.f32 1.0, %v1614_v58  ;;  %v4651_v58 = vor.u32 %v5576_v50, %v4650_v49  ;;  %v4930_v49 = vld [vmem:[%s6056_s30 + $0x398] sm:$0xf] }
 0x793   : > { %v5643_v50 = vld [vmem:[%s6056_s30 + $0x3d4] sm:$0xf0] }
 0x794   : > { %v1616_v31 = vmul.f32 %v6287_v63, %v1615_v0  ;;  %v4931_v54 = vor.u32 %v5643_v50, %v4930_v49 }
 0x795   : > { %v1603_v57 = vpop.f32.mrf.mxu2 }
 0x796   : > { %v1604_v60 = vadd.f32 %v5820_v55, %v1603_v57  ;;  %v1617_v45 = vadd.f32 %v6287_v63, %v1616_v31  ;;  %v4652_v55 = vld [vmem:[%s6056_s30 + $0x1c0] sm:$0xf0]  ;;  %v5569_v57 = vld [vmem:[%s6056_s30 + $0x18c] sm:$0xf] }
 0x797   : > { %v4655_v0 = vor.u32 %v5568_v52, %v4652_v55  ;;  %v4532_v31 = vld [vmem:[%s6056_s30 + $0xc8] sm:$0xf0]  ;;  %v5635_v52 = vld [vmem:[%s6056_s30 + $0x39c] sm:$0xf] }
 0x798   : > { %v6284_v61 = vadd.f32 %v1604_v60, %v6128_v59  ;;  %v4907_v59 = vor.u32 %v5640_v2, %v4906_v1  ;;  %v4660_v60 = vld [vmem:[%s6056_s30 + $0x1c8] sm:$0xf0]  ;;  %v6334_v62 = vsel %vm1618_vm5, %v6287_v63, %v1617_v45  ;;  %v4659_v1 = vor.u32 %v5577_v56, %v4658_v7  ;;  %v5634_v45 = vld [vmem:[%s6056_s30 + $0x394] sm:$0xf]  ;;  %v4932_v55 = vld [vmem:[%s6056_s30 + $0x3d8] sm:$0xf0] }
 0x799   : > { %v4663_v3 = vor.u32 %v5569_v57, %v4660_v60  ;;  %2485 = vmatpush.bf16.msrb.mxu0 %v4655_v0  ;;  %v4858_v7 = vld [vmem:[%s6056_s30 + $0x310] sm:$0xf]  ;;  %v4935_v57 = vor.u32 %v5635_v52, %v4932_v55  ;;  %v4860_v0 = vld [vmem:[%s6056_s30 + $0x350] sm:$0xf0]  ;;  %v5555_v52 = vld [vmem:[%s6056_s30 + $0x11c] sm:$0xf] }
 0x79a   : > { %1611 = vadd.xlane.f32.xlu2 %v6284_v61  ;;  %2467 = vmatpush.bf16.msrb.mxu3 %v4907_v59  ;;  %v5626_v56 = vld [vmem:[%s6056_s30 + $0x34c] sm:$0xf0] }
 0x79b   : > { %2499 = vmatpush.bf16.msra.mxu1 %v4659_v1  ;;  %2513 = vmatpush.bf16.msra.mxu2 %v4663_v3  ;;  %v4859_v60 = vor.u32 %v5626_v56, %v4858_v7  ;;  %v4866_v1 = vld [vmem:[%s6056_s30 + $0x318] sm:$0xf]  ;;  %v4538_v56 = vld [vmem:[%s6056_s30 + $0x90] sm:$0xf] }
 0x79c   : > { %v5627_v3 = vld [vmem:[%s6056_s30 + $0x354] sm:$0xf0] }
 0x79d   : > { %2486 = vmatpush.bf16.msrb.mxu0 %v4591_v9 }
 0x79e   : > { %2468 = vmatpush.bf16.msrb.mxu3 %v4843_v20  ;;  %v5553_v20 = vld [vmem:[%s6056_s30 + $0x10c] sm:$0xf] }
 0x79f   : > { %v4599_v22 = vor.u32 %v5553_v20, %v4596_v21  ;;  %v4804_v20 = vld [vmem:[%s6056_s30 + $0x2d8] sm:$0xf0] }
 0x7a1   : > { %2514 = vmatpush.bf16.msra.mxu2 %v4599_v22  ;;  %2487 = vmatpush.bf16.msrb.mxu0 %v4527_v28  ;;  %v4730_v22 = vld [vmem:[%s6056_s30 + $0x210] sm:$0xf]  ;;  %v4739_v28 = vor.u32 %v5595_v26, %v4738_v25 }
 0x7a2   : > { %2469 = vmatpush.bf16.msrb.mxu3 %v4779_v32  ;;  %v4535_v32 = vor.u32 %v5537_v30, %v4532_v31  ;;  %v4731_v53 = vor.u32 %v5594_v23, %v4730_v22  ;;  %v4740_v30 = vld [vmem:[%s6056_s30 + $0x258] sm:$0xf0] }
 0x7a3   : > { %v4484_v22 = vld [vmem:[%s6056_s30 + $0x58] sm:$0xf0] }
 0x7a5   : > { %2515 = vmatpush.bf16.msra.mxu2 %v4535_v32  ;;  %2488 = vmatpush.bf16.msrb.mxu0 %v4463_v39  ;;  %v4666_v32 = vld [vmem:[%s6056_s30 + $0x190] sm:$0xf]  ;;  %v4675_v39 = vor.u32 %v5579_v37, %v4674_v4 }
 0x7a6   : > { %2470 = vmatpush.bf16.msrb.mxu3 %v4715_v46  ;;  %v4924_v46 = vld [vmem:[%s6056_s30 + $0x3d0] sm:$0xf0]  ;;  %v4667_v35 = vor.u32 %v5578_v33, %v4666_v32 }
 0x7a7   : > { %v4927_v48 = vor.u32 %v5634_v45, %v4924_v46  ;;  %v4604_v46 = vld [vmem:[%s6056_s30 + $0x150] sm:$0xf0] }
 0x7a8   : > { %v4607_v49 = vor.u32 %v5554_v44, %v4604_v46  ;;  %v4938_v44 = vld [vmem:[%s6056_s30 + $0x3a0] sm:$0xf]  ;;  %v5636_v46 = vld [vmem:[%s6056_s30 + $0x3a4] sm:$0xf] }
 0x7a9   : > { %2516 = vmatpush.bf16.msra.mxu2 %v4471_v43  ;;  %2537 = vmatpush.bf16.msra.mxu0 %v4927_v48  ;;  %v5562_v43 = vld [vmem:[%s6056_s30 + $0x14c] sm:$0xf0]  ;;  %v5563_v48 = vld [vmem:[%s6056_s30 + $0x154] sm:$0xf0] }
 0x7aa   : > { %2471 = vmatpush.bf16.msrb.mxu3 %v4651_v58  ;;  %v5618_v58 = vld [vmem:[%s6056_s30 + $0x314] sm:$0xf]  ;;  %v4603_v45 = vor.u32 %v5562_v43, %v4602_v42 }
 0x7ad   : > { %2565 = vmatpush.bf16.msrb.mxu2 %v4935_v57  ;;  %v5546_v57 = vld [vmem:[%s6056_s30 + $0xcc] sm:$0xf0] }
 0x7ae   : > { %2472 = vmatpush.bf16.msrb.mxu3 %v4587_v17  ;;  %v4796_v17 = vld [vmem:[%s6056_s30 + $0x2d0] sm:$0xf0] }
 0x7b2   : > { %2473 = vmatpush.bf16.msrb.mxu3 %v4523_v24  ;;  %v4732_v24 = vld [vmem:[%s6056_s30 + $0x250] sm:$0xf0] }
 0x7b3   : > { %v4735_v27 = vor.u32 %v5586_v10, %v4732_v24 }
 0x7b6   : > { %2474 = vmatpush.bf16.msrb.mxu3 %v4459_v36  ;;  %v4668_v36 = vld [vmem:[%s6056_s30 + $0x1d0] sm:$0xf0] }
 0x7b7   : > { %v4671_v38 = vor.u32 %v5570_v34, %v4668_v36  ;;  %v1606_v34 = vld [vmem:[%s6050_s0] sm:$0x3]  ;;  %s6869_s0 = sld [smem:[#allocation15_spill]] (!%p5480_p5) }
 0x7b8   : > { %v1656_v37 = vperm.slane %v1606_v34, 0 }
 0x7ba   : > { %2523 = vmatpush.bf16.msra.mxu3 %v4923_v47  ;;  %v4610_v47 = vld [vmem:[%s6056_s30 + $0x118] sm:$0xf] }
 0x7bb   : > { %v4611_v50 = vor.u32 %v5563_v48, %v4610_v47  ;;  %v4946_v47 = vld [vmem:[%s6056_s30 + $0x3a8] sm:$0xf] }
 0x7be   : > { %2524 = vmatpush.bf16.msra.mxu3 %v4859_v60  ;;  %v5538_v60 = vld [vmem:[%s6056_s30 + $0x94] sm:$0xf] }
 0x805   : > { %v1610_v2 = vpop.xlane.xlu0 %1609 }
 0x806   : > { %v1620_v59 = vmul.f32 %v6334_v62, %v1610_v2  ;;  %v4863_v2 = vor.u32 %v5618_v58, %v4860_v0  ;;  %v4539_v0 = vor.u32 %v5546_v57, %v4538_v56  ;;  %v4874_v56 = vld [vmem:[%s6056_s30 + $0x320] sm:$0xf] }
 0x807   : > { %v5628_v57 = vld [vmem:[%s6056_s30 + $0x35c] sm:$0xf0] }
 0x808   : > { %v6338_v8 = vsub.f32 %v6280_v6, %v1620_v59  ;;  %v5619_v59 = vld [vmem:[%s6056_s30 + $0x31c] sm:$0xf]  ;;  %2538 = vmatpush.bf16.msra.mxu0 %v4863_v2  ;;  %v4546_v2 = vld [vmem:[%s6056_s30 + $0x98] sm:$0xf] }
 0x80a   : > { %v1624_v63 = vmul.f32 %v6338_v8, %v6338_v8 }
 0x80c   : > { %1626 = vadd.xlane.f32.xlu1 %v1624_v63  ;;  %v4868_v63 = vld [vmem:[%s6056_s30 + $0x358] sm:$0xf0] }
 0x80d   : > { %v1612_v11 = vpop.xlane.xlu2 %1611 }
 0x80e   : > { %v1621_v12 = vmul.f32 %v6334_v62, %v1612_v11  ;;  %v4867_v11 = vor.u32 %v5627_v3, %v4866_v1  ;;  %v4540_v1 = vld [vmem:[%s6056_s30 + $0xd0] sm:$0xf0]  ;;  %v5547_v3 = vld [vmem:[%s6056_s30 + $0xd4] sm:$0xf0] }
 0x810   : > { %v6344_v13 = vsub.f32 %v6284_v61, %v1621_v12  ;;  %v4595_v61 = vor.u32 %v5561_v51, %v4594_v19  ;;  %v4871_v12 = vor.u32 %v5619_v59, %v4868_v63  ;;  %v5611_v19 = vld [vmem:[%s6056_s30 + $0x2d4] sm:$0xf0]  ;;  %v4799_v51 = vor.u32 %v5602_v15, %v4796_v17  ;;  %v4474_v15 = vld [vmem:[%s6056_s30 + $0x10] sm:$0xf]  ;;  %v5522_v17 = vld [vmem:[%s6056_s30 + $0x14] sm:$0xf] }
 0x811   : > { %v4803_v9 = vor.u32 %v5611_v19, %v4802_v18  ;;  %v4543_v59 = vor.u32 %v5538_v60, %v4540_v1  ;;  %v4547_v63 = vor.u32 %v5547_v3, %v4546_v2  ;;  %v4476_v19 = vld [vmem:[%s6056_s30 + $0x50] sm:$0xf0]  ;;  %v4876_v1 = vld [vmem:[%s6056_s30 + $0x360] sm:$0xf0]  ;;  %v4882_v2 = vld [vmem:[%s6056_s30 + $0x328] sm:$0xf] }
 0x812   : > { %v1625_v6 = vmul.f32 %v6344_v13, %v6344_v13  ;;  %2500 = vmatpush.bf16.msra.mxu1 %v4595_v61  ;;  %v5603_v61 = vld [vmem:[%s6056_s30 + $0x29c] sm:$0xf]  ;;  %2566 = vmatpush.bf16.msrb.mxu2 %v4871_v12  ;;  %v5629_v3 = vld [vmem:[%s6056_s30 + $0x364] sm:$0xf0] }
 0x813   : > { %v4807_v21 = vor.u32 %v5603_v61, %v4804_v20  ;;  %2539 = vmatpush.bf16.msra.mxu0 %v4799_v51  ;;  %v4548_v12 = vld [vmem:[%s6056_s30 + $0xd8] sm:$0xf0]  ;;  %v4482_v51 = vld [vmem:[%s6056_s30 + $0x18] sm:$0xf]  ;;  %v4479_v61 = vor.u32 %v5522_v17, %v4476_v19  ;;  %v5604_v17 = vld [vmem:[%s6056_s30 + $0x2a4] sm:$0xf] }
 0x814   : > { %1628 = vadd.xlane.f32.xlu0 %v1625_v6  ;;  %v4794_v6 = vld [vmem:[%s6056_s30 + $0x290] sm:$0xf]  ;;  %v4818_v19 = vld [vmem:[%s6056_s30 + $0x2a8] sm:$0xf] }
 0x815   : > { %v4795_v16 = vor.u32 %v5610_v14, %v4794_v6 }
 0x816   : > { %2501 = vmatpush.bf16.msra.mxu1 %v4531_v29  ;;  %v5587_v29 = vld [vmem:[%s6056_s30 + $0x21c] sm:$0xf]  ;;  %2567 = vmatpush.bf16.msrb.mxu2 %v4807_v21 }
 0x817   : > { %2525 = vmatpush.bf16.msra.mxu3 %v4795_v16  ;;  %v4743_v31 = vor.u32 %v5587_v29, %v4740_v30  ;;  %2540 = vmatpush.bf16.msra.mxu0 %v4735_v27  ;;  %v5530_v16 = vld [vmem:[%s6056_s30 + $0x4c] sm:$0xf0]  ;;  %v5523_v21 = vld [vmem:[%s6056_s30 + $0x1c] sm:$0xf] }
 0x818   : > { %v4475_v18 = vor.u32 %v5530_v16, %v4474_v15  ;;  %v4487_v23 = vor.u32 %v5523_v21, %v4484_v22  ;;  %v4883_v15 = vor.u32 %v5629_v3, %v4882_v2  ;;  %v4746_v22 = vld [vmem:[%s6056_s30 + $0x220] sm:$0xf]  ;;  %v4562_v2 = vld [vmem:[%s6056_s30 + $0xa8] sm:$0xf] }
 0x819   : > { %v5549_v3 = vld [vmem:[%s6056_s30 + $0xe4] sm:$0xf0] }
 0x81a   : > { %2502 = vmatpush.bf16.msra.mxu1 %v4467_v40  ;;  %v5571_v40 = vld [vmem:[%s6056_s30 + $0x19c] sm:$0xf]  ;;  %2568 = vmatpush.bf16.msrb.mxu2 %v4743_v31 }
 0x81b   : > { %2526 = vmatpush.bf16.msra.mxu3 %v4731_v53  ;;  %v4679_v41 = vor.u32 %v5571_v40, %v4676_v5  ;;  %2541 = vmatpush.bf16.msra.mxu0 %v4671_v38  ;;  %v1659_v5 = vperm.slane %v1606_v34, 1 }
 0x81e   : > { %2551 = vmatpush.bf16.msrb.mxu1 %v4931_v54  ;;  %v4612_v54 = vld [vmem:[%s6056_s30 + $0x158] sm:$0xf0]  ;;  %2569 = vmatpush.bf16.msrb.mxu2 %v4679_v41 }
 0x81f   : > { %2527 = vmatpush.bf16.msra.mxu3 %v4667_v35  ;;  %v4615_v55 = vor.u32 %v5555_v52, %v4612_v54  ;;  %2542 = vmatpush.bf16.msra.mxu0 %v4607_v49  ;;  %v5637_v52 = vld [vmem:[%s6056_s30 + $0x3ac] sm:$0xf] }
 0x822   : > { %2552 = vmatpush.bf16.msrb.mxu1 %v4867_v11  ;;  %v5539_v11 = vld [vmem:[%s6056_s30 + $0x9c] sm:$0xf]  ;;  %2570 = vmatpush.bf16.msrb.mxu2 %v4615_v55 }
 0x823   : > { %2528 = vmatpush.bf16.msra.mxu3 %v4603_v45  ;;  %v4551_v14 = vor.u32 %v5539_v11, %v4548_v12  ;;  %2543 = vmatpush.bf16.msra.mxu0 %v4543_v59  ;;  %v5644_v45 = vld [vmem:[%s6056_s30 + $0x3dc] sm:$0xf0]  ;;  %v5621_v59 = vld [vmem:[%s6056_s30 + $0x32c] sm:$0xf]  ;;  %v4875_v11 = vor.u32 %v5628_v57, %v4874_v56 }
 0x824   : > { %v4939_v55 = vor.u32 %v5644_v45, %v4938_v44  ;;  %v4554_v56 = vld [vmem:[%s6056_s30 + $0xa0] sm:$0xf] }
 0x825   : > { %v5548_v57 = vld [vmem:[%s6056_s30 + $0xdc] sm:$0xf0] }
 0x826   : > { %2553 = vmatpush.bf16.msrb.mxu1 %v4803_v9  ;;  %v5531_v9 = vld [vmem:[%s6056_s30 + $0x54] sm:$0xf0]  ;;  %2571 = vmatpush.bf16.msrb.mxu2 %v4551_v14  ;;  %v5612_v14 = vld [vmem:[%s6056_s30 + $0x2dc] sm:$0xf0] }
 0x827   : > { %2529 = vmatpush.bf16.msra.mxu3 %v4539_v0  ;;  %v4483_v20 = vor.u32 %v5531_v9, %v4482_v51  ;;  %2544 = vmatpush.bf16.msra.mxu0 %v4479_v61  ;;  %v5620_v0 = vld [vmem:[%s6056_s30 + $0x324] sm:$0xf]  ;;  %v5613_v51 = vld [vmem:[%s6056_s30 + $0x2e4] sm:$0xf0]  ;;  %v5605_v9 = vld [vmem:[%s6056_s30 + $0x2ac] sm:$0xf] }
 0x828   : > { %v4879_v12 = vor.u32 %v5620_v0, %v4876_v1  ;;  %v4820_v61 = vld [vmem:[%s6056_s30 + $0x2e8] sm:$0xf0]  ;;  %v5540_v0 = vld [vmem:[%s6056_s30 + $0xa4] sm:$0xf] }
 0x829   : > { %v4556_v1 = vld [vmem:[%s6056_s30 + $0xe0] sm:$0xf0] }
 0x82a   : > { %2554 = vmatpush.bf16.msrb.mxu1 %v4739_v28  ;;  %2572 = vmatpush.bf16.msrb.mxu2 %v4487_v23  ;;  %v5596_v23 = vld [vmem:[%s6056_s30 + $0x25c] sm:$0xf0] }
 0x82b   : > { %2530 = vmatpush.bf16.msra.mxu3 %v4475_v18  ;;  %v4812_v18 = vld [vmem:[%s6056_s30 + $0x2e0] sm:$0xf0] }
 0x82c   : > { %v4815_v21 = vor.u32 %v5604_v17, %v4812_v18  ;;  %v4563_v17 = vor.u32 %v5549_v3, %v4562_v2  ;;  %v4770_v2 = vld [vmem:[%s6056_s30 + $0x238] sm:$0xf] }
 0x82d   : > { %v5599_v3 = vld [vmem:[%s6056_s30 + $0x274] sm:$0xf0] }
 0x82e   : > { %2555 = vmatpush.bf16.msrb.mxu1 %v4675_v39 }
 0x832   : > { %2556 = vmatpush.bf16.msrb.mxu1 %v4611_v50  ;;  %v5645_v50 = vld [vmem:[%s6056_s30 + $0x3e4] sm:$0xf0] }
 0x833   : > { %v4947_v60 = vor.u32 %v5645_v50, %v4946_v47  ;;  %v4626_v47 = vld [vmem:[%s6056_s30 + $0x128] sm:$0xf] }
 0x834   : > { %v5565_v50 = vld [vmem:[%s6056_s30 + $0x164] sm:$0xf0] }
 0x836   : > { %2557 = vmatpush.bf16.msrb.mxu1 %v4547_v63  ;;  %v4884_v63 = vld [vmem:[%s6056_s30 + $0x368] sm:$0xf0] }
 0x837   : > { %v4887_v16 = vor.u32 %v5621_v59, %v4884_v63  ;;  %v5541_v59 = vld [vmem:[%s6056_s30 + $0xac] sm:$0xf] }
 0x838   : > { %v4564_v63 = vld [vmem:[%s6056_s30 + $0xe8] sm:$0xf0] }
 0x839   : > { %v4567_v18 = vor.u32 %v5541_v59, %v4564_v63  ;;  %v5591_v59 = vld [vmem:[%s6056_s30 + $0x23c] sm:$0xf] }
 0x83a   : > { %2558 = vmatpush.bf16.msrb.mxu1 %v4483_v20  ;;  %v4772_v63 = vld [vmem:[%s6056_s30 + $0x278] sm:$0xf0] }
 0x87f   : > { %v1627_v7 = vpop.xlane.xlu1 %1626 }
 0x880   : > { %v1630_v58 = vmul.f32 %v1627_v7, %v6334_v62 }
 0x882   : > { %v1632_v6 = vadd.f32 1e-05, %v1630_v58 }
 0x884   : > { %5856 = vrsqrt.f32 %v1632_v6  ;;  %vm1640_vm7 = vweird.f32 %v1632_v6 }
 0x887   : > { %v1629_v10 = vpop.xlane.xlu0 %1628 }
 0x888   : > { %v1631_v53 = vmul.f32 %v1629_v10, %v6334_v62  ;;  %v4819_v10 = vor.u32 %v5613_v51, %v4818_v19  ;;  %v4498_v19 = vld [vmem:[%s6056_s30 + $0x28] sm:$0xf] }
 0x889   : > { %v5533_v51 = vld [vmem:[%s6056_s30 + $0x64] sm:$0xf0] }
 0x88a   : > { %v5857_v24 = vpop.eup %5856  ;;  %v1633_v25 = vadd.f32 1e-05, %v1631_v53  ;;  %v4823_v53 = vor.u32 %v5605_v9, %v4820_v61  ;;  %v5525_v9 = vld [vmem:[%s6056_s30 + $0x2c] sm:$0xf] }
 0x88b   : > { %v1635_v26 = vmul.f32 %v5857_v24, %v1632_v6  ;;  %vm1641_vm6 = vweird.f32 %v5857_v24  ;;  %v4810_v6 = vld [vmem:[%s6056_s30 + $0x2a0] sm:$0xf]  ;;  %v4500_v61 = vld [vmem:[%s6056_s30 + $0x68] sm:$0xf0] }
 0x88c   : > { %5858 = vrsqrt.f32 %v1633_v25  ;;  %vm1642_vm8 = vmor %vm1640_vm7, %vm1641_vm6  ;;  %vm1650_vm10 = vweird.f32 %v1633_v25  ;;  %v4811_v20 = vor.u32 %v5612_v14, %v4810_v6  ;;  %v4559_v6 = vor.u32 %v5540_v0, %v4556_v1  ;;  %v5532_v14 = vld [vmem:[%s6056_s30 + $0x5c] sm:$0xf0]  ;;  %v5590_v0 = vld [vmem:[%s6056_s30 + $0x234] sm:$0xf] }
 0x88d   : > { %v1636_v27 = vmul.f32 %v5857_v24, %v1635_v26  ;;  %v4754_v26 = vld [vmem:[%s6056_s30 + $0x228] sm:$0xf]  ;;  %v4764_v1 = vld [vmem:[%s6056_s30 + $0x270] sm:$0xf0] }
 0x88f   : > { %v1637_v28 = vmul.f32 0.5, %v1636_v27  ;;  %v5597_v27 = vld [vmem:[%s6056_s30 + $0x264] sm:$0xf0] }
 0x890   : > { %v4755_v34 = vor.u32 %v5597_v27, %v4754_v26  ;;  %v5639_v26 = vld [vmem:[%s6056_s30 + $0x3bc] sm:$0xf] }
 0x891   : > { %v1638_v29 = vsub.f32 1.5, %v1637_v28  ;;  %v5589_v28 = vld [vmem:[%s6056_s30 + $0x22c] sm:$0xf]  ;;  %v4964_v27 = vld [vmem:[%s6056_s30 + $0x3f8] sm:$0xf0] }
 0x892   : > { %v5859_v30 = vpop.eup %5858 }
 0x893   : > { %v1639_v31 = vmul.f32 %v5857_v24, %v1638_v29  ;;  %v1645_v32 = vmul.f32 %v5859_v30, %v1633_v25  ;;  %vm1651_vm9 = vweird.f32 %v5859_v30  ;;  %v4748_v25 = vld [vmem:[%s6056_s30 + $0x260] sm:$0xf0]  ;;  %v4756_v29 = vld [vmem:[%s6056_s30 + $0x268] sm:$0xf0] }
 0x894   : > { %vm1652_vm11 = vmor %vm1650_vm10, %vm1651_vm9 }
 0x895   : > { %v1646_v33 = vmul.f32 %v5859_v30, %v1645_v32  ;;  %v1643_v35 = vsel %vm1642_vm8, %v5857_v24, %v1639_v31  ;;  %v5588_v24 = vld [vmem:[%s6056_s30 + $0x224] sm:$0xf]  ;;  %v4682_v32 = vld [vmem:[%s6056_s30 + $0x1a0] sm:$0xf] }
 0x896   : > { %v1654_v38 = vmul.f32 %v1643_v35, %v6338_v8  ;;  %v4940_v8 = vld [vmem:[%s6056_s30 + $0x3e0] sm:$0xf0]  ;;  %v4751_v31 = vor.u32 %v5588_v24, %v4748_v25  ;;  %v4759_v35 = vor.u32 %v5589_v28, %v4756_v29  ;;  %v5647_v25 = vld [vmem:[%s6056_s30 + $0x3f4] sm:$0xf0]  ;;  %v4499_v28 = vor.u32 %v5533_v51, %v4498_v19 }
 0x897   : > { %v1647_v36 = vmul.f32 0.5, %v1646_v33  ;;  %v4943_v7 = vor.u32 %v5636_v46, %v4940_v8  ;;  %v5580_v33 = vld [vmem:[%s6056_s30 + $0x1dc] sm:$0xf0]  ;;  %v5556_v46 = vld [vmem:[%s6056_s30 + $0x124] sm:$0xf]  ;;  %v4503_v29 = vor.u32 %v5525_v9, %v4500_v61 }
 0x898   : > { %v1657_v41 = vmul.f32 %v1656_v37, %v1654_v38  ;;  %v5581_v38 = vld [vmem:[%s6056_s30 + $0x1e4] sm:$0xf0]  ;;  %v4620_v8 = vld [vmem:[%s6056_s30 + $0x160] sm:$0xf0]  ;;  %v4706_v19 = vld [vmem:[%s6056_s30 + $0x1b8] sm:$0xf] }
 0x899   : > { %v1648_v4 = vsub.f32 1.5, %v1647_v36  ;;  %v5572_v36 = vld [vmem:[%s6056_s30 + $0x1a4] sm:$0xf]  ;;  %v5583_v51 = vld [vmem:[%s6056_s30 + $0x1f4] sm:$0xf0] }
 0x89a   : > { %v6446_v48 = vadd.f32 %v1659_v5, %v1657_v41  ;;  %v5575_v9 = vld [vmem:[%s6056_s30 + $0x1bc] sm:$0xf] }
 0x89b   : > { %v1649_v39 = vmul.f32 %v5859_v30, %v1648_v4  ;;  %v4684_v4 = vld [vmem:[%s6056_s30 + $0x1e0] sm:$0xf0]  ;;  %v4708_v61 = vld [vmem:[%s6056_s30 + $0x1f8] sm:$0xf0] }
 0x89c   : > { %v4687_v41 = vor.u32 %v5572_v36, %v4684_v4  ;;  %v5622_v36 = vld [vmem:[%s6056_s30 + $0x334] sm:$0xf] }
 0x89d   : > { %v1653_v40 = vsel %vm1652_vm11, %v5859_v30, %v1649_v39  ;;  %v4747_v30 = vor.u32 %v5596_v23, %v4746_v22  ;;  %v5573_v39 = vld [vmem:[%s6056_s30 + $0x1ac] sm:$0xf]  ;;  %v5638_v22 = vld [vmem:[%s6056_s30 + $0x3b4] sm:$0xf] }
 0x89e   : > { %v1655_v42 = vmul.f32 %v1653_v40, %v6344_v13  ;;  %v4948_v13 = vld [vmem:[%s6056_s30 + $0x3e8] sm:$0xf0]  ;;  %v4956_v23 = vld [vmem:[%s6056_s30 + $0x3f0] sm:$0xf0] }
 0x89f   : > { %v4951_v58 = vor.u32 %v5637_v52, %v4948_v13  ;;  %v4692_v40 = vld [vmem:[%s6056_s30 + $0x1e8] sm:$0xf0]  ;;  %v4892_v4 = vld [vmem:[%s6056_s30 + $0x370] sm:$0xf0] }
 0x8a0   : > { %v1658_v43 = vmul.f32 %v1656_v37, %v1655_v42  ;;  %v4690_v37 = vld [vmem:[%s6056_s30 + $0x1a8] sm:$0xf]  ;;  %v4618_v42 = vld [vmem:[%s6056_s30 + $0x120] sm:$0xf]  ;;  %v4695_v45 = vor.u32 %v5573_v39, %v4692_v40  ;;  %v5557_v52 = vld [vmem:[%s6056_s30 + $0x12c] sm:$0xf] }
 0x8a1   : > { %v4691_v44 = vor.u32 %v5581_v38, %v4690_v37  ;;  %v4628_v13 = vld [vmem:[%s6056_s30 + $0x168] sm:$0xf0]  ;;  %v4898_v37 = vld [vmem:[%s6056_s30 + $0x338] sm:$0xf]  ;;  %v5623_v39 = vld [vmem:[%s6056_s30 + $0x33c] sm:$0xf] }
 0x8a2   : > { %v6448_v49 = vadd.f32 %v1659_v5, %v1658_v43  ;;  %v4683_v5 = vor.u32 %v5580_v33, %v4682_v32  ;;  %v5564_v43 = vld [vmem:[%s6056_s30 + $0x15c] sm:$0xf0]  ;;  %v4890_v32 = vld [vmem:[%s6056_s30 + $0x330] sm:$0xf]  ;;  %v5631_v38 = vld [vmem:[%s6056_s30 + $0x374] sm:$0xf0] }
 0x8a3   : > { %v5630_v33 = vld [vmem:[%s6056_s30 + $0x36c] sm:$0xf0]  ;;  %v4900_v40 = vld [vmem:[%s6056_s30 + $0x378] sm:$0xf0] }
 0x8a4   : > { %v6455_v54 = vpack.c.bf16 %v6448_v49, %v6446_v48 }
 0x8a6   : > { %2475 = vmatmul.bf16.vlgmr.msrb.gmra.mxu3 %v6455_v54  ;;  %2489 = vmatmul.bf16.vlgmr.msrb.gmra.mxu0 %v6455_v54 }
 0x8a7   : > { %2503 = vmatmul.bf16.vlgmr.msra.gmra.mxu1 %v6455_v54  ;;  %2517 = vmatmul.bf16.vlgmr.msra.gmra.mxu2 %v6455_v54 }
 0x8a8   : > { %2579 = vmatpush.bf16.msrb.mxu3 %v4939_v55  ;;  %2593 = vmatpush.bf16.msrb.mxu0 %v4943_v7  ;;  %v4619_v55 = vor.u32 %v5564_v43, %v4618_v42  ;;  %v4623_v7 = vor.u32 %v5556_v46, %v4620_v8  ;;  %v4826_v42 = vld [vmem:[%s6056_s30 + $0x2b0] sm:$0xf]  ;;  %v5606_v46 = vld [vmem:[%s6056_s30 + $0x2b4] sm:$0xf] }
 0x8a9   : > { %2607 = vmatpush.bf16.msra.mxu1 %v4947_v60  ;;  %2621 = vmatpush.bf16.msra.mxu2 %v4951_v58  ;;  %v4627_v60 = vor.u32 %v5565_v50, %v4626_v47  ;;  %v4631_v58 = vor.u32 %v5557_v52, %v4628_v13  ;;  %v5614_v43 = vld [vmem:[%s6056_s30 + $0x2ec] sm:$0xf0]  ;;  %v4828_v8 = vld [vmem:[%s6056_s30 + $0x2f0] sm:$0xf0]  ;;  %v4834_v47 = vld [vmem:[%s6056_s30 + $0x2b8] sm:$0xf] }
 0x8aa   : > { %v5615_v50 = vld [vmem:[%s6056_s30 + $0x2f4] sm:$0xf0]  ;;  %v5607_v52 = vld [vmem:[%s6056_s30 + $0x2bc] sm:$0xf] }
 0x8ab   : > { %v4836_v13 = vld [vmem:[%s6056_s30 + $0x2f8] sm:$0xf0] }
 0x8ac   : > { %2580 = vmatpush.bf16.msrb.mxu3 %v4875_v11  ;;  %2594 = vmatpush.bf16.msrb.mxu0 %v4879_v12  ;;  %v4490_v11 = vld [vmem:[%s6056_s30 + $0x20] sm:$0xf]  ;;  %v4555_v12 = vor.u32 %v5548_v57, %v4554_v56  ;;  %v4762_v56 = vld [vmem:[%s6056_s30 + $0x230] sm:$0xf] }
 0x8ad   : > { %2608 = vmatpush.bf16.msra.mxu1 %v4883_v15  ;;  %2622 = vmatpush.bf16.msra.mxu2 %v4887_v16  ;;  %v5524_v15 = vld [vmem:[%s6056_s30 + $0x24] sm:$0xf]  ;;  %v5598_v57 = vld [vmem:[%s6056_s30 + $0x26c] sm:$0xf0] }
 0x8ae   : > { %v4492_v16 = vld [vmem:[%s6056_s30 + $0x60] sm:$0xf0] }
 0x8af   : > { %v4495_v24 = vor.u32 %v5524_v15, %v4492_v16  ;;  %v4771_v15 = vor.u32 %v5599_v3, %v4770_v2  ;;  %v4775_v16 = vor.u32 %v5591_v59, %v4772_v63  ;;  %v5662_v2 = vld [vmem:[%s6067_s19 + $0x70] sm:$0xff] }
 0x8b0   : > { %2581 = vmatpush.bf16.msrb.mxu3 %v4811_v20  ;;  %2595 = vmatpush.bf16.msrb.mxu0 %v4815_v21  ;;  %v4954_v20 = vld [vmem:[%s6056_s30 + $0x3b0] sm:$0xf] }
 0x8b1   : > { %2609 = vmatpush.bf16.msra.mxu1 %v4819_v10  ;;  %2623 = vmatpush.bf16.msra.mxu2 %v4823_v53  ;;  %v5646_v21 = vld [vmem:[%s6056_s30 + $0x3ec] sm:$0xf0]  ;;  %v4962_v10 = vld [vmem:[%s6056_s30 + $0x3b8] sm:$0xf]  ;;  %v4491_v53 = vor.u32 %v5532_v14, %v4490_v11  ;;  %v4763_v11 = vor.u32 %v5598_v57, %v4762_v56 }
 0x8b2   : > { %v5582_v14 = vld [vmem:[%s6056_s30 + $0x1ec] sm:$0xf0] }
 0x8b3   : > { %v5670_v3 = vld [vmem:[%s6067_s19 + $0xb0] sm:$0xff] }
 0x8b4   : > { %2582 = vmatpush.bf16.msrb.mxu3 %v4747_v30  ;;  %2596 = vmatpush.bf16.msrb.mxu0 %v4751_v31  ;;  %v4955_v30 = vor.u32 %v5646_v21, %v4954_v20  ;;  %v4959_v31 = vor.u32 %v5638_v22, %v4956_v23  ;;  %v4634_v22 = vld [vmem:[%s6056_s30 + $0x130] sm:$0xf] }
 0x8b5   : > { %2610 = vmatpush.bf16.msra.mxu1 %v4755_v34  ;;  %2624 = vmatpush.bf16.msra.mxu2 %v4759_v35  ;;  %v4963_v34 = vor.u32 %v5647_v25, %v4962_v10  ;;  %v4967_v35 = vor.u32 %v5639_v26, %v4964_v27  ;;  %v5566_v23 = vld [vmem:[%s6056_s30 + $0x16c] sm:$0xf0]  ;;  %v4707_v10 = vor.u32 %v5583_v51, %v4706_v19  ;;  %v4636_v25 = vld [vmem:[%s6056_s30 + $0x170] sm:$0xf0]  ;;  %v4642_v26 = vld [vmem:[%s6056_s30 + $0x138] sm:$0xf] }
 0x8b6   : > { %2531 = vmatmul.bf16.vlgmr.msra.gmra.mxu3 %v6455_v54  ;;  %2545 = vmatmul.bf16.vlgmr.msra.gmra.mxu0 %v6455_v54  ;;  %v5567_v27 = vld [vmem:[%s6056_s30 + $0x174] sm:$0xf0]  ;;  %v5654_v59 = vld [vmem:[%s6067_s19 + $0x30] sm:$0xff] }
 0x8b7   : > { %2559 = vmatmul.bf16.vlgmr.msrb.gmra.mxu1 %v6455_v54  ;;  %2573 = vmatmul.bf16.vlgmr.msrb.gmra.mxu2 %v6455_v54  ;;  %v5678_v63 = vld [vmem:[%s6067_s19 + $0xf0] sm:$0xff]  ;;  %v5667_v19 = vld [vmem:[%s6067_s19 + $0x98] sm:$0xff] }
 0x8b8   : > { %2583 = vmatpush.bf16.msrb.mxu3 %v4683_v5  ;;  %2597 = vmatpush.bf16.msrb.mxu0 %v4687_v41  ;;  %v4891_v5 = vor.u32 %v5630_v33, %v4890_v32  ;;  %v4895_v41 = vor.u32 %v5622_v36, %v4892_v4  ;;  %v4570_v32 = vld [vmem:[%s6056_s30 + $0xb0] sm:$0xf]  ;;  %v5542_v36 = vld [vmem:[%s6056_s30 + $0xb4] sm:$0xf]  ;;  %v5651_v51 = vld [vmem:[%s6067_s19 + $0x18] sm:$0xff] }
 0x8b9   : > { %2611 = vmatpush.bf16.msra.mxu1 %v4691_v44  ;;  %2625 = vmatpush.bf16.msra.mxu2 %v4695_v45  ;;  %v4899_v44 = vor.u32 %v5631_v38, %v4898_v37  ;;  %v4903_v45 = vor.u32 %v5623_v39, %v4900_v40  ;;  %v5550_v33 = vld [vmem:[%s6056_s30 + $0xec] sm:$0xf0]  ;;  %v4572_v4 = vld [vmem:[%s6056_s30 + $0xf0] sm:$0xf0]  ;;  %v4578_v37 = vld [vmem:[%s6056_s30 + $0xb8] sm:$0xf] }
 0x8ba   : > { %v5551_v38 = vld [vmem:[%s6056_s30 + $0xf4] sm:$0xf0]  ;;  %v5543_v39 = vld [vmem:[%s6056_s30 + $0xbc] sm:$0xf] }
 0x8bb   : > { %v4580_v40 = vld [vmem:[%s6056_s30 + $0xf8] sm:$0xf0] }
 0x8bc   : > { %2584 = vmatpush.bf16.msrb.mxu3 %v4619_v55  ;;  %2598 = vmatpush.bf16.msrb.mxu0 %v4623_v7  ;;  %v4827_v55 = vor.u32 %v5614_v43, %v4826_v42  ;;  %v4831_v7 = vor.u32 %v5606_v46, %v4828_v8  ;;  %v4506_v42 = vld [vmem:[%s6056_s30 + $0x30] sm:$0xf]  ;;  %v5526_v46 = vld [vmem:[%s6056_s30 + $0x34] sm:$0xf] }
 0x8bd   : > { %2612 = vmatpush.bf16.msra.mxu1 %v4627_v60  ;;  %2626 = vmatpush.bf16.msra.mxu2 %v4631_v58  ;;  %v4835_v60 = vor.u32 %v5615_v50, %v4834_v47  ;;  %v4839_v58 = vor.u32 %v5607_v52, %v4836_v13  ;;  %v5534_v43 = vld [vmem:[%s6056_s30 + $0x6c] sm:$0xf0]  ;;  %v4508_v8 = vld [vmem:[%s6056_s30 + $0x70] sm:$0xf0]  ;;  %v4514_v47 = vld [vmem:[%s6056_s30 + $0x38] sm:$0xf] }
 0x8be   : > { %v5535_v50 = vld [vmem:[%s6056_s30 + $0x74] sm:$0xf0]  ;;  %v5527_v52 = vld [vmem:[%s6056_s30 + $0x3c] sm:$0xf] }
 0x8bf   : > { %v4516_v13 = vld [vmem:[%s6056_s30 + $0x78] sm:$0xf0]  ;;  %v4515_v56 = vor.u32 %v5535_v50, %v4514_v47  ;;  %v5698_v47 = vld [vmem:[%s6067_s19 + $0x190] sm:$0xff] }
 0x8c0   : > { %2585 = vmatpush.bf16.msrb.mxu3 %v4555_v12  ;;  %2599 = vmatpush.bf16.msrb.mxu0 %v4559_v6  ;;  %v4767_v12 = vor.u32 %v5590_v0, %v4764_v1  ;;  %v4698_v6 = vld [vmem:[%s6056_s30 + $0x1b0] sm:$0xf]  ;;  %v4519_v57 = vor.u32 %v5527_v52, %v4516_v13  ;;  %v5655_v0 = vld [vmem:[%s6067_s19 + $0x38] sm:$0xff]  ;;  %v5689_v13 = vld [vmem:[%s6067_s19 + $0x148] sm:$0xff] }
 0x8c1   : > { %2613 = vmatpush.bf16.msra.mxu1 %v4563_v17  ;;  %2627 = vmatpush.bf16.msra.mxu2 %v4567_v18  ;;  %v5574_v17 = vld [vmem:[%s6056_s30 + $0x1b4] sm:$0xf]  ;;  %v4699_v20 = vor.u32 %v5582_v14, %v4698_v6  ;;  %v5679_v1 = vld [vmem:[%s6067_s19 + $0xf8] sm:$0xff]  ;;  %v5653_v6 = vld [vmem:[%s6067_s19 + $0x28] sm:$0xff] }
 0x8c2   : > { %v4700_v18 = vld [vmem:[%s6056_s30 + $0x1f0] sm:$0xf0]  ;;  %v5677_v14 = vld [vmem:[%s6067_s19 + $0xe8] sm:$0xff] }
 0x8c3   : > { %v4703_v21 = vor.u32 %v5574_v17, %v4700_v18  ;;  %v5676_v17 = vld [vmem:[%s6067_s19 + $0xe0] sm:$0xff]  ;;  %v5659_v18 = vld [vmem:[%s6067_s19 + $0x58] sm:$0xff]  ;;  %v5682_v50 = vld [vmem:[%s6067_s19 + $0x110] sm:$0xff] }
 0x8c4   : > { %2586 = vmatpush.bf16.msrb.mxu3 %v4491_v53  ;;  %2600 = vmatpush.bf16.msrb.mxu0 %v4495_v24  ;;  %v4711_v53 = vor.u32 %v5575_v9, %v4708_v61  ;;  %v5558_v24 = vld [vmem:[%s6056_s30 + $0x134] sm:$0xf]  ;;  %v5675_v9 = vld [vmem:[%s6067_s19 + $0xd8] sm:$0xff] }
 0x8c5   : > { %2614 = vmatpush.bf16.msra.mxu1 %v4499_v28  ;;  %2628 = vmatpush.bf16.msra.mxu2 %v4503_v29  ;;  %v5559_v28 = vld [vmem:[%s6056_s30 + $0x13c] sm:$0xf]  ;;  %v5658_v61 = vld [vmem:[%s6067_s19 + $0x50] sm:$0xff] }
 0x8c6   : > { %v4644_v29 = vld [vmem:[%s6056_s30 + $0x178] sm:$0xf0]  ;;  %v5706_v52 = vld [vmem:[%s6067_s19 + $0x1d0] sm:$0xff]  ;;  %s6867_s30 = sld [smem:[#allocation14_spill]] (!%p5480_p5) }
 0x8c7   : > { %2587 = vmatmul.bf16.vlgmr.msrb.gmra.mxu3 %v6455_v54  ;;  %2601 = vmatmul.bf16.vlgmr.msrb.gmra.mxu0 %v6455_v54 }
 0x8c8   : > { %2635 = vmatpush.bf16.msra.mxu3 %v4955_v30  ;;  %2649 = vmatpush.bf16.msra.mxu0 %v4959_v31  ;;  %v4635_v30 = vor.u32 %v5566_v23, %v4634_v22  ;;  %v4639_v31 = vor.u32 %v5558_v24, %v4636_v25  ;;  %v5674_v22 = vld [vmem:[%s6067_s19 + $0xd0] sm:$0xff]  ;;  %v5657_v23 = vld [vmem:[%s6067_s19 + $0x48] sm:$0xff]  ;;  %v5656_v25 = vld [vmem:[%s6067_s19 + $0x40] sm:$0xff] }
 0x8c9   : > { %2663 = vmatpush.bf16.msrb.mxu1 %v4963_v34  ;;  %2677 = vmatpush.bf16.msrb.mxu2 %v4967_v35  ;;  %v4643_v34 = vor.u32 %v5567_v27, %v4642_v26  ;;  %v4647_v35 = vor.u32 %v5559_v28, %v4644_v29  ;;  %v5673_v24 = vld [vmem:[%s6067_s19 + $0xc8] sm:$0xff]  ;;  %v5664_v26 = vld [vmem:[%s6067_s19 + $0x80] sm:$0xff]  ;;  %v5695_v27 = vld [vmem:[%s6067_s19 + $0x178] sm:$0xff] }
 0x8ca   : > { %2615 = vmatmul.bf16.vlgmr.msra.gmra.mxu1 %v6455_v54  ;;  %2629 = vmatmul.bf16.vlgmr.msra.gmra.mxu2 %v6455_v54  ;;  %v5703_v28 = vld [vmem:[%s6067_s19 + $0x1b8] sm:$0xff]  ;;  %v5648_v29 = vld [vmem:[%s6067_s19] sm:$0xff] }
 0x8cc   : > { %2636 = vmatpush.bf16.msra.mxu3 %v4891_v5  ;;  %2650 = vmatpush.bf16.msra.mxu0 %v4895_v41  ;;  %v4571_v5 = vor.u32 %v5550_v33, %v4570_v32  ;;  %v4575_v41 = vor.u32 %v5542_v36, %v4572_v4  ;;  %v5711_v32 = vld [vmem:[%s6067_s19 + $0x1f8] sm:$0xff]  ;;  %v5694_v33 = vld [vmem:[%s6067_s19 + $0x170] sm:$0xff]  ;;  %v5693_v4 = vld [vmem:[%s6067_s19 + $0x168] sm:$0xff] }
 0x8cd   : > { %2664 = vmatpush.bf16.msrb.mxu1 %v4899_v44  ;;  %2678 = vmatpush.bf16.msrb.mxu2 %v4903_v45  ;;  %v4579_v44 = vor.u32 %v5551_v38, %v4578_v37  ;;  %v4583_v45 = vor.u32 %v5543_v39, %v4580_v40  ;;  %v5710_v36 = vld [vmem:[%s6067_s19 + $0x1f0] sm:$0xff]  ;;  %v5701_v37 = vld [vmem:[%s6067_s19 + $0x1a8] sm:$0xff]  ;;  %v5692_v40 = vld [vmem:[%s6067_s19 + $0x160] sm:$0xff] }
 0x8ce   : > { %v5685_v38 = vld [vmem:[%s6067_s19 + $0x128] sm:$0xff] }
 0x8cf   : > { %v5709_v39 = vld [vmem:[%s6067_s19 + $0x1e8] sm:$0xff] }
 0x8d0   : > { %2637 = vmatpush.bf16.msra.mxu3 %v4827_v55  ;;  %2651 = vmatpush.bf16.msra.mxu0 %v4831_v7  ;;  %v4507_v55 = vor.u32 %v5534_v43, %v4506_v42  ;;  %v4511_v7 = vor.u32 %v5526_v46, %v4508_v8  ;;  %v5708_v42 = vld [vmem:[%s6067_s19 + $0x1e0] sm:$0xff]  ;;  %v5691_v43 = vld [vmem:[%s6067_s19 + $0x158] sm:$0xff]  ;;  %v5690_v8 = vld [vmem:[%s6067_s19 + $0x150] sm:$0xff] }
 0x8d1   : > { %2665 = vmatpush.bf16.msrb.mxu1 %v4835_v60  ;;  %2679 = vmatpush.bf16.msrb.mxu2 %v4839_v58  ;;  %v5663_v60 = vld [vmem:[%s6067_s19 + $0x78] sm:$0xff] }
 0x8d2   : > { %v5671_v58 = vld [vmem:[%s6067_s19 + $0xb8] sm:$0xff] }
 0x8d3   : > { %v5707_v46 = vld [vmem:[%s6067_s19 + $0x1d8] sm:$0xff] }
 0x8d4   : > { %2638 = vmatpush.bf16.msra.mxu3 %v4763_v11  ;;  %2652 = vmatpush.bf16.msra.mxu0 %v4767_v12  ;;  %v5661_v11 = vld [vmem:[%s6067_s19 + $0x68] sm:$0xff] }
 0x8d5   : > { %2666 = vmatpush.bf16.msrb.mxu1 %v4771_v15  ;;  %2680 = vmatpush.bf16.msrb.mxu2 %v4775_v16  ;;  %v5669_v12 = vld [vmem:[%s6067_s19 + $0xa8] sm:$0xff]  ;;  %v5668_v15 = vld [vmem:[%s6067_s19 + $0xa0] sm:$0xff] }
 0x8d6   : > { %v5652_v16 = vld [vmem:[%s6067_s19 + $0x20] sm:$0xff] }
 0x8d8   : > { %2639 = vmatpush.bf16.msra.mxu3 %v4699_v20  ;;  %2653 = vmatpush.bf16.msra.mxu0 %v4703_v21  ;;  %v5666_v20 = vld [vmem:[%s6067_s19 + $0x90] sm:$0xff] }
 0x8d9   : > { %2667 = vmatpush.bf16.msrb.mxu1 %v4707_v10  ;;  %2681 = vmatpush.bf16.msrb.mxu2 %v4711_v53  ;;  %v5650_v21 = vld [vmem:[%s6067_s19 + $0x10] sm:$0xff]  ;;  %v5665_v10 = vld [vmem:[%s6067_s19 + $0x88] sm:$0xff] }
 0x8da   : > { %v5649_v53 = vld [vmem:[%s6067_s19 + $0x8] sm:$0xff] }
 0x8dc   : > { %2640 = vmatpush.bf16.msra.mxu3 %v4635_v30  ;;  %2654 = vmatpush.bf16.msra.mxu0 %v4639_v31  ;;  %v5672_v30 = vld [vmem:[%s6067_s19 + $0xc0] sm:$0xff]  ;;  %v5687_v31 = vld [vmem:[%s6067_s19 + $0x138] sm:$0xff] }
 0x8dd   : > { %2668 = vmatpush.bf16.msrb.mxu1 %v4643_v34  ;;  %2682 = vmatpush.bf16.msrb.mxu2 %v4647_v35  ;;  %v5702_v34 = vld [vmem:[%s6067_s19 + $0x1b0] sm:$0xff] }
 0x8de   : > { %v5686_v35 = vld [vmem:[%s6067_s19 + $0x130] sm:$0xff] }
 0x8e0   : > { %2641 = vmatpush.bf16.msra.mxu3 %v4571_v5  ;;  %2655 = vmatpush.bf16.msra.mxu0 %v4575_v41  ;;  %v5700_v5 = vld [vmem:[%s6067_s19 + $0x1a0] sm:$0xff] }
 0x8e1   : > { %2669 = vmatpush.bf16.msrb.mxu1 %v4579_v44  ;;  %2683 = vmatpush.bf16.msrb.mxu2 %v4583_v45  ;;  %v5684_v41 = vld [vmem:[%s6067_s19 + $0x120] sm:$0xff]  ;;  %v5699_v44 = vld [vmem:[%s6067_s19 + $0x198] sm:$0xff] }
 0x8e2   : > { %v5683_v45 = vld [vmem:[%s6067_s19 + $0x118] sm:$0xff] }
 0x8e4   : > { %2642 = vmatpush.bf16.msra.mxu3 %v4507_v55  ;;  %2656 = vmatpush.bf16.msra.mxu0 %v4511_v7  ;;  %v5697_v55 = vld [vmem:[%s6067_s19 + $0x188] sm:$0xff] }
 0x8e5   : > { %2670 = vmatpush.bf16.msrb.mxu1 %v4515_v56  ;;  %2684 = vmatpush.bf16.msrb.mxu2 %v4519_v57  ;;  %v5681_v7 = vld [vmem:[%s6067_s19 + $0x108] sm:$0xff]  ;;  %v5688_v57 = vld [vmem:[%s6067_s19 + $0x140] sm:$0xff] }
 0x8e6   : > { %v5705_v56 = vld [vmem:[%s6067_s19 + $0x1c8] sm:$0xff] }
 0x8e7   : > { %2643 = vmatmul.bf16.vlgmr.msra.gmra.mxu3 %v6455_v54  ;;  %2657 = vmatmul.bf16.vlgmr.msra.gmra.mxu0 %v6455_v54 }
 0x8e8   : > { %3781 = vmatpush.bf16.msrb.mxu0 %v5663_v60  ;;  %2671 = vmatmul.bf16.vlgmr.msrb.gmra.mxu1 %v6455_v54  ;;  %v5696_v60 = vld [vmem:[%s6067_s19 + $0x180] sm:$0xff] }
 0x8e9   : > { %3795 = vmatpush.bf16.msra.mxu1 %v5671_v58  ;;  %2685 = vmatmul.bf16.vlgmr.msrb.gmra.mxu2 %v6455_v54  ;;  %v5660_v54 = vld [vmem:[%s6067_s19 + $0x60] sm:$0xff] }
 0x8ea   : > { %3767 = vmatpush.bf16.msrb.mxu3 %v5655_v0  ;;  %3809 = vmatpush.bf16.msra.mxu2 %v5679_v1  ;;  %v5680_v58 = vld [vmem:[%s6067_s19 + $0x100] sm:$0xff] }
 0x8eb   : > { %v5704_v0 = vld [vmem:[%s6067_s19 + $0x1c0] sm:$0xff] }
 0x8ec   : > { %3782 = vmatpush.bf16.msrb.mxu0 %v5662_v2  ;;  %v6658_v1 = vld [vmem:[%s6062_s26] sm:$0xff] }
 0x8ed   : > { %3796 = vmatpush.bf16.msra.mxu1 %v5670_v3 }
 0x8ee   : > { %3768 = vmatpush.bf16.msrb.mxu3 %v5654_v59  ;;  %3810 = vmatpush.bf16.msra.mxu2 %v5678_v63  ;;  %v1796_v59 = vperm.slane %v6658_v1, 1  ;;  %v1797_v63 = vperm.slane %v6658_v1, 2 }
 0x8f0   : > { %3783 = vmatpush.bf16.msrb.mxu0 %v5661_v11 }
 0x8f1   : > { %3797 = vmatpush.bf16.msra.mxu1 %v5669_v12 }
 0x8f2   : > { %3769 = vmatpush.bf16.msrb.mxu3 %v5653_v6  ;;  %3811 = vmatpush.bf16.msra.mxu2 %v5677_v14 }
 0x8f4   : > { %3784 = vmatpush.bf16.msrb.mxu0 %v5660_v54 }
 0x8f5   : > { %3798 = vmatpush.bf16.msra.mxu1 %v5668_v15  ;;  %v1795_v15 = vperm.slane %v6658_v1, 0 }
 0x8f6   : > { %3770 = vmatpush.bf16.msrb.mxu3 %v5652_v16  ;;  %3812 = vmatpush.bf16.msra.mxu2 %v5676_v17 }
 0x8f8   : > { %3785 = vmatpush.bf16.msrb.mxu0 %v5659_v18  ;;  %v1798_v18 = vperm.slane %v6658_v1, 3 }
 0x8f9   : > { %3799 = vmatpush.bf16.msra.mxu1 %v5667_v19 }
 0x8fa   : > { %3771 = vmatpush.bf16.msrb.mxu3 %v5651_v51  ;;  %3813 = vmatpush.bf16.msra.mxu2 %v5675_v9 }
 0x8fc   : > { %3786 = vmatpush.bf16.msrb.mxu0 %v5658_v61 }
 0x8fd   : > { %3800 = vmatpush.bf16.msra.mxu1 %v5666_v20 }
 0x8fe   : > { %3772 = vmatpush.bf16.msrb.mxu3 %v5650_v21  ;;  %3814 = vmatpush.bf16.msra.mxu2 %v5674_v22  ;;  %v5727_v21 = vld [vmem:[%s6067_s19 + $0x278] sm:$0xff] }
 0x900   : > { %3787 = vmatpush.bf16.msrb.mxu0 %v5657_v23 }
 0x901   : > { %3801 = vmatpush.bf16.msra.mxu1 %v5665_v10  ;;  %v5735_v10 = vld [vmem:[%s6067_s19 + $0x2b8] sm:$0xff] }
 0x902   : > { %3773 = vmatpush.bf16.msrb.mxu3 %v5649_v53  ;;  %3815 = vmatpush.bf16.msra.mxu2 %v5673_v24 }
 0x904   : > { %3788 = vmatpush.bf16.msrb.mxu0 %v5656_v25 }
 0x905   : > { %3802 = vmatpush.bf16.msra.mxu1 %v5664_v26 }
 0x906   : > { %3774 = vmatpush.bf16.msrb.mxu3 %v5648_v29  ;;  %3816 = vmatpush.bf16.msra.mxu2 %v5672_v30  ;;  %v5726_v30 = vld [vmem:[%s6067_s19 + $0x270] sm:$0xff] }
 0x908   : > { %3837 = vmatpush.bf16.msra.mxu0 %v5695_v27 }
 0x909   : > { %3851 = vmatpush.bf16.msrb.mxu1 %v5703_v28 }
 0x90a   : > { %3823 = vmatpush.bf16.msra.mxu3 %v5687_v31  ;;  %3865 = vmatpush.bf16.msrb.mxu2 %v5711_v32 }
 0x90c   : > { %3838 = vmatpush.bf16.msra.mxu0 %v5694_v33 }
 0x90d   : > { %3852 = vmatpush.bf16.msrb.mxu1 %v5702_v34  ;;  %v5734_v34 = vld [vmem:[%s6067_s19 + $0x2b0] sm:$0xff] }
 0x90e   : > { %3824 = vmatpush.bf16.msra.mxu3 %v5686_v35  ;;  %3866 = vmatpush.bf16.msrb.mxu2 %v5710_v36 }
 0x910   : > { %3839 = vmatpush.bf16.msra.mxu0 %v5693_v4  ;;  %v5719_v4 = vld [vmem:[%s6067_s19 + $0x238] sm:$0xff] }
 0x911   : > { %3853 = vmatpush.bf16.msrb.mxu1 %v5701_v37 }
 0x912   : > { %3825 = vmatpush.bf16.msra.mxu3 %v5685_v38  ;;  %3867 = vmatpush.bf16.msrb.mxu2 %v5709_v39  ;;  %v1800_v38 = vperm.slane %v6658_v1, 5  ;;  %v5743_v39 = vld [vmem:[%s6067_s19 + $0x2f8] sm:$0xff] }
 0x914   : > { %3840 = vmatpush.bf16.msra.mxu0 %v5692_v40 }
 0x915   : > { %3854 = vmatpush.bf16.msrb.mxu1 %v5700_v5  ;;  %v1801_v5 = vperm.slane %v6658_v1, 6 }
 0x916   : > { %3826 = vmatpush.bf16.msra.mxu3 %v5684_v41  ;;  %3868 = vmatpush.bf16.msrb.mxu2 %v5708_v42  ;;  %v5725_v41 = vld [vmem:[%s6067_s19 + $0x268] sm:$0xff] }
 0x917   : > { %v5733_v42 = vld [vmem:[%s6067_s19 + $0x2a8] sm:$0xff] }
 0x918   : > { %3841 = vmatpush.bf16.msra.mxu0 %v5691_v43 }
 0x919   : > { %3855 = vmatpush.bf16.msrb.mxu1 %v5699_v44  ;;  %v5718_v44 = vld [vmem:[%s6067_s19 + $0x230] sm:$0xff] }
 0x91a   : > { %3827 = vmatpush.bf16.msra.mxu3 %v5683_v45  ;;  %3869 = vmatpush.bf16.msrb.mxu2 %v5707_v46 }
 0x91c   : > { %3842 = vmatpush.bf16.msra.mxu0 %v5690_v8  ;;  %v5742_v8 = vld [vmem:[%s6067_s19 + $0x2f0] sm:$0xff] }
 0x91d   : > { %3856 = vmatpush.bf16.msrb.mxu1 %v5698_v47 }
 0x91e   : > { %3828 = vmatpush.bf16.msra.mxu3 %v5682_v50  ;;  %3870 = vmatpush.bf16.msrb.mxu2 %v5706_v52  ;;  %v5724_v52 = vld [vmem:[%s6067_s19 + $0x260] sm:$0xff] }
 0x920   : > { %3843 = vmatpush.bf16.msra.mxu0 %v5689_v13  ;;  %v1799_v13 = vperm.slane %v6658_v1, 4 }
 0x921   : > { %3857 = vmatpush.bf16.msrb.mxu1 %v5697_v55 }
 0x922   : > { %3829 = vmatpush.bf16.msra.mxu3 %v5681_v7  ;;  %3871 = vmatpush.bf16.msrb.mxu2 %v5705_v56  ;;  %v5732_v56 = vld [vmem:[%s6067_s19 + $0x2a0] sm:$0xff] }
 0x923   : > { %v2490_v2 = vpop.f32.mrf.mxu0 }
 0x924   : > { %3844 = vmatpush.bf16.msra.mxu0 %v5688_v57  ;;  %v2504_v3 = vpop.f32.mrf.mxu1  ;;  %v2491_v12 = vadd.f32 %v2490_v2, %v1796_v59  ;;  %v1802_v57 = vperm.slane %v6658_v1, 7 }
 0x925   : > { %3858 = vmatpush.bf16.msrb.mxu1 %v5696_v60  ;;  %v2505_v14 = vadd.f32 %v2504_v3, %v1797_v63  ;;  %v5741_v3 = vld [vmem:[%s6067_s19 + $0x2e8] sm:$0xff] }
 0x926   : > { %3830 = vmatpush.bf16.msra.mxu3 %v5680_v58  ;;  %3872 = vmatpush.bf16.msrb.mxu2 %v5704_v0  ;;  %v2692_v51 = vmax.f32 %v2491_v12, 0.0  ;;  %v5717_v58 = vld [vmem:[%s6067_s19 + $0x228] sm:$0xff] }
 0x927   : > { %v2693_v61 = vmax.f32 %v2505_v14, 0.0  ;;  %v5731_v14 = vld [vmem:[%s6067_s19 + $0x298] sm:$0xff] }
 0x929   : > { %v2476_v11 = vpop.f32.mrf.mxu3 }
 0x92a   : > { %v2518_v6 = vpop.f32.mrf.mxu2  ;;  %v2477_v22 = vadd.f32 %v2476_v11, %v1795_v15  ;;  %v5723_v11 = vld [vmem:[%s6067_s19 + $0x258] sm:$0xff] }
 0x92b   : > { %v2492_v54 = vpop.f32.mrf.mxu0  ;;  %v2519_v53 = vadd.f32 %v2518_v6, %v1798_v18 }
 0x92c   : > { %v2493_v16 = vadd.f32 %v2492_v54, %v1796_v59  ;;  %v2506_v17 = vpop.f32.mrf.mxu1  ;;  %v2691_v31 = vmax.f32 %v2477_v22, 0.0 }
 0x92d   : > { %v2507_v19 = vadd.f32 %v2506_v17, %v1797_v63  ;;  %v2694_v35 = vmax.f32 %v2519_v53, 0.0 }
 0x92e   : > { %v2708_v9 = vmax.f32 %v2493_v16, 0.0  ;;  %v5716_v16 = vld [vmem:[%s6067_s19 + $0x220] sm:$0xff] }
 0x92f   : > { %v2709_v20 = vmax.f32 %v2507_v19, 0.0  ;;  %v5740_v19 = vld [vmem:[%s6067_s19 + $0x2e0] sm:$0xff] }
 0x930   : > { %v2724_v23 = vpack.c.bf16 %v2708_v9, %v2692_v51  ;;  %v5722_v9 = vld [vmem:[%s6067_s19 + $0x250] sm:$0xff] }
 0x931   : > { %v2725_v24 = vpack.c.bf16 %v2709_v20, %v2693_v61  ;;  %v2478_v25 = vpop.f32.mrf.mxu3 }
 0x932   : > { %v2479_v26 = vadd.f32 %v2478_v25, %v1795_v15  ;;  %v2520_v27 = vpop.f32.mrf.mxu2  ;;  %3789 = vmatmul.bf16.vlgmr.msrb.gmra.mxu0 %v2724_v23 }
 0x933   : > { %v2521_v28 = vadd.f32 %v2520_v27, %v1798_v18  ;;  %3803 = vmatmul.bf16.vlgmr.msra.gmra.mxu1 %v2725_v24  ;;  %3893 = vmatpush.bf16.msrb.mxu0 %v5727_v21  ;;  %v2546_v29 = vpop.f32.mrf.mxu0  ;;  %v5730_v21 = vld [vmem:[%s6067_s19 + $0x290] sm:$0xff]  ;;  %v5715_v24 = vld [vmem:[%s6067_s19 + $0x218] sm:$0xff] }
 0x934   : > { %v2707_v32 = vmax.f32 %v2479_v26, 0.0  ;;  %3907 = vmatpush.bf16.msra.mxu1 %v5735_v10  ;;  %v2560_v33 = vpop.f32.mrf.mxu1  ;;  %v2547_v45 = vadd.f32 %v2546_v29, %v1800_v38  ;;  %v6689_v10 = vld [vmem:[%s6062_s26 + $0x8] sm:$0xff]  ;;  %v5739_v27 = vld [vmem:[%s6067_s19 + $0x2d8] sm:$0xff] }
 0x935   : > { %v2710_v36 = vmax.f32 %v2521_v28, 0.0  ;;  %v2561_v47 = vadd.f32 %v2560_v33, %v1801_v5  ;;  %v5721_v29 = vld [vmem:[%s6067_s19 + $0x248] sm:$0xff]  ;;  %v5714_v33 = vld [vmem:[%s6067_s19 + $0x210] sm:$0xff] }
 0x936   : > { %v2723_v37 = vpack.c.bf16 %v2707_v32, %v2691_v31  ;;  %v2696_v0 = vmax.f32 %v2547_v45, 0.0  ;;  %v5729_v31 = vld [vmem:[%s6067_s19 + $0x288] sm:$0xff]  ;;  %v1805_v32 = vperm.slane %v6689_v10, 2 }
 0x937   : > { %v2726_v40 = vpack.c.bf16 %v2710_v36, %v2694_v35  ;;  %3894 = vmatpush.bf16.msrb.mxu0 %v5726_v30  ;;  %v2697_v59 = vmax.f32 %v2561_v47, 0.0  ;;  %v1804_v30 = vperm.slane %v6689_v10, 1  ;;  %v5720_v36 = vld [vmem:[%s6067_s19 + $0x240] sm:$0xff] }
 0x938   : > { %3908 = vmatpush.bf16.msra.mxu1 %v5734_v34  ;;  %3775 = vmatmul.bf16.vlgmr.msrb.gmra.mxu3 %v2723_v37  ;;  %v5738_v34 = vld [vmem:[%s6067_s19 + $0x2d0] sm:$0xff] }
 0x939   : > { %3817 = vmatmul.bf16.vlgmr.msra.gmra.mxu2 %v2726_v40  ;;  %3879 = vmatpush.bf16.msrb.mxu3 %v5719_v4  ;;  %v2532_v43 = vpop.f32.mrf.mxu3 }
 0x93a   : > { %3921 = vmatpush.bf16.msra.mxu2 %v5743_v39  ;;  %v2574_v46 = vpop.f32.mrf.mxu2  ;;  %v2533_v12 = vadd.f32 %v2532_v43, %v1799_v13  ;;  %v5759_v39 = vld [vmem:[%s6067_s19 + $0x378] sm:$0xff]  ;;  %v1803_v43 = vperm.slane %v6689_v10, 0 }
 0x93b   : > { %3895 = vmatpush.bf16.msrb.mxu0 %v5725_v41  ;;  %v2548_v50 = vpop.f32.mrf.mxu0  ;;  %v2575_v54 = vadd.f32 %v2574_v46, %v1802_v57  ;;  %v5767_v41 = vld [vmem:[%s6067_s19 + $0x3b8] sm:$0xff]  ;;  %v5737_v46 = vld [vmem:[%s6067_s19 + $0x2c8] sm:$0xff] }
 0x93c   : > { %3909 = vmatpush.bf16.msra.mxu1 %v5733_v42  ;;  %v2549_v55 = vadd.f32 %v2548_v50, %v1800_v38  ;;  %v2562_v7 = vpop.f32.mrf.mxu1  ;;  %v2695_v61 = vmax.f32 %v2533_v12, 0.0  ;;  %v5728_v38 = vld [vmem:[%s6067_s19 + $0x280] sm:$0xff]  ;;  %v5713_v42 = vld [vmem:[%s6067_s19 + $0x208] sm:$0xff] }
 0x93d   : > { %v2563_v60 = vadd.f32 %v2562_v7, %v1801_v5  ;;  %3880 = vmatpush.bf16.msrb.mxu3 %v5718_v44  ;;  %v2698_v22 = vmax.f32 %v2575_v54, 0.0  ;;  %v5758_v7 = vld [vmem:[%s6067_s19 + $0x370] sm:$0xff]  ;;  %v5757_v54 = vld [vmem:[%s6067_s19 + $0x368] sm:$0xff] }
 0x93e   : > { %v2712_v2 = vmax.f32 %v2549_v55, 0.0  ;;  %3922 = vmatpush.bf16.msra.mxu2 %v5742_v8  ;;  %v1806_v8 = vperm.slane %v6689_v10, 3 }
 0x93f   : > { %v2713_v63 = vmax.f32 %v2563_v60, 0.0  ;;  %3896 = vmatpush.bf16.msrb.mxu0 %v5724_v52  ;;  %v5766_v60 = vld [vmem:[%s6067_s19 + $0x3b0] sm:$0xff] }
 0x940   : > { %v2728_v6 = vpack.c.bf16 %v2712_v2, %v2696_v0  ;;  %3910 = vmatpush.bf16.msra.mxu1 %v5732_v56 }
 0x941   : > { %v2729_v1 = vpack.c.bf16 %v2713_v63, %v2697_v59  ;;  %3881 = vmatpush.bf16.msrb.mxu3 %v5717_v58  ;;  %v2534_v15 = vpop.f32.mrf.mxu3  ;;  %v5712_v58 = vld [vmem:[%s6067_s19 + $0x200] sm:$0xff]  ;;  %v5751_v63 = vld [vmem:[%s6067_s19 + $0x338] sm:$0xff] }
 0x942   : > { %3923 = vmatpush.bf16.msra.mxu2 %v5741_v3  ;;  %v2535_v17 = vadd.f32 %v2534_v15, %v1799_v13  ;;  %v2576_v18 = vpop.f32.mrf.mxu2  ;;  %3845 = vmatmul.bf16.vlgmr.msra.gmra.mxu0 %v2728_v6  ;;  %v5736_v59 = vld [vmem:[%s6067_s19 + $0x2c0] sm:$0xff]  ;;  %v5775_v6 = vld [vmem:[%s6067_s19 + $0x3f8] sm:$0xff] }
 0x943   : > { %v2577_v51 = vadd.f32 %v2576_v18, %v1802_v57  ;;  %3859 = vmatmul.bf16.vlgmr.msrb.gmra.mxu1 %v2729_v1  ;;  %3897 = vmatpush.bf16.msrb.mxu0 %v5723_v11 }
 0x944   : > { %v2711_v20 = vmax.f32 %v2535_v17, 0.0  ;;  %3911 = vmatpush.bf16.msra.mxu1 %v5731_v14  ;;  %v2602_v53 = vpop.f32.mrf.mxu0 }
 0x945   : > { %v2714_v23 = vmax.f32 %v2577_v51, 0.0  ;;  %3882 = vmatpush.bf16.msrb.mxu3 %v5716_v16  ;;  %v2603_v4 = vadd.f32 %v2602_v53, %v1804_v30  ;;  %v5765_v16 = vld [vmem:[%s6067_s19 + $0x3a8] sm:$0xff]  ;;  %v5755_v53 = vld [vmem:[%s6067_s19 + $0x358] sm:$0xff] }
 0x946   : > { %v2727_v25 = vpack.c.bf16 %v2711_v20, %v2695_v61  ;;  %3924 = vmatpush.bf16.msra.mxu2 %v5740_v19  ;;  %v5750_v19 = vld [vmem:[%s6067_s19 + $0x330] sm:$0xff]  ;;  %v5756_v20 = vld [vmem:[%s6067_s19 + $0x360] sm:$0xff] }
 0x947   : > { %v2616_v26 = vpop.f32.mrf.mxu1  ;;  %v2730_v28 = vpack.c.bf16 %v2714_v23, %v2698_v22  ;;  %3898 = vmatpush.bf16.msrb.mxu0 %v5722_v9  ;;  %v2700_v50 = vmax.f32 %v2603_v4, 0.0  ;;  %v5774_v9 = vld [vmem:[%s6067_s19 + $0x3f0] sm:$0xff]  ;;  %v5749_v22 = vld [vmem:[%s6067_s19 + $0x328] sm:$0xff] }
 0x948   : > { %3912 = vmatpush.bf16.msra.mxu1 %v5730_v21  ;;  %3831 = vmatmul.bf16.vlgmr.msra.gmra.mxu3 %v2727_v25  ;;  %v2617_v40 = vadd.f32 %v2616_v26, %v1805_v32  ;;  %v5764_v21 = vld [vmem:[%s6067_s19 + $0x3a0] sm:$0xff]  ;;  %v5773_v23 = vld [vmem:[%s6067_s19 + $0x3e8] sm:$0xff]  ;;  %v5746_v4 = vld [vmem:[%s6067_s19 + $0x310] sm:$0xff] }
 0x949   : > { %3873 = vmatmul.bf16.vlgmr.msrb.gmra.mxu2 %v2730_v28  ;;  %3883 = vmatpush.bf16.msrb.mxu3 %v5715_v24  ;;  %v5763_v24 = vld [vmem:[%s6067_s19 + $0x398] sm:$0xff]  ;;  %v5748_v25 = vld [vmem:[%s6067_s19 + $0x320] sm:$0xff] }
 0x94a   : > { %3925 = vmatpush.bf16.msra.mxu2 %v5739_v27  ;;  %v2588_v35 = vpop.f32.mrf.mxu3  ;;  %v2701_v13 = vmax.f32 %v2617_v40, 0.0  ;;  %v5772_v26 = vld [vmem:[%s6067_s19 + $0x3e0] sm:$0xff]  ;;  %v5754_v27 = vld [vmem:[%s6067_s19 + $0x350] sm:$0xff] }
 0x94b   : > { %3899 = vmatpush.bf16.msrb.mxu0 %v5721_v29  ;;  %v2589_v56 = vadd.f32 %v2588_v35, %v1803_v43  ;;  %v5762_v29 = vld [vmem:[%s6067_s19 + $0x390] sm:$0xff]  ;;  %v1809_v35 = vperm.slane %v6689_v10, 6 }
 0x94c   : > { %3913 = vmatpush.bf16.msra.mxu1 %v5729_v31  ;;  %v2604_v5 = vpop.f32.mrf.mxu0  ;;  %v5747_v31 = vld [vmem:[%s6067_s19 + $0x318] sm:$0xff] }
 0x94d   : > { %v2630_v37 = vpop.f32.mrf.mxu2  ;;  %3884 = vmatpush.bf16.msrb.mxu3 %v5714_v33  ;;  %v2605_v44 = vadd.f32 %v2604_v5, %v1804_v30  ;;  %v2699_v1 = vmax.f32 %v2589_v56, 0.0  ;;  %v1808_v33 = vperm.slane %v6689_v10, 5  ;;  %v5752_v5 = vld [vmem:[%s6067_s19 + $0x340] sm:$0xff] }
 0x94e   : > { %3926 = vmatpush.bf16.msra.mxu2 %v5738_v34  ;;  %v2631_v0 = vadd.f32 %v2630_v37, %v1806_v8  ;;  %v5753_v34 = vld [vmem:[%s6067_s19 + $0x348] sm:$0xff] }
 0x94f   : > { %v2618_v45 = vpop.f32.mrf.mxu1  ;;  %3900 = vmatpush.bf16.msrb.mxu0 %v5720_v36  ;;  %v2716_v52 = vmax.f32 %v2605_v44, 0.0  ;;  %v5761_v36 = vld [vmem:[%s6067_s19 + $0x388] sm:$0xff]  ;;  %v1807_v44 = vperm.slane %v6689_v10, 4 }
 0x950   : > { %v2619_v47 = vadd.f32 %v2618_v45, %v1805_v32  ;;  %3914 = vmatpush.bf16.msra.mxu1 %v5728_v38  ;;  %v2702_v17 = vmax.f32 %v2631_v0, 0.0  ;;  %v5771_v32 = vld [vmem:[%s6067_s19 + $0x3d8] sm:$0xff]  ;;  %v5770_v38 = vld [vmem:[%s6067_s19 + $0x3d0] sm:$0xff] }
 0x951   : > { %3885 = vmatpush.bf16.msrb.mxu3 %v5713_v42  ;;  %v2732_v57 = vpack.c.bf16 %v2716_v52, %v2700_v50  ;;  %v5769_v52 = vld [vmem:[%s6067_s19 + $0x3c8] sm:$0xff] }
 0x952   : > { %v2717_v55 = vmax.f32 %v2619_v47, 0.0  ;;  %3927 = vmatpush.bf16.msra.mxu2 %v5737_v46  ;;  %v2590_v3 = vpop.f32.mrf.mxu3  ;;  %v1810_v47 = vperm.slane %v6689_v10, 7 }
 0x953   : > { %3949 = vmatpush.bf16.msra.mxu0 %v5759_v39  ;;  %v2591_v11 = vadd.f32 %v2590_v3, %v1803_v43  ;;  %v5760_v43 = vld [vmem:[%s6067_s19 + $0x380] sm:$0xff] }
 0x954   : > { %3963 = vmatpush.bf16.msrb.mxu1 %v5767_v41  ;;  %v2733_v2 = vpack.c.bf16 %v2717_v55, %v2701_v13  ;;  %3901 = vmatmul.bf16.vlgmr.msrb.gmra.mxu0 %v2732_v57 }
 0x955   : > { %v2632_v12 = vpop.f32.mrf.mxu2  ;;  %v2715_v15 = vmax.f32 %v2591_v11, 0.0  ;;  %3886 = vmatpush.bf16.msrb.mxu3 %v5712_v58  ;;  %v5744_v58 = vld [vmem:[%s6067_s19 + $0x300] sm:$0xff] }
 0x956   : > { %v2633_v14 = vadd.f32 %v2632_v12, %v1806_v8  ;;  %3915 = vmatmul.bf16.vlgmr.msra.gmra.mxu1 %v2733_v2  ;;  %3928 = vmatpush.bf16.msra.mxu2 %v5736_v59  ;;  %v5745_v8 = vld [vmem:[%s6067_s19 + $0x308] sm:$0xff]  ;;  %v5768_v59 = vld [vmem:[%s6067_s19 + $0x3c0] sm:$0xff] }
 0x957   : > { %3950 = vmatpush.bf16.msra.mxu0 %v5758_v7  ;;  %v2731_v51 = vpack.c.bf16 %v2715_v15, %v2699_v1 }
 0x958   : > { %3964 = vmatpush.bf16.msrb.mxu1 %v5766_v60  ;;  %v2718_v18 = vmax.f32 %v2633_v14, 0.0 }
 0x959   : > { %3935 = vmatpush.bf16.msra.mxu3 %v5751_v63 }
 0x95a   : > { %3977 = vmatpush.bf16.msrb.mxu2 %v5775_v6  ;;  %v2734_v61 = vpack.c.bf16 %v2718_v18, %v2702_v17  ;;  %3887 = vmatmul.bf16.vlgmr.msrb.gmra.mxu3 %v2731_v51 }
 0x95b   : > { %3951 = vmatpush.bf16.msra.mxu0 %v5757_v54 }
 0x95c   : > { %3965 = vmatpush.bf16.msrb.mxu1 %v5765_v16  ;;  %3929 = vmatmul.bf16.vlgmr.msra.gmra.mxu2 %v2734_v61 }
 0x95d   : > { %3936 = vmatpush.bf16.msra.mxu3 %v5750_v19 }
 0x95e   : > { %3978 = vmatpush.bf16.msrb.mxu2 %v5774_v9 }
 0x95f   : > { %3952 = vmatpush.bf16.msra.mxu0 %v5756_v20  ;;  %v5821_v20 = vld [vmem:[%s711_s4] ss:$0 sm:$0xff]  ;;  %s5913_s4 = smov (!%p5480_p5), 125  }
 0x960   : > { %3966 = vmatpush.bf16.msrb.mxu1 %v5764_v21 }
 0x961   : > { %3937 = vmatpush.bf16.msra.mxu3 %v5749_v22 }
 0x962   : > { %3979 = vmatpush.bf16.msrb.mxu2 %v5773_v23 }
 0x963   : > { %3953 = vmatpush.bf16.msra.mxu0 %v5755_v53 }
 0x964   : > { %v2658_v28 = vpop.f32.mrf.mxu0  ;;  %3967 = vmatpush.bf16.msrb.mxu1 %v5763_v24 }
 0x965   : > { %v2672_v30 = vpop.f32.mrf.mxu1  ;;  %3938 = vmatpush.bf16.msra.mxu3 %v5748_v25  ;;  %v2659_v39 = vadd.f32 %v2658_v28, %v1808_v33 }
 0x966   : > { %3980 = vmatpush.bf16.msrb.mxu2 %v5772_v26  ;;  %v2673_v41 = vadd.f32 %v2672_v30, %v1809_v35 }
 0x967   : > { %3954 = vmatpush.bf16.msra.mxu0 %v5754_v27  ;;  %v2704_v13 = vmax.f32 %v2659_v39, 0.0 }
 0x968   : > { %3968 = vmatpush.bf16.msrb.mxu1 %v5762_v29  ;;  %v2705_v7 = vmax.f32 %v2673_v41, 0.0 }
 0x969   : > { %3939 = vmatpush.bf16.msra.mxu3 %v5747_v31 }
 0x96a   : > { %v2644_v37 = vpop.f32.mrf.mxu3  ;;  %3981 = vmatpush.bf16.msrb.mxu2 %v5771_v32 }
 0x96b   : > { %3955 = vmatpush.bf16.msra.mxu0 %v5753_v34  ;;  %v2645_v57 = vadd.f32 %v2644_v37, %v1807_v44 }
 0x96c   : > { %v2686_v40 = vpop.f32.mrf.mxu2  ;;  %v2660_v42 = vpop.f32.mrf.mxu0  ;;  %3969 = vmatpush.bf16.msrb.mxu1 %v5761_v36 }
 0x96d   : > { %v2661_v45 = vadd.f32 %v2660_v42, %v1808_v33  ;;  %v2674_v46 = vpop.f32.mrf.mxu1  ;;  %3940 = vmatpush.bf16.msra.mxu3 %v5746_v4  ;;  %v2687_v0 = vadd.f32 %v2686_v40, %v1810_v47  ;;  %v2703_v12 = vmax.f32 %v2645_v57, 0.0 }
 0x96e   : > { %v2675_v50 = vadd.f32 %v2674_v46, %v1809_v35  ;;  %3982 = vmatpush.bf16.msrb.mxu2 %v5770_v38 }
 0x96f   : > { %v2720_v55 = vmax.f32 %v2661_v45, 0.0  ;;  %3956 = vmatpush.bf16.msra.mxu0 %v5752_v5  ;;  %v2706_v14 = vmax.f32 %v2687_v0, 0.0 }
 0x970   : > { %v2721_v56 = vmax.f32 %v2675_v50, 0.0  ;;  %3970 = vmatpush.bf16.msrb.mxu1 %v5760_v43 }
 0x971   : > { %v2736_v60 = vpack.c.bf16 %v2720_v55, %v2704_v13  ;;  %3941 = vmatpush.bf16.msra.mxu3 %v5745_v8 }
 0x972   : > { %v2737_v2 = vpack.c.bf16 %v2721_v56, %v2705_v7  ;;  %v2646_v3 = vpop.f32.mrf.mxu3  ;;  %3983 = vmatpush.bf16.msrb.mxu2 %v5769_v52 }
 0x973   : > { %v2647_v10 = vadd.f32 %v2646_v3, %v1807_v44  ;;  %3957 = vmatmul.bf16.vlgmr.msra.gmra.mxu0 %v2736_v60 }
 0x974   : > { %v2688_v63 = vpop.f32.mrf.mxu2  ;;  %3971 = vmatmul.bf16.vlgmr.msrb.gmra.mxu1 %v2737_v2 }
 0x975   : > { %v2689_v11 = vadd.f32 %v2688_v63, %v1810_v47  ;;  %v2719_v6 = vmax.f32 %v2647_v10, 0.0  ;;  %3942 = vmatpush.bf16.msra.mxu3 %v5744_v58 }
 0x976   : > { %3984 = vmatpush.bf16.msrb.mxu2 %v5768_v59 }
 0x977   : > { %v2722_v54 = vmax.f32 %v2689_v11, 0.0  ;;  %v2735_v1 = vpack.c.bf16 %v2719_v6, %v2703_v12 }
 0x979   : > { %v2738_v15 = vpack.c.bf16 %v2722_v54, %v2706_v14  ;;  %3943 = vmatmul.bf16.vlgmr.msra.gmra.mxu3 %v2735_v1 }
 0x97b   : > { %3985 = vmatmul.bf16.vlgmr.msrb.gmra.mxu2 %v2738_v15 }
 0x9af   : > { %v3790_v16 = vpop.f32.mrf.mxu0 }
 0x9b0   : > { %v3804_v18 = vpop.f32.mrf.mxu1 }
 0x9b7   : > { %v3792_v51 = vpop.f32.mrf.mxu0 }
 0x9b8   : > { %v3806_v61 = vpop.f32.mrf.mxu1 }
 0x9bb   : > { %v3776_v17 = vpop.f32.mrf.mxu3 }
 0x9bc   : > { %v3818_v19 = vpop.f32.mrf.mxu2  ;;  %v3777_v22 = vadd.f32 %v5821_v20, %v3776_v17 }
 0x9be   : > { %v3791_v24 = vadd.f32 %v3790_v16, %v3777_v22 }
 0x9bf   : > { %v3846_v23 = vpop.f32.mrf.mxu0 }
 0x9c0   : > { %v3860_v25 = vpop.f32.mrf.mxu1  ;;  %v3805_v27 = vadd.f32 %v3804_v18, %v3791_v24 }
 0x9c2   : > { %v3819_v29 = vadd.f32 %v3818_v19, %v3805_v27 }
 0x9c3   : > { %v3778_v9 = vpop.f32.mrf.mxu3 }
 0x9c4   : > { %v3820_v21 = vpop.f32.mrf.mxu2  ;;  %v3779_v28 = vadd.f32 %v5821_v20, %v3778_v9 }
 0x9c6   : > { %v3793_v30 = vadd.f32 %v3792_v51, %v3779_v28 }
 0x9c7   : > { %v3848_v31 = vpop.f32.mrf.mxu0 }
 0x9c8   : > { %v3862_v34 = vpop.f32.mrf.mxu1  ;;  %v3807_v35 = vadd.f32 %v3806_v61, %v3793_v30 }
 0x9ca   : > { %v3821_v37 = vadd.f32 %v3820_v21, %v3807_v35 }
 0x9cb   : > { %v3832_v53 = vpop.f32.mrf.mxu3 }
 0x9cc   : > { %v3874_v26 = vpop.f32.mrf.mxu2  ;;  %v3833_v33 = vadd.f32 %v3832_v53, %v3819_v29 }
 0x9ce   : > { %v3847_v4 = vadd.f32 %v3846_v23, %v3833_v33 }
 0x9d0   : > { %v3861_v38 = vadd.f32 %v3860_v25, %v3847_v4 }
 0x9d1   : > { %v3902_v40 = vpop.f32.mrf.mxu0 }
 0x9d2   : > { %v3875_v42 = vadd.f32 %v3874_v26, %v3861_v38 }
 0x9d3   : > { %v3834_v32 = vpop.f32.mrf.mxu3  ;;  %v3916_v41 = vpop.f32.mrf.mxu1 }
 0x9d4   : > { %v3876_v36 = vpop.f32.mrf.mxu2  ;;  %v3835_v39 = vadd.f32 %v3834_v32, %v3821_v37 }
 0x9d6   : > { %v3849_v43 = vadd.f32 %v3848_v31, %v3835_v39 }
 0x9d8   : > { %v3863_v46 = vadd.f32 %v3862_v34, %v3849_v43  ;;  %v3991_v34 = vld [vmem:[%s6076_s20] sm:$0x3]  ;;  %s6870_s20 = sld [smem:[#allocation17_spill]] (!%p5480_p5) }
 0x9d9   : > { %v3904_v47 = vpop.f32.mrf.mxu0  ;;  %v4034_v38 = vperm.slane %v3991_v34, 0 }
 0x9da   : > { %v3877_v52 = vadd.f32 %v3876_v36, %v3863_v46 }
 0x9db   : > { %v3918_v13 = vpop.f32.mrf.mxu1 }
 0x9dd   : > { %v3888_v5 = vpop.f32.mrf.mxu3 }
 0x9de   : > { %v3889_v45 = vadd.f32 %v3888_v5, %v3875_v42  ;;  %v4037_v5 = vperm.slane %v3991_v34, 1 }
 0x9df   : > { %v3930_v44 = vpop.f32.mrf.mxu2 }
 0x9e0   : > { %v3903_v8 = vadd.f32 %v3902_v40, %v3889_v45 }
 0x9e2   : > { %v3917_v55 = vadd.f32 %v3916_v41, %v3903_v8 }
 0x9e4   : > { %v3931_v57 = vadd.f32 %v3930_v44, %v3917_v55 }
 0x9e5   : > { %v3890_v50 = vpop.f32.mrf.mxu3 }
 0x9e6   : > { %v3891_v7 = vadd.f32 %v3890_v50, %v3877_v52 }
 0x9e7   : > { %v3932_v56 = vpop.f32.mrf.mxu2 }
 0x9e8   : > { %v3905_v60 = vadd.f32 %v3904_v47, %v3891_v7 }
 0x9ea   : > { %v3919_v59 = vadd.f32 %v3918_v13, %v3905_v60 }
 0x9ec   : > { %v3933_v12 = vadd.f32 %v3932_v56, %v3919_v59 }
 0x9f0   : > { %v3958_v58 = vpop.f32.mrf.mxu0 }
 0x9f1   : > { %v3972_v3 = vpop.f32.mrf.mxu1 }
 0x9f8   : > { %v3960_v15 = vpop.f32.mrf.mxu0 }
 0x9f9   : > { %v3974_v17 = vpop.f32.mrf.mxu1 }
 0x9fc   : > { %v3944_v0 = vpop.f32.mrf.mxu3 }
 0x9fd   : > { %v3945_v2 = vadd.f32 %v3944_v0, %v3931_v57 }
 0x9fe   : > { %v3986_v63 = vpop.f32.mrf.mxu2 }
 0x9ff   : > { %v3959_v10 = vadd.f32 %v3958_v58, %v3945_v2 }
 0xa01   : > { %v3973_v11 = vadd.f32 %v3972_v3, %v3959_v10 }
 0xa03   : > { %v3987_v6 = vadd.f32 %v3986_v63, %v3973_v11 }
 0xa04   : > { %v3946_v14 = vpop.f32.mrf.mxu3 }
 0xa05   : > { %v3947_v54 = vadd.f32 %v3946_v14, %v3933_v12  ;;  %v3992_v1 = vadd.f32 %v3987_v6, %v6446_v48 }
 0xa06   : > { %v3988_v19 = vpop.f32.mrf.mxu2 }
 0xa07   : > { %v3961_v16 = vadd.f32 %v3960_v15, %v3947_v54  ;;  %3994 = vadd.xlane.f32.xlu2 %v3992_v1 }
 0xa09   : > { %v3975_v18 = vadd.f32 %v3974_v17, %v3961_v16 }
 0xa0b   : > { %v3989_v51 = vadd.f32 %v3988_v19, %v3975_v18 }
 0xa0d   : > { %v3993_v9 = vadd.f32 %v3989_v51, %v6448_v49 }
 0xa0f   : > { %3996 = vadd.xlane.f32.xlu1 %v3993_v9 }
 0xa7a   : > { %v3995_v61 = vpop.xlane.xlu2 %3994 }
 0xa7b   : > { %v3998_v20 = vmul.f32 %v3995_v61, %v6334_v62 }
 0xa7d   : > { %v4000_v21 = vsub.f32 %v3992_v1, %v3998_v20 }
 0xa7f   : > { %v4002_v22 = vmul.f32 %v4000_v21, %v4000_v21 }
 0xa81   : > { %4004 = vadd.xlane.f32.xlu0 %v4002_v22 }
 0xa82   : > { %v3997_v23 = vpop.xlane.xlu1 %3996 }
 0xa83   : > { %v3999_v53 = vmul.f32 %v3997_v23, %v6334_v62 }
 0xa85   : > { %v4001_v48 = vsub.f32 %v3993_v9, %v3999_v53 }
 0xa87   : > { %v4003_v24 = vmul.f32 %v4001_v48, %v4001_v48 }
 0xa89   : > { %4006 = vadd.xlane.f32.xlu2 %v4003_v24 }
 0xaf4   : > { %v4005_v25 = vpop.xlane.xlu0 %4004 }
 0xaf5   : > { %v4008_v26 = vmul.f32 %v4005_v25, %v6334_v62 }
 0xaf7   : > { %v4010_v27 = vadd.f32 1e-05, %v4008_v26 }
 0xaf9   : > { %5860 = vrsqrt.f32 %v4010_v27  ;;  %vm4018_vm13 = vweird.f32 %v4010_v27 }
 0xafc   : > { %v4007_v49 = vpop.xlane.xlu2 %4006 }
 0xafd   : > { %v4009_v28 = vmul.f32 %v4007_v49, %v6334_v62 }
 0xaff   : > { %v5861_v29 = vpop.eup %5860  ;;  %v4011_v30 = vadd.f32 1e-05, %v4009_v28 }
 0xb00   : > { %v4013_v31 = vmul.f32 %v5861_v29, %v4010_v27  ;;  %vm4019_vm12 = vweird.f32 %v5861_v29 }
 0xb01   : > { %5862 = vrsqrt.f32 %v4011_v30  ;;  %vm4020_vm14 = vmor %vm4018_vm13, %vm4019_vm12  ;;  %vm4028_vm0 = vweird.f32 %v4011_v30 }
 0xb02   : > { %v4014_v32 = vmul.f32 %v5861_v29, %v4013_v31 }
 0xb04   : > { %v4015_v33 = vmul.f32 0.5, %v4014_v32 }
 0xb06   : > { %v4016_v35 = vsub.f32 1.5, %v4015_v33 }
 0xb07   : > { %v5863_v36 = vpop.eup %5862 }
 0xb08   : > { %v4017_v4 = vmul.f32 %v5861_v29, %v4016_v35  ;;  %v4023_v37 = vmul.f32 %v5863_v36, %v4011_v30  ;;  %vm4029_vm15 = vweird.f32 %v5863_v36 }
 0xb09   : > { %vm4030_vm1 = vmor %vm4028_vm0, %vm4029_vm15 }
 0xb0a   : > { %v4021_v39 = vsel %vm4020_vm14, %v5861_v29, %v4017_v4  ;;  %v4024_v40 = vmul.f32 %v5863_v36, %v4023_v37 }
 0xb0b   : > { %v4032_v41 = vmul.f32 %v4021_v39, %v4000_v21 }
 0xb0c   : > { %v4025_v42 = vmul.f32 0.5, %v4024_v40 }
 0xb0d   : > { %v4035_v43 = vmul.f32 %v4034_v38, %v4032_v41 }
 0xb0e   : > { %v4026_v44 = vsub.f32 1.5, %v4025_v42 }
 0xb0f   : > { %v4038_v45 = vadd.f32 %v4037_v5, %v4035_v43 }
 0xb10   : > { %v4027_v46 = vmul.f32 %v5863_v36, %v4026_v44 }
 0xb11   : > { %4040 = vst [vmem:[#allocation2] sm:$0xff] %v4038_v45 }
 0xb12   : > { %v4031_v8 = vsel %vm4030_vm1, %v5863_v36, %v4027_v46 }
 0xb13   : > { %v4033_v47 = vmul.f32 %v4031_v8, %v4001_v48 }
 0xb15   : > { %v4036_v50 = vmul.f32 %v4034_v38, %v4033_v47  ;;  %4045 = sbr.rel (%p5480_p5) target bundleno = 3357 (0xd1d), region = 96 }
 0xb17   : > { %v4039_v52 = vadd.f32 %v4037_v5, %v4036_v50 }
 0xb19   : > { %4041 = vst [vmem:[#allocation2 + $0x8] sm:$0xff] %v4039_v52 }
 0xb1a   : > { %v4047_v13 = vrot.slane %v4038_v45, 7  ;;  %v4050_v55 = vrot.slane %v4039_v52, 6  ;;  %vm4052_vm2 = vcmask 1040384   ;;  %vm4056_vm3 = vcmask 1041408   ;;  %v4098_v57 = vld [vmem:[%s6867_s30 + $0x78] sm:$0xff]  ;;  %v4097_v60 = vld [vmem:[%s6867_s30 + $0x70] sm:$0xff] }
 0xb1b   : > { %4103 = vmatpush.msra.mxu0 %v4098_v57  ;;  %v4096_v10 = vld [vmem:[%s6867_s30 + $0x68] sm:$0xff]  ;;  %v4095_v63 = vld [vmem:[%s6867_s30 + $0x60] sm:$0xff]  ;;  %v4094_v11 = vld [vmem:[%s6867_s30 + $0x58] sm:$0xff]  ;;  %vm4123_vm7 = vcmask 17408   ;;  %vm4129_vm8 = vcmask 1024  }
 0xb1c   : > { %v4053_v7 = vsel %vm4052_vm2, %v4047_v13, %v4050_v55  ;;  %v4093_v12 = vld [vmem:[%s6867_s30 + $0x50] sm:$0xff]  ;;  %v4092_v6 = vld [vmem:[%s6867_s30 + $0x48] sm:$0xff]  ;;  %v4091_v14 = vld [vmem:[%s6867_s30 + $0x40] sm:$0xff] }
 0xb1d   : > { %v4057_v56 = vsel %vm4056_vm3, %v4053_v7, 0.0  ;;  %4104 = vmatpush.msra.mxu0 %v4097_v60  ;;  %v4090_v54 = vld [vmem:[%s6867_s30 + $0x38] sm:$0xff]  ;;  %v4089_v1 = vld [vmem:[%s6867_s30 + $0x30] sm:$0xff]  ;;  %v4088_v15 = vld [vmem:[%s6867_s30 + $0x28] sm:$0xff] }
 0xb1e   : > { %4058 = vadd.xlane.f32.xlu0 %v4057_v56  ;;  %v4087_v16 = vld [vmem:[%s6867_s30 + $0x20] sm:$0xff]  ;;  %v4086_v17 = vld [vmem:[%s6867_s30 + $0x18] sm:$0xff]  ;;  %v4085_v18 = vld [vmem:[%s6867_s30 + $0x10] sm:$0xff] }
 0xb1f   : > { %4105 = vmatpush.msra.mxu0 %v4096_v10  ;;  %v4084_v19 = vld [vmem:[%s6867_s30 + $0x8] sm:$0xff]  ;;  %v4083_v51 = vld [vmem:[%s6867_s30] sm:$0xff] }
 0xb20   : > { %v5864_v25 = vld [vmem:[%s6868_s23] ss:$0 sm:$0xff] }
 0xb21   : > { %4106 = vmatpush.msra.mxu0 %v4095_v63  ;;  %v5866_v29 = vld [vmem:[%s6869_s0] ss:$0 sm:$0xff] }
 0xb23   : > { %4107 = vmatpush.msra.mxu0 %v4094_v11 }
 0xb25   : > { %4108 = vmatpush.msra.mxu0 %v4093_v12 }
 0xb27   : > { %4109 = vmatpush.msra.mxu0 %v4092_v6 }
 0xb29   : > { %4110 = vmatpush.msra.mxu0 %v4091_v14 }
 0xb2b   : > { %4111 = vmatpush.msra.mxu0 %v4090_v54 }
 0xb2d   : > { %4112 = vmatpush.msra.mxu0 %v4089_v1 }
 0xb2f   : > { %4113 = vmatpush.msra.mxu0 %v4088_v15 }
 0xb31   : > { %4114 = vmatpush.msra.mxu0 %v4087_v16 }
 0xb33   : > { %4115 = vmatpush.msra.mxu0 %v4086_v17 }
 0xb35   : > { %4116 = vmatpush.msra.mxu0 %v4085_v18 }
 0xb37   : > { %4117 = vmatpush.msra.mxu0 %v4084_v19 }
 0xb39   : > { %4118 = vmatpush.msra.mxu0 %v4083_v51 }
 0xb91   : > { %v4059_v58 = vpop.xlane.xlu0 %4058 }
 0xb92   : > { %v4060_v0 = vmul.f32 %v4059_v58, %v6334_v62 }
 0xb94   : > { %v4061_v2 = vsub.f32 %v4053_v7, %v4060_v0 }
 0xb96   : > { %v4062_v3 = vmul.f32 %v4061_v2, %v4061_v2 }
 0xb98   : > { %v4063_v59 = vsel %vm4056_vm3, %v4062_v3, 0.0 }
 0xb99   : > { %4064 = vadd.xlane.f32.xlu0 %v4063_v59 }
 0xc0c   : > { %v4065_v9 = vpop.xlane.xlu0 %4064 }
 0xc0d   : > { %v4066_v61 = vmul.f32 %v4065_v9, %v6334_v62  ;;  %v5865_v62 = vld [vmem:[%s6868_s23 + $0x1] ss:$0 sm:$0xff] }
 0xc0f   : > { %v4067_v20 = vadd.f32 1e-05, %v4066_v61 }
 0xc11   : > { %5867 = vrsqrt.f32 %v4067_v20  ;;  %vm4074_vm5 = vweird.f32 %v4067_v20 }
 0xc17   : > { %v5868_v21 = vpop.eup %5867 }
 0xc18   : > { %v4069_v22 = vmul.f32 %v5868_v21, %v4067_v20  ;;  %vm4075_vm4 = vweird.f32 %v5868_v21 }
 0xc19   : > { %vm4076_vm6 = vmor %vm4074_vm5, %vm4075_vm4 }
 0xc1a   : > { %v4070_v23 = vmul.f32 %v5868_v21, %v4069_v22 }
 0xc1c   : > { %v4071_v53 = vmul.f32 0.5, %v4070_v23 }
 0xc1e   : > { %v4072_v48 = vsub.f32 1.5, %v4071_v53 }
 0xc20   : > { %v4073_v24 = vmul.f32 %v5868_v21, %v4072_v48 }
 0xc22   : > { %v4077_v26 = vsel %vm4076_vm6, %v5868_v21, %v4073_v24 }
 0xc23   : > { %v4078_v27 = vmul.f32 %v4077_v26, %v4061_v2 }
 0xc25   : > { %v4080_v49 = vmul.f32 %v5864_v25, %v4078_v27 }
 0xc27   : > { %v4082_v28 = vadd.f32 %v5865_v62, %v4080_v49 }
 0xc29   : > { %4119 = vmatmul.f32.vlgmr.msra.gmra.mxu0 %v4082_v28 }
 0xca6   : > { %v4120_v30 = vpop.f32.mrf.mxu0 }
 0xca7   : > { %v4121_v31 = vadd.f32 %v5866_v29, %v4120_v30 }
 0xca9   : > { %4124 = vst.msk [vmem:[#allocation3] sm:$0x3] %vm4123_vm7, %v4121_v31  ;;  %4126 = vrot.lane.b32.xlu1 %v4121_v31, %s5913_s4 }
 0xd1b   : > { %v4127_v32 = vpop.permute.xlu1 %4126 }
 0xd1c   : > { %4130 = vst.msk [vmem:[%s6870_s20] sm:$0x3] %vm4129_vm8, %v4127_v32 }
 0xd1d PF: > { %p5783_p6 = scmp.eq.s32.totalorder %s6016_s28, 1  ;;  %s5914_s17 = smov [#allocation3]  }
 0xd1e   : > { %s4137_s27 = sshll.u32 %s5914_s17, 4  ;;  %s6871_s6 = sld [smem:[#allocation16_spill]]  ;;  %s4138_s27 = int_to_ptr.vmem [resolvable:$true] %s4137_s27 }
 0xd24   : > { %s4139_s16 = sshll.u32 %s6871_s6, 4  ;;  %s4140_s16 = int_to_ptr.hbm [resolvable:$true] %s4139_s16 }
 0xd25   : > { %5780 = dma.vmem_to_hbm [thread:$0]  (%p5783_p6), %s4138_s27, 32, %s4140_s16, [#allocation4]  }
 0xd26   : > { %5902 = dma.done.wait (%p5783_p6), [#allocation4], 32  }
 0xd27   : > { %5904 = vsyncadd (%p5783_p6), [#allocation4], 4294967264 }
 0xd28 PF: > { %s6872_s15 = sld [smem:[#allocation6_spill]] }
 0xd2e   : > { %s30_s27 = sadd.s32 1, %s6872_s15  }
 0xd2f   : > { %p27_p7 = scmp.ge.s32.totalorder %s30_s27, 4  }
 0xd31   :  { %29 = sbr.rel (!%p27_p7) target bundleno = 13 (0xd), region = 158 }
 0xd36   :  { %4159 = vsyncpa [#allocation4], 1 }
 0xd37   :  { %4161 = vsyncpa [#allocation4 + $0x1], 1 }

</bundles_post_ra>
